<compile_context>
chip_gen: v6e
topology: v6e:2x2x1
jax: 0.10.0
libtpu: 0.0.40
codegen_flags: <defaults>
</compile_context>

<pallas_src>
import functools
import math

import jax
import jax.numpy as jnp
from jax.experimental import pallas as pl
from jax.experimental.pallas import tpu as pltpu


# ----------------------------- fused Pallas kernel ---------------------------------------

def _fused_encoder_kernel(x_ref,
                          wqkv_ref, bqkv_ref, wo_ref, bo_ref,
                          g1_ref, be1_ref, w1_ref, b1_ref, w2_ref, b2_ref,
                          g2_ref, be2_ref, wd_ref, bd_ref,
                          o_ref, x_vmem,
                          *, num_heads, seq_t, group_b):
    """One grid step = one nn.TransformerEncoderLayer (post-norm, ReLU FFN).

    The last grid step additionally applies the final Linear(D->1) + LeakyReLU(0.1).
    """
    layer = pl.program_id(0)
    n_layers = pl.num_programs(0)

    # Load activations into the resident VMEM scratch on the first layer only.
    @pl.when(layer == 0)
    def _():
        x_vmem[...] = x_ref[...]

    x = x_vmem[...]                                     # (M, D) f32, resident
    M, D = x.shape
    dh = D // num_heads
    scale = 1.0 / math.sqrt(dh)

    # ---- self attention, block-diagonal over t-groups of `group_b` rows ----
    xb = x.astype(jnp.bfloat16)
    qkv = jnp.dot(xb, wqkv_ref[0], preferred_element_type=jnp.float32) + bqkv_ref[0]
    q = qkv[:, 0 * D:1 * D].reshape(seq_t, group_b, D)
    k = qkv[:, 1 * D:2 * D].reshape(seq_t, group_b, D)
    v = qkv[:, 2 * D:3 * D].reshape(seq_t, group_b, D)

    # NOTE: heads remain a static Python loop (Mosaic dot_general is only reliably
    # batched over a single batch dim); the t-group batch axis already removes the
    # O(M^2) scores, the (M,M) iotas and the integer-div mask entirely.
    head_outs = []
    for h in range(num_heads):
        qh = q[:, :, h * dh:(h + 1) * dh] * scale        # (T, B, dh)
        kh = k[:, :, h * dh:(h + 1) * dh]
        vh = v[:, :, h * dh:(h + 1) * dh]
        s = jnp.einsum('tbd,tcd->tbc', qh, kh,
                       preferred_element_type=jnp.float32)   # (T, B, B)
        s = s - jnp.max(s, axis=-1, keepdims=True)
        p = jnp.exp(s)
        p = p * pl.reciprocal(jnp.sum(p, axis=-1, keepdims=True), approx=True)
        head_outs.append(jnp.einsum('tbc,tcd->tbd', p, vh,
                                    preferred_element_type=jnp.float32))
    attn = jnp.concatenate(head_outs, axis=-1).reshape(M, D)
    attn = jnp.dot(attn.astype(jnp.bfloat16), wo_ref[0],
                   preferred_element_type=jnp.float32) + bo_ref[0]

    # ---- residual + LayerNorm 1 (post-norm, eps=1e-5) ----
    x = x + attn
    mu = jnp.mean(x, axis=-1, keepdims=True)
    var = jnp.mean((x - mu) ** 2, axis=-1, keepdims=True)
    x = (x - mu) * jax.lax.rsqrt(var + 1e-5) * g1_ref[0] + be1_ref[0]

    # ---- feed-forward (ReLU, PyTorch default activation) ----
    h1 = jnp.dot(x.astype(jnp.bfloat16), w1_ref[0],
                 preferred_element_type=jnp.float32) + b1_ref[0]
    h1 = jnp.maximum(h1, 0.0)
    h2 = jnp.dot(h1.astype(jnp.bfloat16), w2_ref[0],
                 preferred_element_type=jnp.float32) + b2_ref[0]

    # ---- residual + LayerNorm 2 ----
    x = x + h2
    mu = jnp.mean(x, axis=-1, keepdims=True)
    var = jnp.mean((x - mu) ** 2, axis=-1, keepdims=True)
    x = (x - mu) * jax.lax.rsqrt(var + 1e-5) * g2_ref[0] + be2_ref[0]

    x_vmem[...] = x                                     # carry to next layer iteration

    # ---- fused final Linear(D -> 1) + LeakyReLU(0.1), lane-dense (1, M) output ----
    @pl.when(layer == n_layers - 1)
    def _():
        y = jax.lax.dot_general(wd_ref[...], x, (((1,), (1,)), ((), ())),
                                preferred_element_type=jnp.float32) + bd_ref[...]
        o_ref[...] = jnp.where(y >= 0.0, y, 0.1 * y)


# ----------------------------- wrapper ----------------------------------------------------

def attn_model_forward(tokens, params, *, num_heads):
    """tokens: (B, num_in_features, T) int32 -> (B, T, 1) float32."""
    B, NF, T = tokens.shape
    # Embedding lookup + concat (glue, plain JAX gather).
    embs = [jnp.take(params['emb'][i], tokens[:, i, :], axis=0) for i in range(NF)]
    z = jnp.concatenate(embs, axis=-1)                          # (B, T, D)
    D = z.shape[-1]
    # Flatten to (T*B, D): rows grouped by t (group size B) -> matches batch_first=False.
    x = jnp.transpose(z, (1, 0, 2)).reshape(T * B, D).astype(jnp.float32)

    L = params['w_qkv'].shape[0]
    FF = params['w_ff1'].shape[-1]
    M = T * B

    grid_spec = pltpu.PrefetchScalarGridSpec(
        num_scalar_prefetch=0,
        grid=(L,),                                              # layer axis (sequential)
        in_specs=[
            pl.BlockSpec((M, D), lambda l: (0, 0)),             # x (DMA'd once, resident)
            pl.BlockSpec((1, D, 3 * D), lambda l: (l, 0, 0)),   # w_qkv
            pl.BlockSpec((1, 1, 3 * D), lambda l: (l, 0, 0)),   # b_qkv
            pl.BlockSpec((1, D, D), lambda l: (l, 0, 0)),       # w_o
            pl.BlockSpec((1, 1, D), lambda l: (l, 0, 0)),       # b_o
            pl.BlockSpec((1, 1, D), lambda l: (l, 0, 0)),       # ln1_g
            pl.BlockSpec((1, 1, D), lambda l: (l, 0, 0)),       # ln1_b
            pl.BlockSpec((1, D, FF), lambda l: (l, 0, 0)),      # w_ff1
            pl.BlockSpec((1, 1, FF), lambda l: (l, 0, 0)),      # b_ff1
            pl.BlockSpec((1, FF, D), lambda l: (l, 0, 0)),      # w_ff2
            pl.BlockSpec((1, 1, D), lambda l: (l, 0, 0)),       # b_ff2
            pl.BlockSpec((1, 1, D), lambda l: (l, 0, 0)),       # ln2_g
            pl.BlockSpec((1, 1, D), lambda l: (l, 0, 0)),       # ln2_b
            pl.BlockSpec((1, D), lambda l: (0, 0)),             # dense_w
            pl.BlockSpec((1, 1), lambda l: (0, 0)),             # dense_b
        ],
        out_specs=pl.BlockSpec((1, M), lambda l: (0, 0)),
        scratch_shapes=[pltpu.VMEM((M, D), jnp.float32)],       # resident activations
    )

    y = pl.pallas_call(
        functools.partial(_fused_encoder_kernel,
                          num_heads=num_heads, seq_t=T, group_b=B),
        out_shape=jax.ShapeDtypeStruct((1, M), jnp.float32),
        grid_spec=grid_spec,
        compiler_params=pltpu.CompilerParams(
            dimension_semantics=("arbitrary",),    # layer axis carries state
            vmem_limit_bytes=32 * 1024 * 1024,     # explicit (v5e scoped default is 16 MiB)
        ),
    )(x,
      params['w_qkv'], params['b_qkv'], params['w_o'], params['b_o'],
      params['ln1_g'], params['ln1_b'], params['w_ff1'], params['b_ff1'],
      params['w_ff2'], params['b_ff2'], params['ln2_g'], params['ln2_b'],
      params['dense_w'], params['dense_b'])

    # y is (1, T*B) with columns t-major -> (B, T, 1).
    return jnp.transpose(y.reshape(T, B), (1, 0))[:, :, None]


# ----------------------------- deterministic params --------------------------------------

def init_params(key, *, vocab_size, model_dim, num_in_features, num_layers, ff_dim):
    D = model_dim * num_in_features

    def nxt():
        nonlocal key
        key, sub = jax.random.split(key)
        return sub

    def w(shape, scale=0.02):
        # Weights stored as bf16 (halves HBM traffic; MXU-native). Accumulation stays f32.
        return (scale * jax.random.normal(nxt(), (num_layers,) + shape,
                                          jnp.float32)).astype(jnp.bfloat16)

    params = {
        'emb': [jax.random.normal(nxt(), (vocab_size, model_dim), jnp.float32)
                for _ in range(num_in_features)],
        # Per-layer weights stacked along a leading L axis (streamed by the layer grid).
        'w_qkv': w((D, 3 * D)),
        'b_qkv': jnp.zeros((num_layers, 1, 3 * D), jnp.float32),
        'w_o':   w((D, D)),
        'b_o':   jnp.zeros((num_layers, 1, D), jnp.float32),
        'ln1_g': jnp.ones((num_layers, 1, D), jnp.float32),
        'ln1_b': jnp.zeros((num_layers, 1, D), jnp.float32),
        'w_ff1': w((D, ff_dim)),
        'b_ff1': jnp.zeros((num_layers, 1, ff_dim), jnp.float32),
        'w_ff2': w((ff_dim, D)),
        'b_ff2': jnp.zeros((num_layers, 1, D), jnp.float32),
        'ln2_g': jnp.ones((num_layers, 1, D), jnp.float32),
        'ln2_b': jnp.zeros((num_layers, 1, D), jnp.float32),
        'dense_w': 0.02 * jax.random.normal(nxt(), (1, D), jnp.float32),
        'dense_b': jnp.zeros((1, 1), jnp.float32),
    }
    return params


# ----------------------------- main --------------------------------------------------------

if __name__ == "__main__":
    hyper = {
        'vocab_size': 100,
        'model_dim': 64,
        'num_in_features': 2,     # -> d_model = 128
        'num_heads': 4,
        'num_encoder_layers': 2,
    }
    FF_DIM = 2048                 # nn.TransformerEncoderLayer default dim_feedforward
    B, T = 2, 8                   # batch, token sequence length

    key = jax.random.PRNGKey(0)
    pkey, tkey = jax.random.split(key)
    params = init_params(pkey,
                         vocab_size=hyper['vocab_size'],
                         model_dim=hyper['model_dim'],
                         num_in_features=hyper['num_in_features'],
                         num_layers=hyper['num_encoder_layers'],
                         ff_dim=FF_DIM)

    tokens = jax.random.randint(tkey, (B, hyper['num_in_features'], T),
                                0, hyper['vocab_size'], dtype=jnp.int32)

    out = attn_model_forward(tokens, params, num_heads=hyper['num_heads'])
    out = jax.block_until_ready(out)
    assert out.shape == (B, T, 1), out.shape
    assert bool(jnp.all(jnp.isfinite(out)))
    print("KERNEL_OK")
</pallas_src>

<mosaic_0001>
module attributes {stable_mosaic.version = 11 : i64} {
  func.func @_fused_encoder_kernel(%arg0: i32, %arg1: memref<16x128xf32, #tpu.memory_space<vmem>>, %arg2: memref<1x128x384xbf16, #tpu.memory_space<vmem>>, %arg3: memref<1x1x384xf32, #tpu.memory_space<vmem>>, %arg4: memref<1x128x128xbf16, #tpu.memory_space<vmem>>, %arg5: memref<1x1x128xf32, #tpu.memory_space<vmem>>, %arg6: memref<1x1x128xf32, #tpu.memory_space<vmem>>, %arg7: memref<1x1x128xf32, #tpu.memory_space<vmem>>, %arg8: memref<1x128x2048xbf16, #tpu.memory_space<vmem>>, %arg9: memref<1x1x2048xf32, #tpu.memory_space<vmem>>, %arg10: memref<1x2048x128xbf16, #tpu.memory_space<vmem>>, %arg11: memref<1x1x128xf32, #tpu.memory_space<vmem>>, %arg12: memref<1x1x128xf32, #tpu.memory_space<vmem>>, %arg13: memref<1x1x128xf32, #tpu.memory_space<vmem>>, %arg14: memref<1x128xf32, #tpu.memory_space<vmem>>, %arg15: memref<1x1xf32, #tpu.memory_space<vmem>>, %arg16: memref<1x16xf32, #tpu.memory_space<vmem>>, %arg17: memref<16x128xf32, #tpu.memory_space<vmem>>) attributes {dimension_semantics = [#tpu.dimension_semantics<arbitrary>], iteration_bounds = array<i64: 2>, scalar_prefetch = 0 : i64, scratch_operands = 1 : i64, tpu.core_type = #tpu.core_type<tc>, window_params = [{pipeline_mode = #tpu.pipeline_mode<synchronous>, transform_indices = @transform_0, window_bounds = array<i64: 16, 128>}, {transform_indices = @transform_1, window_bounds = array<i64: 1, 128, 384>}, {transform_indices = @transform_2, window_bounds = array<i64: 1, 1, 384>}, {transform_indices = @transform_3, window_bounds = array<i64: 1, 128, 128>}, {transform_indices = @transform_4, window_bounds = array<i64: 1, 1, 128>}, {transform_indices = @transform_5, window_bounds = array<i64: 1, 1, 128>}, {transform_indices = @transform_6, window_bounds = array<i64: 1, 1, 128>}, {transform_indices = @transform_7, window_bounds = array<i64: 1, 128, 2048>}, {transform_indices = @transform_8, window_bounds = array<i64: 1, 1, 2048>}, {transform_indices = @transform_9, window_bounds = array<i64: 1, 2048, 128>}, {transform_indices = @transform_10, window_bounds = array<i64: 1, 1, 128>}, {transform_indices = @transform_11, window_bounds = array<i64: 1, 1, 128>}, {transform_indices = @transform_12, window_bounds = array<i64: 1, 1, 128>}, {pipeline_mode = #tpu.pipeline_mode<synchronous>, transform_indices = @transform_13, window_bounds = array<i64: 1, 128>}, {pipeline_mode = #tpu.pipeline_mode<synchronous>, transform_indices = @transform_14, window_bounds = array<i64: 1, 1>}, {pipeline_mode = #tpu.pipeline_mode<synchronous>, transform_indices = @transform_15, window_bounds = array<i64: 1, 16>}]} {
    %c0_i32 = arith.constant 0 : i32
    %0 = arith.cmpi eq, %arg0, %c0_i32 : i32
    %1 = arith.extui %0 : i1 to i32
    %c0_i32_0 = arith.constant 0 : i32
    %2 = arith.cmpi ne, %1, %c0_i32_0 : i32
    scf.if %2 {
      %c0_75 = arith.constant 0 : index
      %c0_76 = arith.constant 0 : index
      %172 = vector.load %arg1[%c0_75, %c0_76] : memref<16x128xf32, #tpu.memory_space<vmem>>, vector<16x128xf32>
      %c0_77 = arith.constant 0 : index
      %c0_78 = arith.constant 0 : index
      %173 = vector.load %arg17[%c0_77, %c0_78] : memref<16x128xf32, #tpu.memory_space<vmem>>, vector<16x128xf32>
      tpu.vector_store %arg17[%c0_77, %c0_78], %172 {strides = array<i32>} : memref<16x128xf32, #tpu.memory_space<vmem>>, vector<16x128xf32>,
    } else {
    }
    %c0 = arith.constant 0 : index
    %c0_1 = arith.constant 0 : index
    %3 = vector.load %arg17[%c0, %c0_1] : memref<16x128xf32, #tpu.memory_space<vmem>>, vector<16x128xf32>
    %4 = arith.truncf %3 : vector<16x128xf32> to vector<16x128xbf16>
    %c0_2 = arith.constant 0 : index
    %c0_3 = arith.constant 0 : index
    %c0_4 = arith.constant 0 : index
    %5 = vector.load %arg2[%c0_2, %c0_3, %c0_4] : memref<1x128x384xbf16, #tpu.memory_space<vmem>>, vector<1x128x384xbf16>
    %6 = vector.shape_cast %5 : vector<1x128x384xbf16> to vector<128x384xbf16>
    %cst = arith.constant dense<0.000000e+00> : vector<16x384xf32>
    %7 = tpu.matmul %4, %6, %cst {dimension_numbers = #tpu.dot_dimension_numbers<[1], [0], [0], [1], [0, 0, 1, 1], [], []>} : vector<16x128xbf16>, vector<128x384xbf16>, vector<16x384xf32> -> vector<16x384xf32>
    %c0_5 = arith.constant 0 : index
    %c0_6 = arith.constant 0 : index
    %c0_7 = arith.constant 0 : index
    %8 = vector.load %arg3[%c0_5, %c0_6, %c0_7] : memref<1x1x384xf32, #tpu.memory_space<vmem>>, vector<1x1x384xf32>
    %9 = vector.shape_cast %8 : vector<1x1x384xf32> to vector<1x384xf32>
    %10 = vector.broadcast %9 : vector<1x384xf32> to vector<16x384xf32>
    %11 = arith.addf %7, %10 : vector<16x384xf32>
    %12 = vector.extract_strided_slice %11 {offsets = [0, 0], sizes = [16, 128], strides = [1, 1]} : vector<16x384xf32> to vector<16x128xf32>
    %13 = vector.shape_cast %12 : vector<16x128xf32> to vector<8x2x128xf32>
    %14 = vector.extract_strided_slice %11 {offsets = [0, 128], sizes = [16, 128], strides = [1, 1]} : vector<16x384xf32> to vector<16x128xf32>
    %15 = vector.shape_cast %14 : vector<16x128xf32> to vector<8x2x128xf32>
    %16 = vector.extract_strided_slice %11 {offsets = [0, 256], sizes = [16, 128], strides = [1, 1]} : vector<16x384xf32> to vector<16x128xf32>
    %17 = vector.shape_cast %16 : vector<16x128xf32> to vector<8x2x128xf32>
    %18 = vector.extract_strided_slice %13 {offsets = [0, 0, 0], sizes = [8, 2, 32], strides = [1, 1, 1]} : vector<8x2x128xf32> to vector<8x2x32xf32>
    %cst_8 = arith.constant 0.176776692 : f32
    %19 = vector.broadcast %cst_8 : f32 to vector<8x2x32xf32>
    %20 = arith.mulf %18, %19 : vector<8x2x32xf32>
    %21 = vector.extract_strided_slice %15 {offsets = [0, 0, 0], sizes = [8, 2, 32], strides = [1, 1, 1]} : vector<8x2x128xf32> to vector<8x2x32xf32>
    %22 = vector.extract_strided_slice %17 {offsets = [0, 0, 0], sizes = [8, 2, 32], strides = [1, 1, 1]} : vector<8x2x128xf32> to vector<8x2x32xf32>
    "tpu.trace_start"() <{level = 10 : i32, message = "tbd,tcd->tbc"}> : () -> ()
    %cst_9 = arith.constant dense<0.000000e+00> : vector<8x2x2xf32>
    %23 = tpu.matmul %20, %21, %cst_9 {dimension_numbers = #tpu.dot_dimension_numbers<[2], [2], [1], [1], [0, 0, 0, 1, 1, 1], [0], [0]>} : vector<8x2x32xf32>, vector<8x2x32xf32>, vector<8x2x2xf32> -> vector<8x2x2xf32>
    "tpu.trace_stop"() : () -> ()
    %cst_10 = arith.constant dense<0xFF800000> : vector<8x2xf32>
    %24 = vector.multi_reduction <maximumf>, %23, %cst_10 [2] : vector<8x2x2xf32> to vector<8x2xf32>
    %25 = vector.shape_cast %24 : vector<8x2xf32> to vector<8x2x1xf32>
    %26 = vector.broadcast %25 : vector<8x2x1xf32> to vector<8x2x2xf32>
    %27 = arith.subf %23, %26 : vector<8x2x2xf32>
    %28 = math.exp %27 : vector<8x2x2xf32>
    %cst_11 = arith.constant dense<0.000000e+00> : vector<8x2xf32>
    %29 = vector.multi_reduction <add>, %28, %cst_11 [2] : vector<8x2x2xf32> to vector<8x2xf32>
    %30 = vector.shape_cast %29 : vector<8x2xf32> to vector<8x2x1xf32>
    %31 = tpu.reciprocal %30 {approx = true} : vector<8x2x1xf32> -> vector<8x2x1xf32>
    %32 = vector.broadcast %31 : vector<8x2x1xf32> to vector<8x2x2xf32>
    %33 = arith.mulf %28, %32 : vector<8x2x2xf32>
    "tpu.trace_start"() <{level = 10 : i32, message = "tbc,tcd->tbd"}> : () -> ()
    %cst_12 = arith.constant dense<0.000000e+00> : vector<8x2x32xf32>
    %34 = tpu.matmul %33, %22, %cst_12 {dimension_numbers = #tpu.dot_dimension_numbers<[2], [1], [1], [2], [0, 0, 0, 1, 1, 2], [0], [0]>} : vector<8x2x2xf32>, vector<8x2x32xf32>, vector<8x2x32xf32> -> vector<8x2x32xf32>
    "tpu.trace_stop"() : () -> ()
    %35 = vector.extract_strided_slice %13 {offsets = [0, 0, 32], sizes = [8, 2, 32], strides = [1, 1, 1]} : vector<8x2x128xf32> to vector<8x2x32xf32>
    %cst_13 = arith.constant 0.176776692 : f32
    %36 = vector.broadcast %cst_13 : f32 to vector<8x2x32xf32>
    %37 = arith.mulf %35, %36 : vector<8x2x32xf32>
    %38 = vector.extract_strided_slice %15 {offsets = [0, 0, 32], sizes = [8, 2, 32], strides = [1, 1, 1]} : vector<8x2x128xf32> to vector<8x2x32xf32>
    %39 = vector.extract_strided_slice %17 {offsets = [0, 0, 32], sizes = [8, 2, 32], strides = [1, 1, 1]} : vector<8x2x128xf32> to vector<8x2x32xf32>
    "tpu.trace_start"() <{level = 10 : i32, message = "tbd,tcd->tbc"}> : () -> ()
    %cst_14 = arith.constant dense<0.000000e+00> : vector<8x2x2xf32>
    %40 = tpu.matmul %37, %38, %cst_14 {dimension_numbers = #tpu.dot_dimension_numbers<[2], [2], [1], [1], [0, 0, 0, 1, 1, 1], [0], [0]>} : vector<8x2x32xf32>, vector<8x2x32xf32>, vector<8x2x2xf32> -> vector<8x2x2xf32>
    "tpu.trace_stop"() : () -> ()
    %cst_15 = arith.constant dense<0xFF800000> : vector<8x2xf32>
    %41 = vector.multi_reduction <maximumf>, %40, %cst_15 [2] : vector<8x2x2xf32> to vector<8x2xf32>
    %42 = vector.shape_cast %41 : vector<8x2xf32> to vector<8x2x1xf32>
    %43 = vector.broadcast %42 : vector<8x2x1xf32> to vector<8x2x2xf32>
    %44 = arith.subf %40, %43 : vector<8x2x2xf32>
    %45 = math.exp %44 : vector<8x2x2xf32>
    %cst_16 = arith.constant dense<0.000000e+00> : vector<8x2xf32>
    %46 = vector.multi_reduction <add>, %45, %cst_16 [2] : vector<8x2x2xf32> to vector<8x2xf32>
    %47 = vector.shape_cast %46 : vector<8x2xf32> to vector<8x2x1xf32>
    %48 = tpu.reciprocal %47 {approx = true} : vector<8x2x1xf32> -> vector<8x2x1xf32>
    %49 = vector.broadcast %48 : vector<8x2x1xf32> to vector<8x2x2xf32>
    %50 = arith.mulf %45, %49 : vector<8x2x2xf32>
    "tpu.trace_start"() <{level = 10 : i32, message = "tbc,tcd->tbd"}> : () -> ()
    %cst_17 = arith.constant dense<0.000000e+00> : vector<8x2x32xf32>
    %51 = tpu.matmul %50, %39, %cst_17 {dimension_numbers = #tpu.dot_dimension_numbers<[2], [1], [1], [2], [0, 0, 0, 1, 1, 2], [0], [0]>} : vector<8x2x2xf32>, vector<8x2x32xf32>, vector<8x2x32xf32> -> vector<8x2x32xf32>
    "tpu.trace_stop"() : () -> ()
    %52 = vector.extract_strided_slice %13 {offsets = [0, 0, 64], sizes = [8, 2, 32], strides = [1, 1, 1]} : vector<8x2x128xf32> to vector<8x2x32xf32>
    %cst_18 = arith.constant 0.176776692 : f32
    %53 = vector.broadcast %cst_18 : f32 to vector<8x2x32xf32>
    %54 = arith.mulf %52, %53 : vector<8x2x32xf32>
    %55 = vector.extract_strided_slice %15 {offsets = [0, 0, 64], sizes = [8, 2, 32], strides = [1, 1, 1]} : vector<8x2x128xf32> to vector<8x2x32xf32>
    %56 = vector.extract_strided_slice %17 {offsets = [0, 0, 64], sizes = [8, 2, 32], strides = [1, 1, 1]} : vector<8x2x128xf32> to vector<8x2x32xf32>
    "tpu.trace_start"() <{level = 10 : i32, message = "tbd,tcd->tbc"}> : () -> ()
    %cst_19 = arith.constant dense<0.000000e+00> : vector<8x2x2xf32>
    %57 = tpu.matmul %54, %55, %cst_19 {dimension_numbers = #tpu.dot_dimension_numbers<[2], [2], [1], [1], [0, 0, 0, 1, 1, 1], [0], [0]>} : vector<8x2x32xf32>, vector<8x2x32xf32>, vector<8x2x2xf32> -> vector<8x2x2xf32>
    "tpu.trace_stop"() : () -> ()
    %cst_20 = arith.constant dense<0xFF800000> : vector<8x2xf32>
    %58 = vector.multi_reduction <maximumf>, %57, %cst_20 [2] : vector<8x2x2xf32> to vector<8x2xf32>
    %59 = vector.shape_cast %58 : vector<8x2xf32> to vector<8x2x1xf32>
    %60 = vector.broadcast %59 : vector<8x2x1xf32> to vector<8x2x2xf32>
    %61 = arith.subf %57, %60 : vector<8x2x2xf32>
    %62 = math.exp %61 : vector<8x2x2xf32>
    %cst_21 = arith.constant dense<0.000000e+00> : vector<8x2xf32>
    %63 = vector.multi_reduction <add>, %62, %cst_21 [2] : vector<8x2x2xf32> to vector<8x2xf32>
    %64 = vector.shape_cast %63 : vector<8x2xf32> to vector<8x2x1xf32>
    %65 = tpu.reciprocal %64 {approx = true} : vector<8x2x1xf32> -> vector<8x2x1xf32>
    %66 = vector.broadcast %65 : vector<8x2x1xf32> to vector<8x2x2xf32>
    %67 = arith.mulf %62, %66 : vector<8x2x2xf32>
    "tpu.trace_start"() <{level = 10 : i32, message = "tbc,tcd->tbd"}> : () -> ()
    %cst_22 = arith.constant dense<0.000000e+00> : vector<8x2x32xf32>
    %68 = tpu.matmul %67, %56, %cst_22 {dimension_numbers = #tpu.dot_dimension_numbers<[2], [1], [1], [2], [0, 0, 0, 1, 1, 2], [0], [0]>} : vector<8x2x2xf32>, vector<8x2x32xf32>, vector<8x2x32xf32> -> vector<8x2x32xf32>
    "tpu.trace_stop"() : () -> ()
    %69 = vector.extract_strided_slice %13 {offsets = [0, 0, 96], sizes = [8, 2, 32], strides = [1, 1, 1]} : vector<8x2x128xf32> to vector<8x2x32xf32>
    %cst_23 = arith.constant 0.176776692 : f32
    %70 = vector.broadcast %cst_23 : f32 to vector<8x2x32xf32>
    %71 = arith.mulf %69, %70 : vector<8x2x32xf32>
    %72 = vector.extract_strided_slice %15 {offsets = [0, 0, 96], sizes = [8, 2, 32], strides = [1, 1, 1]} : vector<8x2x128xf32> to vector<8x2x32xf32>
    %73 = vector.extract_strided_slice %17 {offsets = [0, 0, 96], sizes = [8, 2, 32], strides = [1, 1, 1]} : vector<8x2x128xf32> to vector<8x2x32xf32>
    "tpu.trace_start"() <{level = 10 : i32, message = "tbd,tcd->tbc"}> : () -> ()
    %cst_24 = arith.constant dense<0.000000e+00> : vector<8x2x2xf32>
    %74 = tpu.matmul %71, %72, %cst_24 {dimension_numbers = #tpu.dot_dimension_numbers<[2], [2], [1], [1], [0, 0, 0, 1, 1, 1], [0], [0]>} : vector<8x2x32xf32>, vector<8x2x32xf32>, vector<8x2x2xf32> -> vector<8x2x2xf32>
    "tpu.trace_stop"() : () -> ()
    %cst_25 = arith.constant dense<0xFF800000> : vector<8x2xf32>
    %75 = vector.multi_reduction <maximumf>, %74, %cst_25 [2] : vector<8x2x2xf32> to vector<8x2xf32>
    %76 = vector.shape_cast %75 : vector<8x2xf32> to vector<8x2x1xf32>
    %77 = vector.broadcast %76 : vector<8x2x1xf32> to vector<8x2x2xf32>
    %78 = arith.subf %74, %77 : vector<8x2x2xf32>
    %79 = math.exp %78 : vector<8x2x2xf32>
    %cst_26 = arith.constant dense<0.000000e+00> : vector<8x2xf32>
    %80 = vector.multi_reduction <add>, %79, %cst_26 [2] : vector<8x2x2xf32> to vector<8x2xf32>
    %81 = vector.shape_cast %80 : vector<8x2xf32> to vector<8x2x1xf32>
    %82 = tpu.reciprocal %81 {approx = true} : vector<8x2x1xf32> -> vector<8x2x1xf32>
    %83 = vector.broadcast %82 : vector<8x2x1xf32> to vector<8x2x2xf32>
    %84 = arith.mulf %79, %83 : vector<8x2x2xf32>
    "tpu.trace_start"() <{level = 10 : i32, message = "tbc,tcd->tbd"}> : () -> ()
    %cst_27 = arith.constant dense<0.000000e+00> : vector<8x2x32xf32>
    %85 = tpu.matmul %84, %73, %cst_27 {dimension_numbers = #tpu.dot_dimension_numbers<[2], [1], [1], [2], [0, 0, 0, 1, 1, 2], [0], [0]>} : vector<8x2x2xf32>, vector<8x2x32xf32>, vector<8x2x32xf32> -> vector<8x2x32xf32>
    "tpu.trace_stop"() : () -> ()
    %86 = tpu.concatenate %34, %51, %68, %85 in 2 : vector<8x2x32xf32>, vector<8x2x32xf32>, vector<8x2x32xf32>, vector<8x2x32xf32> -> vector<8x2x128xf32>
    %87 = vector.shape_cast %86 : vector<8x2x128xf32> to vector<16x128xf32>
    %88 = arith.truncf %87 : vector<16x128xf32> to vector<16x128xbf16>
    %c0_28 = arith.constant 0 : index
    %c0_29 = arith.constant 0 : index
    %c0_30 = arith.constant 0 : index
    %89 = vector.load %arg4[%c0_28, %c0_29, %c0_30] : memref<1x128x128xbf16, #tpu.memory_space<vmem>>, vector<1x128x128xbf16>
    %90 = vector.shape_cast %89 : vector<1x128x128xbf16> to vector<128x128xbf16>
    %cst_31 = arith.constant dense<0.000000e+00> : vector<16x128xf32>
    %91 = tpu.matmul %88, %90, %cst_31 {dimension_numbers = #tpu.dot_dimension_numbers<[1], [0], [0], [1], [0, 0, 1, 1], [], []>} : vector<16x128xbf16>, vector<128x128xbf16>, vector<16x128xf32> -> vector<16x128xf32>
    %c0_32 = arith.constant 0 : index
    %c0_33 = arith.constant 0 : index
    %c0_34 = arith.constant 0 : index
    %92 = vector.load %arg5[%c0_32, %c0_33, %c0_34] : memref<1x1x128xf32, #tpu.memory_space<vmem>>, vector<1x1x128xf32>
    %93 = vector.shape_cast %92 : vector<1x1x128xf32> to vector<1x128xf32>
    %94 = vector.broadcast %93 : vector<1x128xf32> to vector<16x128xf32>
    %95 = arith.addf %91, %94 : vector<16x128xf32>
    %96 = arith.addf %3, %95 : vector<16x128xf32>
    %cst_35 = arith.constant dense<0.000000e+00> : vector<16xf32>
    %97 = vector.multi_reduction <add>, %96, %cst_35 [1] : vector<16x128xf32> to vector<16xf32>
    %98 = vector.shape_cast %97 : vector<16xf32> to vector<16x1xf32>
    %cst_36 = arith.constant 1.280000e+02 : f32
    %99 = vector.broadcast %cst_36 : f32 to vector<16x1xf32>
    %100 = arith.divf %98, %99 : vector<16x1xf32>
    %101 = vector.broadcast %100 : vector<16x1xf32> to vector<16x128xf32>
    %102 = arith.subf %96, %101 : vector<16x128xf32>
    %103 = arith.mulf %102, %102 : vector<16x128xf32>
    %cst_37 = arith.constant dense<0.000000e+00> : vector<16xf32>
    %104 = vector.multi_reduction <add>, %103, %cst_37 [1] : vector<16x128xf32> to vector<16xf32>
    %105 = vector.shape_cast %104 : vector<16xf32> to vector<16x1xf32>
    %cst_38 = arith.constant 1.280000e+02 : f32
    %106 = vector.broadcast %cst_38 : f32 to vector<16x1xf32>
    %107 = arith.divf %105, %106 : vector<16x1xf32>
    %108 = vector.broadcast %100 : vector<16x1xf32> to vector<16x128xf32>
    %109 = arith.subf %96, %108 : vector<16x128xf32>
    %cst_39 = arith.constant 9.99999974E-6 : f32
    %110 = vector.broadcast %cst_39 : f32 to vector<16x1xf32>
    %111 = arith.addf %107, %110 : vector<16x1xf32>
    %112 = math.rsqrt %111 : vector<16x1xf32>
    %113 = vector.broadcast %112 : vector<16x1xf32> to vector<16x128xf32>
    %114 = arith.mulf %109, %113 : vector<16x128xf32>
    %c0_40 = arith.constant 0 : index
    %c0_41 = arith.constant 0 : index
    %c0_42 = arith.constant 0 : index
    %115 = vector.load %arg6[%c0_40, %c0_41, %c0_42] : memref<1x1x128xf32, #tpu.memory_space<vmem>>, vector<1x1x128xf32>
    %116 = vector.shape_cast %115 : vector<1x1x128xf32> to vector<1x128xf32>
    %117 = vector.broadcast %116 : vector<1x128xf32> to vector<16x128xf32>
    %118 = arith.mulf %114, %117 : vector<16x128xf32>
    %c0_43 = arith.constant 0 : index
    %c0_44 = arith.constant 0 : index
    %c0_45 = arith.constant 0 : index
    %119 = vector.load %arg7[%c0_43, %c0_44, %c0_45] : memref<1x1x128xf32, #tpu.memory_space<vmem>>, vector<1x1x128xf32>
    %120 = vector.shape_cast %119 : vector<1x1x128xf32> to vector<1x128xf32>
    %121 = vector.broadcast %120 : vector<1x128xf32> to vector<16x128xf32>
    %122 = arith.addf %118, %121 : vector<16x128xf32>
    %123 = arith.truncf %122 : vector<16x128xf32> to vector<16x128xbf16>
    %c0_46 = arith.constant 0 : index
    %c0_47 = arith.constant 0 : index
    %c0_48 = arith.constant 0 : index
    %124 = vector.load %arg8[%c0_46, %c0_47, %c0_48] : memref<1x128x2048xbf16, #tpu.memory_space<vmem>>, vector<1x128x2048xbf16>
    %125 = vector.shape_cast %124 : vector<1x128x2048xbf16> to vector<128x2048xbf16>
    %cst_49 = arith.constant dense<0.000000e+00> : vector<16x2048xf32>
    %126 = tpu.matmul %123, %125, %cst_49 {dimension_numbers = #tpu.dot_dimension_numbers<[1], [0], [0], [1], [0, 0, 1, 1], [], []>} : vector<16x128xbf16>, vector<128x2048xbf16>, vector<16x2048xf32> -> vector<16x2048xf32>
    %c0_50 = arith.constant 0 : index
    %c0_51 = arith.constant 0 : index
    %c0_52 = arith.constant 0 : index
    %127 = vector.load %arg9[%c0_50, %c0_51, %c0_52] : memref<1x1x2048xf32, #tpu.memory_space<vmem>>, vector<1x1x2048xf32>
    %128 = vector.shape_cast %127 : vector<1x1x2048xf32> to vector<1x2048xf32>
    %129 = vector.broadcast %128 : vector<1x2048xf32> to vector<16x2048xf32>
    %130 = arith.addf %126, %129 : vector<16x2048xf32>
    %cst_53 = arith.constant 0.000000e+00 : f32
    %131 = vector.broadcast %cst_53 : f32 to vector<16x2048xf32>
    %132 = arith.maximumf %130, %131 : vector<16x2048xf32>
    %133 = arith.truncf %132 : vector<16x2048xf32> to vector<16x2048xbf16>
    %c0_54 = arith.constant 0 : index
    %c0_55 = arith.constant 0 : index
    %c0_56 = arith.constant 0 : index
    %134 = vector.load %arg10[%c0_54, %c0_55, %c0_56] : memref<1x2048x128xbf16, #tpu.memory_space<vmem>>, vector<1x2048x128xbf16>
    %135 = vector.shape_cast %134 : vector<1x2048x128xbf16> to vector<2048x128xbf16>
    %cst_57 = arith.constant dense<0.000000e+00> : vector<16x128xf32>
    %136 = tpu.matmul %133, %135, %cst_57 {dimension_numbers = #tpu.dot_dimension_numbers<[1], [0], [0], [1], [0, 0, 1, 1], [], []>} : vector<16x2048xbf16>, vector<2048x128xbf16>, vector<16x128xf32> -> vector<16x128xf32>
    %c0_58 = arith.constant 0 : index
    %c0_59 = arith.constant 0 : index
    %c0_60 = arith.constant 0 : index
    %137 = vector.load %arg11[%c0_58, %c0_59, %c0_60] : memref<1x1x128xf32, #tpu.memory_space<vmem>>, vector<1x1x128xf32>
    %138 = vector.shape_cast %137 : vector<1x1x128xf32> to vector<1x128xf32>
    %139 = vector.broadcast %138 : vector<1x128xf32> to vector<16x128xf32>
    %140 = arith.addf %136, %139 : vector<16x128xf32>
    %141 = arith.addf %122, %140 : vector<16x128xf32>
    %cst_61 = arith.constant dense<0.000000e+00> : vector<16xf32>
    %142 = vector.multi_reduction <add>, %141, %cst_61 [1] : vector<16x128xf32> to vector<16xf32>
    %143 = vector.shape_cast %142 : vector<16xf32> to vector<16x1xf32>
    %cst_62 = arith.constant 1.280000e+02 : f32
    %144 = vector.broadcast %cst_62 : f32 to vector<16x1xf32>
    %145 = arith.divf %143, %144 : vector<16x1xf32>
    %146 = vector.broadcast %145 : vector<16x1xf32> to vector<16x128xf32>
    %147 = arith.subf %141, %146 : vector<16x128xf32>
    %148 = arith.mulf %147, %147 : vector<16x128xf32>
    %cst_63 = arith.constant dense<0.000000e+00> : vector<16xf32>
    %149 = vector.multi_reduction <add>, %148, %cst_63 [1] : vector<16x128xf32> to vector<16xf32>
    %150 = vector.shape_cast %149 : vector<16xf32> to vector<16x1xf32>
    %cst_64 = arith.constant 1.280000e+02 : f32
    %151 = vector.broadcast %cst_64 : f32 to vector<16x1xf32>
    %152 = arith.divf %150, %151 : vector<16x1xf32>
    %153 = vector.broadcast %145 : vector<16x1xf32> to vector<16x128xf32>
    %154 = arith.subf %141, %153 : vector<16x128xf32>
    %cst_65 = arith.constant 9.99999974E-6 : f32
    %155 = vector.broadcast %cst_65 : f32 to vector<16x1xf32>
    %156 = arith.addf %152, %155 : vector<16x1xf32>
    %157 = math.rsqrt %156 : vector<16x1xf32>
    %158 = vector.broadcast %157 : vector<16x1xf32> to vector<16x128xf32>
    %159 = arith.mulf %154, %158 : vector<16x128xf32>
    %c0_66 = arith.constant 0 : index
    %c0_67 = arith.constant 0 : index
    %c0_68 = arith.constant 0 : index
    %160 = vector.load %arg12[%c0_66, %c0_67, %c0_68] : memref<1x1x128xf32, #tpu.memory_space<vmem>>, vector<1x1x128xf32>
    %161 = vector.shape_cast %160 : vector<1x1x128xf32> to vector<1x128xf32>
    %162 = vector.broadcast %161 : vector<1x128xf32> to vector<16x128xf32>
    %163 = arith.mulf %159, %162 : vector<16x128xf32>
    %c0_69 = arith.constant 0 : index
    %c0_70 = arith.constant 0 : index
    %c0_71 = arith.constant 0 : index
    %164 = vector.load %arg13[%c0_69, %c0_70, %c0_71] : memref<1x1x128xf32, #tpu.memory_space<vmem>>, vector<1x1x128xf32>
    %165 = vector.shape_cast %164 : vector<1x1x128xf32> to vector<1x128xf32>
    %166 = vector.broadcast %165 : vector<1x128xf32> to vector<16x128xf32>
    %167 = arith.addf %163, %166 : vector<16x128xf32>
    %c0_72 = arith.constant 0 : index
    %c0_73 = arith.constant 0 : index
    %168 = vector.load %arg17[%c0_72, %c0_73] : memref<16x128xf32, #tpu.memory_space<vmem>>, vector<16x128xf32>
    tpu.vector_store %arg17[%c0_72, %c0_73], %167 {strides = array<i32>} : memref<16x128xf32, #tpu.memory_space<vmem>>, vector<16x128xf32>,
    %c1_i32 = arith.constant 1 : i32
    %169 = arith.cmpi eq, %arg0, %c1_i32 : i32
    %170 = arith.extui %169 : i1 to i32
    %c0_i32_74 = arith.constant 0 : i32
    %171 = arith.cmpi ne, %170, %c0_i32_74 : i32
    scf.if %171 {
      %c0_75 = arith.constant 0 : index
      %c0_76 = arith.constant 0 : index
      %172 = vector.load %arg14[%c0_75, %c0_76] : memref<1x128xf32, #tpu.memory_space<vmem>>, vector<1x128xf32>
      %cst_77 = arith.constant dense<0.000000e+00> : vector<1x16xf32>
      %173 = tpu.matmul %172, %167, %cst_77 {dimension_numbers = #tpu.dot_dimension_numbers<[1], [1], [0], [0], [0, 0, 1, 0], [], []>} : vector<1x128xf32>, vector<16x128xf32>, vector<1x16xf32> -> vector<1x16xf32>
      %c0_78 = arith.constant 0 : index
      %c0_79 = arith.constant 0 : index
      %174 = vector.load %arg15[%c0_78, %c0_79] : memref<1x1xf32, #tpu.memory_space<vmem>>, vector<1x1xf32>
      %175 = vector.broadcast %174 : vector<1x1xf32> to vector<1x16xf32>
      %176 = arith.addf %173, %175 : vector<1x16xf32>
      %cst_80 = arith.constant 0.000000e+00 : f32
      %177 = vector.broadcast %cst_80 : f32 to vector<1x16xf32>
      %178 = arith.cmpf oge, %176, %177 : vector<1x16xf32>
      %cst_81 = arith.constant 1.000000e-01 : f32
      %179 = vector.broadcast %cst_81 : f32 to vector<1x16xf32>
      %180 = arith.mulf %179, %176 : vector<1x16xf32>
      %181 = arith.select %178, %176, %180 : vector<1x16xi1>, vector<1x16xf32>
      %c0_82 = arith.constant 0 : index
      %c0_83 = arith.constant 0 : index
      %182 = vector.load %arg16[%c0_82, %c0_83] : memref<1x16xf32, #tpu.memory_space<vmem>>, vector<1x16xf32>
      tpu.vector_store %arg16[%c0_82, %c0_83], %181 {strides = array<i32>} : memref<1x16xf32, #tpu.memory_space<vmem>>, vector<1x16xf32>,
    } else {
    }
    return
  }
  func.func @transform_0(%arg0: i32) -> (i32, i32) {
    %c0_i32 = arith.constant 0 : i32
    %c0_i32_0 = arith.constant 0 : i32
    %c0_i32_1 = arith.constant 0 : i32
    return %c0_i32, %c0_i32_0 : i32, i32
  }
  func.func @transform_1(%arg0: i32) -> (i32, i32, i32) {
    %c0_i32 = arith.constant 0 : i32
    %c0_i32_0 = arith.constant 0 : i32
    %c0_i32_1 = arith.constant 0 : i32
    return %arg0, %c0_i32, %c0_i32_0 : i32, i32, i32
  }
  func.func @transform_2(%arg0: i32) -> (i32, i32, i32) {
    %c0_i32 = arith.constant 0 : i32
    %c0_i32_0 = arith.constant 0 : i32
    %c0_i32_1 = arith.constant 0 : i32
    return %arg0, %c0_i32, %c0_i32_0 : i32, i32, i32
  }
  func.func @transform_3(%arg0: i32) -> (i32, i32, i32) {
    %c0_i32 = arith.constant 0 : i32
    %c0_i32_0 = arith.constant 0 : i32
    %c0_i32_1 = arith.constant 0 : i32
    return %arg0, %c0_i32, %c0_i32_0 : i32, i32, i32
  }
  func.func @transform_4(%arg0: i32) -> (i32, i32, i32) {
    %c0_i32 = arith.constant 0 : i32
    %c0_i32_0 = arith.constant 0 : i32
    %c0_i32_1 = arith.constant 0 : i32
    return %arg0, %c0_i32, %c0_i32_0 : i32, i32, i32
  }
  func.func @transform_5(%arg0: i32) -> (i32, i32, i32) {
    %c0_i32 = arith.constant 0 : i32
    %c0_i32_0 = arith.constant 0 : i32
    %c0_i32_1 = arith.constant 0 : i32
    return %arg0, %c0_i32, %c0_i32_0 : i32, i32, i32
  }
  func.func @transform_6(%arg0: i32) -> (i32, i32, i32) {
    %c0_i32 = arith.constant 0 : i32
    %c0_i32_0 = arith.constant 0 : i32
    %c0_i32_1 = arith.constant 0 : i32
    return %arg0, %c0_i32, %c0_i32_0 : i32, i32, i32
  }
  func.func @transform_7(%arg0: i32) -> (i32, i32, i32) {
    %c0_i32 = arith.constant 0 : i32
    %c0_i32_0 = arith.constant 0 : i32
    %c0_i32_1 = arith.constant 0 : i32
    return %arg0, %c0_i32, %c0_i32_0 : i32, i32, i32
  }
  func.func @transform_8(%arg0: i32) -> (i32, i32, i32) {
    %c0_i32 = arith.constant 0 : i32
    %c0_i32_0 = arith.constant 0 : i32
    %c0_i32_1 = arith.constant 0 : i32
    return %arg0, %c0_i32, %c0_i32_0 : i32, i32, i32
  }
  func.func @transform_9(%arg0: i32) -> (i32, i32, i32) {
    %c0_i32 = arith.constant 0 : i32
    %c0_i32_0 = arith.constant 0 : i32
    %c0_i32_1 = arith.constant 0 : i32
    return %arg0, %c0_i32, %c0_i32_0 : i32, i32, i32
  }
  func.func @transform_10(%arg0: i32) -> (i32, i32, i32) {
    %c0_i32 = arith.constant 0 : i32
    %c0_i32_0 = arith.constant 0 : i32
    %c0_i32_1 = arith.constant 0 : i32
    return %arg0, %c0_i32, %c0_i32_0 : i32, i32, i32
  }
  func.func @transform_11(%arg0: i32) -> (i32, i32, i32) {
    %c0_i32 = arith.constant 0 : i32
    %c0_i32_0 = arith.constant 0 : i32
    %c0_i32_1 = arith.constant 0 : i32
    return %arg0, %c0_i32, %c0_i32_0 : i32, i32, i32
  }
  func.func @transform_12(%arg0: i32) -> (i32, i32, i32) {
    %c0_i32 = arith.constant 0 : i32
    %c0_i32_0 = arith.constant 0 : i32
    %c0_i32_1 = arith.constant 0 : i32
    return %arg0, %c0_i32, %c0_i32_0 : i32, i32, i32
  }
  func.func @transform_13(%arg0: i32) -> (i32, i32) {
    %c0_i32 = arith.constant 0 : i32
    %c0_i32_0 = arith.constant 0 : i32
    %c0_i32_1 = arith.constant 0 : i32
    return %c0_i32, %c0_i32_0 : i32, i32
  }
  func.func @transform_14(%arg0: i32) -> (i32, i32) {
    %c0_i32 = arith.constant 0 : i32
    %c0_i32_0 = arith.constant 0 : i32
    %c0_i32_1 = arith.constant 0 : i32
    return %c0_i32, %c0_i32_0 : i32, i32
  }
  func.func @transform_15(%arg0: i32) -> (i32, i32) {
    %c0_i32 = arith.constant 0 : i32
    %c0_i32_0 = arith.constant 0 : i32
    %c0_i32_1 = arith.constant 0 : i32
    return %c0_i32, %c0_i32_0 : i32, i32
  }
}

</mosaic_0001>

<bundles_post_ra>
// kernel: tpu_custom_call.1
= control target key start
LH: loop header
LB: loop body
LE: loop exit
PB: predicated region body
PF: predicated region fallthrough
CT: control target
= control target key end

     0   :  { %s13751_s0 = inlined_call_operand.hbm [shape: f32[16,128], index: 0, kind: input, shape index: {}]   ;;  %s13752_s1 = inlined_call_operand.hbm [shape: bf16[2,128,384], index: 1, kind: input, shape index: {}]   ;;  %s13753_s2 = inlined_call_operand.hbm [shape: f32[2,1,384], index: 2, kind: input, shape index: {}]   ;;  %s13754_s3 = inlined_call_operand.hbm [shape: bf16[2,128,128], index: 3, kind: input, shape index: {}]   ;;  %s13755_s4 = inlined_call_operand.vmem [shape: f32[2,1,128], index: 4, kind: input, shape index: {}]   ;;  %s13756_s5 = inlined_call_operand.vmem [shape: f32[2,1,128], index: 5, kind: input, shape index: {}]   ;;  %s13757_s6 = inlined_call_operand.vmem [shape: f32[2,1,128], index: 6, kind: input, shape index: {}]   ;;  %s13758_s7 = inlined_call_operand.hbm [shape: bf16[2,128,2048], index: 7, kind: input, shape index: {}]   ;;  %s13759_s8 = inlined_call_operand.hbm [shape: f32[2,1,2048], index: 8, kind: input, shape index: {}]   ;;  %s13760_s9 = inlined_call_operand.hbm [shape: bf16[2,2048,128], index: 9, kind: input, shape index: {}]   ;;  %s13761_s10 = inlined_call_operand.vmem [shape: f32[2,1,128], index: 10, kind: input, shape index: {}]   ;;  %s13762_s11 = inlined_call_operand.vmem [shape: f32[2,1,128], index: 11, kind: input, shape index: {}]   ;;  %s13763_s12 = inlined_call_operand.vmem [shape: f32[2,1,128], index: 12, kind: input, shape index: {}]   ;;  %s13764_s13 = inlined_call_operand.vmem [shape: f32[1,128], index: 13, kind: input, shape index: {}]   ;;  %s13765_s14 = inlined_call_operand.<no memory space> [shape: f32[1,1], index: 14, kind: input, shape index: {}]   ;;  %s13766_s15 = inlined_call_operand.hbm [shape: f32[1,16], index: 15, kind: output, shape index: {}]  }
   0x1   :  { %13784 = sst [smem:[#allocation26_spill]] %s13751_s0  ;;  %v20_v0 = vstv %s13765_s14 }
   0x2   :  { %13785 = sst [smem:[#allocation27_spill]] %s13752_s1  ;;  %21 = vst [vmem:[#allocation3] sm:$0x1] %v20_v0 }
   0x3   :  { %13786 = sst [smem:[#allocation28_spill]] %s13753_s2 }
   0x4   :  { %13787 = sst [smem:[#allocation29_spill]] %s13754_s3 }
   0x5   :  { %13788 = sst [smem:[#allocation30_spill]] %s13757_s6 }
   0x6   :  { %13789 = sst [smem:[#allocation31_spill]] %s13758_s7 }
   0x7   :  { %13790 = sst [smem:[#allocation32_spill]] %s13759_s8 }
   0x8   :  { %13791 = sst [smem:[#allocation33_spill]] %s13760_s9 }
   0x9   :  { %13792 = sst [smem:[#allocation34_spill]] %s13761_s10 }
   0xa   :  { %13793 = sst [smem:[#allocation35_spill]] %s13762_s11 }
   0xb   :  { %13794 = sst [smem:[#allocation36_spill]] %s13763_s12 }
   0xc   :  { %13795 = sst [smem:[#allocation37_spill]] %s13764_s13 }
   0xd   :  { %13796 = sst [smem:[#allocation38_spill]] %s13766_s15 }
   0xe   :  { %22 = vsyncpa [#allocation5], 0 }
   0xf   :  { %23 = vsyncpa [#allocation8], 0 }
  0x10   :  { %25 = vsyncpa [#allocation8 + $0x1], 0 }
  0x11   :  { %26 = vsyncpa [#allocation11], 0 }
  0x12   :  { %28 = vsyncpa [#allocation11 + $0x1], 0 }
  0x13   :  { %29 = vsyncpa [#allocation14], 0 }
  0x14   :  { %31 = vsyncpa [#allocation14 + $0x1], 0 }
  0x15   :  { %32 = vsyncpa [#allocation6], 0  ;;  %s11857_s20 = smov 0   ;;  %s11859_s21 = smov 0  }
  0x16   :  { %s11861_s22 = smov 0   ;;  %s11863_s23 = smov 0  }
  0x17 LB: > { %13797 = sst [smem:[#allocation22_spill]] %s11743_s22  ;;  %s11878_s14 = sadd.s32 1, %s11747_s23   ;;  %s11747_s23 = sphi %s11863_s23, %s13840_s23   ;;  %s11743_s22 = sphi %s11861_s22, %s13842_s22   ;;  %s11739_s21 = sphi %s11859_s21, %s13844_s21   ;;  %s11735_s20 = sphi %s11857_s20, %s13843_s20  }
  0x18   : > { %13798 = sst [smem:[#allocation23_spill]] %s11878_s14  ;;  %s66_s24 = sadd.s32 1, %s11743_s22 }
  0x19   : > { %s63_s25 = ssub.s32 %s11747_s23, %s11878_s14  ;;  %p73_p0 = scmp.ne.s32.totalorder %s11743_s22, %s11739_s21 }
  0x1a   : > { %p64_p1 = scmp.eq.s32.totalorder %s63_s25, 0  ;;  %p74_p2 = scmp.eq.s32.totalorder %s11747_s23, 0 }
  0x1b   : > { %p11117_p3 = scmp.lt.s32.totalorder %s11747_s23, 2  ;;  %s11891_s27 = sand.u32 1, %s11747_s23  }
  0x1c   : > { %s11888_s26 = scalar_select %p64_p1, %s11743_s22, %s66_s24  }
  0x1d   : > { %p75_p4 = por %p74_p2, %p73_p0  ;;  %s11894_s28 = sand.u32 1, %s11743_s22  }
  0x1e   : > { %13799 = sst [smem:[#allocation24_spill]] %s11888_s26  ;;  %s11067_s29 = smul.u32 192, %s11894_s28 }
  0x1f   : > { %p11897_p5 = pnand %p11117_p3, %p75_p4  ;;  %s11068_s16 = smul.u32 3072, %s11747_s23 }
  0x20   : > { %s13801_s1 = sld [smem:[#allocation27_spill]]  ;;  %s475_s24 = scalar_lea.vmem [#allocation7], %s11067_s29 }
  0x21   : > { %s482_s25 = sshll.u32 %s475_s24, 4  ;;  %p11914_p7 = pneg %p11897_p5  ;;  %s11907_s25 = int_to_ptr.vmem [resolvable:$true] %s482_s25 }
  0x26   : > { %s11905_s19 = scalar_lea.hbm %s13801_s1, %s11068_s16  ;;  %s11484_s18 = scalar_lea.hbm %s13801_s1, 6144 }
  0x27   : > { %s11479_s22 = scalar_lea.hbm %s11905_s19, 3072  ;;  %p11485_p10 = scmp.lt.s32.totalorder %s11905_s19, %s13801_s1 }
  0x28   : > { %p11480_p6 = scmp.ne.s32.totalorder %s11905_s19, %s11479_s22  ;;  %p11486_p11 = scmp.lt.s32.totalorder %s11484_s18, %s11479_s22 }
  0x2a   : > { %p11482_p8 = pnand %p11914_p7, %p11480_p6  ;;  %p11487_p12 = por %p11486_p11, %p11485_p10 }
  0x2c   : > { %p11483_p9 = pneg %p11482_p8 }
  0x2e   : > { %p11488_p13 = pnand %p11487_p12, %p11483_p9 }
  0x30   : > { %11491 = shalt.err (!%p11488_p13)
}
  0x31   : > { %s11492_s26 = scalar_lea.vmem %s11907_s25, 3072  ;;  %s11749_s15 = smov [#allocation7]  }
  0x32   : > { %p11493_p0 = scmp.ne.s32.totalorder %s11907_s25, %s11492_s26  ;;  %s11497_s16 = sshll.u32 %s11749_s15, 4  ;;  %s11498_s16 = int_to_ptr.vmem [resolvable:$false] %s11497_s16 }
  0x33   : > { %s11499_s17 = scalar_lea.vmem %s11498_s16, 6144  ;;  %p11500_p3 = scmp.lt.s32.totalorder %s11907_s25, %s11498_s16 }
  0x34   : > { %p11495_p1 = pnand %p11493_p0, %p11914_p7  ;;  %p11501_p4 = scmp.lt.s32.totalorder %s11499_s17, %s11492_s26 }
  0x36   : > { %p11496_p2 = pneg %p11495_p1  ;;  %p11502_p6 = por %p11501_p4, %p11500_p3 }
  0x38   : > { %p11503_p8 = pnand %p11502_p6, %p11496_p2 }
  0x3a   : > { %11506 = shalt.err (!%p11503_p8)
}
  0x3b   : > { %s11750_s22 = smov 192   ;;  %s11751_s18 = smov 12  }
  0x3c   : > { %s13803_s29 = scalar_lea.sflag [#allocation8], %s11891_s27  ;;  %s9925_s15 = sshll.u32 %s11894_s28, 6 }
  0x3d   : > { %11100 = dma.hbm_to_vmem [thread:$0]  (!%p11897_p5), %s11905_s19, 3072, %s11907_s25, %s13803_s29, %s11750_s22, %s11750_s22, %s11751_s18  }
  0x3e   : > { %s10371_s24 = sshll.u32 %s11747_s23, 10  ;;  %s13804_s3 = sld [smem:[#allocation29_spill]] }
  0x3f   : > { %s515_s1 = scalar_lea.vmem [#allocation10], %s9925_s15  ;;  %s13771_s12 = scalar_lea.sflag [#allocation11], %s11891_s27 }
  0x40   : > { %s522_s13 = sshll.u32 %s515_s1, 4  ;;  %s11945_s13 = int_to_ptr.vmem [resolvable:$true] %s522_s13 }
  0x44   : > { %s11943_s17 = scalar_lea.hbm %s13804_s3, %s10371_s24  ;;  %s11512_s22 = scalar_lea.hbm %s13804_s3, 2048 }
  0x45   : > { %s11507_s11 = scalar_lea.hbm %s11943_s17, 1024  ;;  %p11513_p12 = scmp.lt.s32.totalorder %s11943_s17, %s13804_s3 }
  0x46   : > { %p11508_p9 = scmp.ne.s32.totalorder %s11943_s17, %s11507_s11  ;;  %p11514_p13 = scmp.lt.s32.totalorder %s11512_s22, %s11507_s11 }
  0x48   : > { %p11510_p10 = pnand %p11508_p9, %p11914_p7  ;;  %p11515_p0 = por %p11514_p13, %p11513_p12 }
  0x4a   : > { %p11511_p11 = pneg %p11510_p10 }
  0x4c   : > { %p11516_p1 = pnand %p11515_p0, %p11511_p11 }
  0x4e   : > { %11519 = shalt.err (!%p11516_p1)
}
  0x4f   : > { %s11520_s1 = scalar_lea.vmem %s11945_s13, 1024  ;;  %s11752_s15 = smov [#allocation10]  }
  0x50   : > { %p11521_p2 = scmp.ne.s32.totalorder %s11945_s13, %s11520_s1  ;;  %s11525_s24 = sshll.u32 %s11752_s15, 4  ;;  %s11526_s24 = int_to_ptr.vmem [resolvable:$false] %s11525_s24 }
  0x51   : > { %s11527_s16 = scalar_lea.vmem %s11526_s24, 2048  ;;  %p11528_p6 = scmp.lt.s32.totalorder %s11945_s13, %s11526_s24 }
  0x52   : > { %p11523_p3 = pnand %p11521_p2, %p11914_p7  ;;  %p11529_p8 = scmp.lt.s32.totalorder %s11527_s16, %s11520_s1 }
  0x54   : > { %p11524_p4 = pneg %p11523_p3  ;;  %p11530_p9 = por %p11529_p8, %p11528_p6 }
  0x56   : > { %p11531_p10 = pnand %p11530_p9, %p11524_p4 }
  0x58   : > { %11534 = shalt.err (!%p11531_p10)
}
  0x59   : > { %s13773_s11 = smov 64   ;;  %s13770_s26 = smov 4  }
  0x5a   : > { %11106 = dma.hbm_to_vmem [thread:$0]  (!%p11897_p5), %s11943_s17, 1024, %s11945_s13, %s13771_s12, %s13773_s11, %s13773_s11, %s13770_s26  }
  0x5b   : > { %s9931_s19 = sshll.u32 %s11894_s28, 4  ;;  %s10373_s25 = sshll.u32 %s11747_s23, 8 }
  0x5c   : > { %s13805_s8 = sld [smem:[#allocation32_spill]]  ;;  %s575_s1 = scalar_lea.vmem [#allocation13], %s9931_s19 }
  0x5d   : > { %s583_s15 = sshll.u32 %s575_s1, 4  ;;  %s13772_s24 = scalar_lea.sflag [#allocation14], %s11891_s27  ;;  %s584_s15 = int_to_ptr.vmem [resolvable:$true] %s583_s15 }
  0x62   : > { %s11978_s29 = scalar_lea.hbm %s13805_s8, %s10373_s25  ;;  %s11540_s26 = scalar_lea.hbm %s13805_s8, 512 }
  0x63   : > { %s11535_s16 = scalar_lea.hbm %s11978_s29, 256  ;;  %p11541_p0 = scmp.lt.s32.totalorder %s11978_s29, %s13805_s8 }
  0x64   : > { %p11536_p11 = scmp.ne.s32.totalorder %s11978_s29, %s11535_s16  ;;  %p11542_p1 = scmp.lt.s32.totalorder %s11540_s26, %s11535_s16 }
  0x66   : > { %p11538_p12 = pnand %p11536_p11, %p11914_p7  ;;  %p11543_p2 = por %p11542_p1, %p11541_p0 }
  0x68   : > { %p11539_p13 = pneg %p11538_p12 }
  0x6a   : > { %p11544_p3 = pnand %p11543_p2, %p11539_p13 }
  0x6c   : > { %11547 = shalt.err (!%p11544_p3)
}
  0x6d   : > { %s11548_s19 = scalar_lea.vmem %s584_s15, 256  ;;  %s11755_s25 = smov [#allocation13]  }
  0x6e   : > { %p11549_p4 = scmp.ne.s32.totalorder %s584_s15, %s11548_s19  ;;  %s11553_s18 = sshll.u32 %s11755_s25, 4  ;;  %s11554_s18 = int_to_ptr.vmem [resolvable:$false] %s11553_s18 }
  0x6f   : > { %s11555_s1 = scalar_lea.vmem %s11554_s18, 512  ;;  %p11556_p9 = scmp.lt.s32.totalorder %s584_s15, %s11554_s18 }
  0x70   : > { %p11551_p6 = pnand %p11549_p4, %p11914_p7  ;;  %p11557_p10 = scmp.lt.s32.totalorder %s11555_s1, %s11548_s19 }
  0x72   : > { %p11552_p8 = pneg %p11551_p6  ;;  %p11558_p11 = por %p11557_p10, %p11556_p9 }
  0x74   : > { %p11559_p12 = pnand %p11558_p11, %p11552_p8 }
  0x76   : > { %11562 = shalt.err (!%p11559_p12)
}
  0x77   : > { %11112 = dma.hbm_to_vmem [thread:$0]  (!%p11897_p5), %s11978_s29, 256, %s584_s15, %s13772_s24  }
  0x78   : > { %s12000_s12 = sadd.s32 4294967295, %s11747_s23   ;;  %p79_p13 = scmp.ne.s32.totalorder %s11739_s21, %s11735_s20 }
  0x79   : > { %p13775_p0 = scmp.eq.s32.totalorder %s12000_s12, 0  ;;  %p9920_p1 = scmp.ge.s32.totalorder %s11747_s23, 1 }
  0x7a   : > { %p439_p2 = scmp.lt.s32.totalorder %s11747_s23, 3  ;;  %s11756_s29 = smov [#allocation4]  }
  0x7b   : > { %p12010_p4 = por %p13775_p0, %p79_p13  ;;  %s451_s15 = sshll.u32 %s11756_s29, 4  ;;  %s452_s15 = int_to_ptr.vmem [resolvable:$true] %s451_s15 }
  0x7c   : > { %p12014_p6 = pnand %p9920_p1, %p439_p2  ;;  %s11069_s20 = smul.u32 3, %s11894_s28 }
  0x7d   : > { %s13806_s26 = scalar_select %p12010_p4, 1, 0 }
  0x7e   : > { %s13807_s16 = scalar_select %p12014_p6, 1, 0 }
  0x7f   : > { %p11093_p8 = pneg %p12014_p6  ;;  %s11070_s22 = smul.u32 48, %s11747_s23 }
  0x80   : > { %s13809_s2 = sld [smem:[#allocation28_spill]]  ;;  %s11574_s1 = scalar_lea.vmem %s452_s15, 256 }
  0x81   : > { %p12024_p9 = pnand %p11093_p8, %p13775_p0  ;;  %p11575_p11 = scmp.ne.s32.totalorder %s452_s15, %s11574_s1 }
  0x82   : > { %p11582_p1 = scmp.lt.s32.totalorder %s452_s15, %s452_s15  ;;  %p11583_p2 = scmp.lt.s32.totalorder %s11574_s1, %s11574_s1 }
  0x83   : > { %p11565_p10 = pneg %p12024_p9 }
  0x84   : > { %p11584_p3 = por %p11583_p2, %p11582_p1 }
  0x85   : > { %p11577_p12 = pnand %p11575_p11, %p11565_p10 }
  0x86   : > { %s12032_s18 = scalar_lea.hbm %s13809_s2, %s11070_s22 }
  0x87   : > { %p11578_p13 = pneg %p11577_p12 }
  0x89   : > { %p11585_p8 = pnand %p11584_p3, %p11578_p13 }
  0x8b   : > { %11588 = shalt.err (!%p11585_p8)
}
  0x8c   : > { %s11757_s29 = smov 128   ;;  %s11758_s22 = smov 8  }
  0x8d   : > { %s13810_s0 = sld [smem:[#allocation26_spill]]  ;;  %s496_s24 = scalar_lea.vmem [#allocation9], %s11069_s20 }
  0x8e   : > { %s504_s11 = sshll.u32 %s496_s24, 4  ;;  %s10372_s1 = sshll.u32 %s11747_s23, 14  ;;  %s505_s11 = int_to_ptr.vmem [resolvable:$true] %s504_s11 }
  0x8f   : > { %s13811_s7 = sld [smem:[#allocation31_spill]]  ;;  %s11589_s10 = scalar_lea.hbm %s12032_s18, 48 }
  0x90   : > { %p11590_p3 = scmp.ne.s32.totalorder %s12032_s18, %s11589_s10  ;;  %s11594_s19 = scalar_lea.hbm %s13809_s2, 96 }
  0x91   : > { %p11596_p12 = scmp.lt.s32.totalorder %s11594_s19, %s11589_s10 }
  0x92   : > { %p11592_p10 = pnand %p11590_p3, %p11914_p7 }
  0x93   : > { %11096 = dma.hbm_to_vmem [thread:$0]  (!%p12024_p9), %s13810_s0, 256, %s452_s15, [#allocation5], %s11757_s29, %s11757_s29, %s11758_s22  }
  0x94   : > { %p11593_p11 = pneg %p11592_p10  ;;  %p11595_p9 = scmp.lt.s32.totalorder %s12032_s18, %s13809_s2 }
  0x95   : > { %s12047_s8 = scalar_lea.hbm %s13811_s7, %s10372_s1 }
  0x96   : > { %p11597_p13 = por %p11596_p12, %p11595_p9 }
  0x98   : > { %p11598_p1 = pnand %p11597_p13, %p11593_p11 }
  0x9a   : > { %11601 = shalt.err (!%p11598_p1)
}
  0x9b   : > { %s11602_s3 = scalar_lea.vmem %s505_s11, 48  ;;  %s11759_s24 = smov [#allocation9]  }
  0x9c   : > { %p11603_p2 = scmp.ne.s32.totalorder %s505_s11, %s11602_s3  ;;  %s11607_s13 = sshll.u32 %s11759_s24, 4  ;;  %s11608_s13 = int_to_ptr.vmem [resolvable:$false] %s11607_s13 }
  0x9d   : > { %s11609_s29 = scalar_lea.vmem %s11608_s13, 96  ;;  %p11610_p3 = scmp.lt.s32.totalorder %s505_s11, %s11608_s13 }
  0x9e   : > { %p11605_p8 = pnand %p11603_p2, %p11914_p7  ;;  %p11611_p10 = scmp.lt.s32.totalorder %s11609_s29, %s11602_s3 }
  0xa0   : > { %p11606_p0 = pneg %p11605_p8  ;;  %p11612_p4 = por %p11611_p10, %p11610_p3 }
  0xa2   : > { %p11613_p6 = pnand %p11612_p4, %p11606_p0 }
  0xa4   : > { %11616 = shalt.err (!%p11613_p6)
}
  0xa5   : > { %s13812_s6 = scalar_lea.sflag [#allocation8], %s11891_s27  ;;  %s13813_s10 = sshll.u32 %s11894_s28, 10 }
  0xa6   : > { %11103 = dma.hbm_to_vmem [thread:$0]  (!%p11897_p5), %s12032_s18, 48, %s505_s11, %s13812_s6  }
  0xa7   : > { %s554_s22 = scalar_lea.vmem [#allocation12], %s13813_s10  ;;  %s11617_s17 = scalar_lea.hbm %s12047_s8, 16384 }
  0xa8   : > { %s561_s25 = sshll.u32 %s554_s22, 4  ;;  %p11618_p11 = scmp.ne.s32.totalorder %s12047_s8, %s11617_s17  ;;  %s12069_s25 = int_to_ptr.vmem [resolvable:$true] %s561_s25 }
  0xa9   : > { %s11622_s20 = scalar_lea.hbm %s13811_s7, 32768  ;;  %p11623_p6 = scmp.lt.s32.totalorder %s12047_s8, %s13811_s7 }
  0xaa   : > { %p11620_p0 = pnand %p11618_p11, %p11914_p7  ;;  %p11624_p9 = scmp.lt.s32.totalorder %s11622_s20, %s11617_s17 }
  0xac   : > { %p11621_p4 = pneg %p11620_p0  ;;  %p11625_p12 = por %p11624_p9, %p11623_p6 }
  0xae   : > { %p11626_p13 = pnand %p11625_p12, %p11621_p4 }
  0xb0   : > { %11629 = shalt.err (!%p11626_p13)
}
  0xb1   : > { %s11630_s11 = scalar_lea.vmem %s12069_s25, 16384  ;;  %s11760_s18 = smov [#allocation12]  }
  0xb2   : > { %p11631_p1 = scmp.ne.s32.totalorder %s12069_s25, %s11630_s11  ;;  %s11635_s13 = sshll.u32 %s11760_s18, 4  ;;  %s11636_s13 = int_to_ptr.vmem [resolvable:$false] %s11635_s13 }
  0xb3   : > { %s11637_s29 = scalar_lea.vmem %s11636_s13, 32768  ;;  %p11638_p3 = scmp.lt.s32.totalorder %s12069_s25, %s11636_s13 }
  0xb4   : > { %p11633_p2 = pnand %p11631_p1, %p11914_p7  ;;  %p11639_p10 = scmp.lt.s32.totalorder %s11637_s29, %s11630_s11 }
  0xb6   : > { %p11634_p8 = pneg %p11633_p2  ;;  %p11640_p11 = por %p11639_p10, %p11638_p3 }
  0xb8   : > { %p11641_p0 = pnand %p11640_p11, %p11634_p8 }
  0xba   : > { %11644 = shalt.err (!%p11641_p0)
}
  0xbb   : > { %s11761_s6 = smov 1024   ;;  %s13814_s10 = smov 64  }
  0xbc   : > { %s13815_s22 = scalar_lea.sflag [#allocation11], %s11891_s27  ;;  %s13816_s9 = sld [smem:[#allocation33_spill]] }
  0xbd   : > { %11109 = dma.hbm_to_vmem [thread:$0]  (!%p11897_p5), %s12047_s8, 16384, %s12069_s25, %s13815_s22, %s11761_s6, %s11761_s6, %s13814_s10  }
  0xbe   : > { %s13817_s20 = sshll.u32 %s11894_s28, 10 }
  0xbf   : > { %s594_s3 = scalar_lea.vmem [#allocation15], %s13817_s20 }
  0xc0   : > { %s601_s24 = sshll.u32 %s594_s3, 4  ;;  %s602_s24 = int_to_ptr.vmem [resolvable:$true] %s601_s24 }
  0xc2   : > { %s12099_s15 = scalar_lea.hbm %s13816_s9, %s10372_s1  ;;  %s11650_s23 = scalar_lea.hbm %s13816_s9, 32768 }
  0xc3   : > { %s11645_s11 = scalar_lea.hbm %s12099_s15, 16384  ;;  %p11651_p12 = scmp.lt.s32.totalorder %s12099_s15, %s13816_s9 }
  0xc4   : > { %p11646_p4 = scmp.ne.s32.totalorder %s12099_s15, %s11645_s11  ;;  %p11652_p13 = scmp.lt.s32.totalorder %s11650_s23, %s11645_s11 }
  0xc6   : > { %p11648_p6 = pnand %p11646_p4, %p11914_p7  ;;  %p11653_p1 = por %p11652_p13, %p11651_p12 }
  0xc8   : > { %p11649_p9 = pneg %p11648_p6 }
  0xca   : > { %p11654_p2 = pnand %p11653_p1, %p11649_p9 }
  0xcc   : > { %11657 = shalt.err (!%p11654_p2)
}
  0xcd   : > { %s11658_s28 = scalar_lea.vmem %s602_s24, 16384  ;;  %s11762_s1 = smov [#allocation15]  }
  0xce   : > { %p11659_p8 = scmp.ne.s32.totalorder %s602_s24, %s11658_s28  ;;  %s11663_s29 = sshll.u32 %s11762_s1, 4  ;;  %s11664_s29 = int_to_ptr.vmem [resolvable:$false] %s11663_s29 }
  0xcf   : > { %s11665_s6 = scalar_lea.vmem %s11664_s29, 32768  ;;  %p11666_p11 = scmp.lt.s32.totalorder %s602_s24, %s11664_s29 }
  0xd0   : > { %p11661_p3 = pnand %p11659_p8, %p11914_p7  ;;  %p11667_p0 = scmp.lt.s32.totalorder %s11665_s6, %s11658_s28 }
  0xd2   : > { %p11662_p10 = pneg %p11661_p3  ;;  %p11668_p4 = por %p11667_p0, %p11666_p11 }
  0xd4   : > { %p11669_p6 = pnand %p11668_p4, %p11662_p10 }
  0xd6   : > { %11672 = shalt.err (!%p11669_p6)
}
  0xd7   : > { %s13818_s22 = smov 4   ;;  %s13819_s17 = scalar_lea.sflag [#allocation14], %s11891_s27 }
  0xd8   : > { %11115 = dma.hbm_to_vmem [thread:$0]  (!%p11897_p5), %s12099_s15, 16384, %s602_s24, %s13819_s17, %s13814_s10, %s13814_s10, %s13818_s22  }
  0xd9   : > { %p13820_p7 = scmp.ne.s32.totalorder %s13807_s16, 0 }
  0xdb   : > { %631 = sbr.rel (%p13820_p7) target bundleno = 4656 (0x1230), region = 80 }
  0xe0   : > { %p13821_p9 = scmp.eq.s32.totalorder %s12000_s12, 0 }
  0xe2   : > { %11714 = dma.done.wait (%p13821_p9), [#allocation5], 256   ;;  %p13822_p12 = pmov %p13821_p9 }
  0xe3   : > { %s637_s14 = sand.u32 1, %s12000_s12   ;;  %s639_s30 = sand.u32 1, %s11739_s21  }
  0xe4   : > { %11716 = vsyncadd (%p13822_p12), [#allocation5], 4294967040  ;;  %s11071_s19 = smul.u32 192, %s639_s30  ;;  %s638_s20 = scalar_lea.sflag [#allocation8], %s637_s14 }
  0xe5   : > { %p13823_p13 = scmp.ne.s32.totalorder %s13806_s26, 0 }
  0xe6   : > { %s12132_s3 = scalar_lea.vmem [#allocation7], %s11071_s19 }
  0xe7   : > { %11718 = dma.done.wait (%p13823_p13), %s638_s20, 3120  }
  0xe8   : > { %11720 = vsyncadd (%p13823_p13), %s638_s20, 4294964176  ;;  %s11072_s27 = smul.u32 3, %s639_s30  ;;  %s9939_s16 = sshll.u32 %s639_s30, 6 }
  0xe9   : > { %s656_s15 = scalar_lea.sflag [#allocation11], %s637_s14  ;;  %s12140_s24 = scalar_lea.vmem [#allocation10], %s9939_s16 }
  0xea   : > { %s12138_s10 = scalar_lea.vmem [#allocation9], %s11072_s27 }
  0xeb   : > { %11722 = dma.done.wait (%p13823_p13), %s656_s15, 17408  }
  0xec   : > { %11724 = vsyncadd (%p13823_p13), %s656_s15, 4294949888  ;;  %s9940_s11 = sshll.u32 %s639_s30, 10  ;;  %s9941_s18 = sshll.u32 %s639_s30, 4 }
  0xed   : > { %s12146_s8 = scalar_lea.vmem [#allocation12], %s9940_s11  ;;  %s674_s23 = scalar_lea.sflag [#allocation14], %s637_s14 }
  0xee   : > { %s12148_s25 = scalar_lea.vmem [#allocation13], %s9941_s18 }
  0xef   : > { %11726 = dma.done.wait (%p13823_p13), %s674_s23, 16640  }
  0xf0   : > { %11728 = vsyncadd (%p13823_p13), %s674_s23, 4294950656  ;;  %p771_p5 = scmp.lt.s32.totalorder %s12000_s12, 1  ;;  %s13824_s30 = sld [smem:[#allocation30_spill]] }
  0xf1   : > { %s13825_s16 = sld [smem:[#allocation34_spill]]  ;;  %s12182_s9 = scalar_lea.vmem [#allocation15], %s9940_s11 }
  0xf2   : > { %s12156_s13 = scalar_select %p771_p5, %s12000_s12, 1 }
  0xf3   : > { %s13826_s28 = sld [smem:[#allocation35_spill]]  ;;  %p13828_p1 = scmp.ne.s32.totalorder %s12000_s12, 0 }
  0xf4   : > { %s776_s26 = scalar_lea.vmem %s13756_s5, %s12156_s13  ;;  %s13827_s7 = sld [smem:[#allocation36_spill]] }
  0xf6   : > { %s779_s19 = scalar_lea.vmem %s13824_s30, %s12156_s13  ;;  %793 = sbr.rel (%p13828_p1) target bundleno = 253 (0xfd), region = 112 }
  0xf7   : > { %s782_s15 = scalar_lea.vmem %s13825_s16, %s12156_s13 }
  0xf9   : > { %s785_s1 = scalar_lea.vmem %s13826_s28, %s12156_s13 }
  0xfa   : > { %s788_s29 = scalar_lea.vmem %s13827_s7, %s12156_s13 }
  0xfb   : > { %v794_v1 = vld [vmem:[#allocation4] sm:$0xff]  ;;  %v795_v2 = vld [vmem:[#allocation4 + $0x8] sm:$0xff] }
  0xfc   : > { %796 = vst [vmem:[#allocation2] sm:$0xff] %v794_v1  ;;  %797 = vst [vmem:[#allocation2 + $0x8] sm:$0xff] %v795_v2 }
  0xfd PF: > { %v11172_v3 = vld [vmem:[%s12132_s3 + $0xac] ss:$12 sps:$4 sm:$0xff]   ;;  %v11174_v4 = vld [vmem:[%s12132_s3 + $0xa8] ss:$12 sps:$4 sm:$0xff]   ;;  %v13778_v5 = vmov 0   ;;  %v13780_v6 = vmov 0.0   ;;  %v835_v32 = vlaneseq }
  0xfe   : > { %1010 = vmatprep.mubr.bf16.mxu0 %v13778_v5  ;;  %10700 = vmatprep.subr.bf16.mxu1 %v13780_v6  ;;  %v11175_v7 = vld [vmem:[%s12132_s3 + $0x94] ss:$12 sps:$4 sm:$0xff]   ;;  %v11177_v8 = vld [vmem:[%s12132_s3 + $0x90] ss:$12 sps:$4 sm:$0xff]   ;;  %v11180_v10 = vld [vmem:[%s12132_s3 + $0x78] ss:$12 sps:$4 sm:$0xff]  }
  0xff   : > { %978 = vmatprep.subr.bf16.mxu0 %v11172_v3  ;;  %v11178_v9 = vld [vmem:[%s12132_s3 + $0x7c] ss:$12 sps:$4 sm:$0xff]   ;;  %v11181_v11 = vld [vmem:[%s12132_s3 + $0x64] ss:$12 sps:$4 sm:$0xff]   ;;  %v11183_v12 = vld [vmem:[%s12132_s3 + $0x60] ss:$12 sps:$4 sm:$0xff]  }
 0x100   : > { %979 = vmatpush1.bf16.msra.mxu0 %v11174_v4  ;;  %v11184_v13 = vld [vmem:[%s12132_s3 + $0x4c] ss:$12 sps:$4 sm:$0xff]   ;;  %v11196_v14 = vld [vmem:[%s12132_s3 + $0xb0] ss:$12 sps:$4 sm:$0xff]   ;;  %v11186_v16 = vld [vmem:[%s12132_s3 + $0x48] ss:$12 sps:$4 sm:$0xff]  }
 0x101   : > { %980 = vmatprep.subr.bf16.mxu0 %v11175_v7  ;;  %10701 = vmatpush3.bf16.msra.mxu1 %v11196_v14  ;;  %v11197_v15 = vld [vmem:[%s12132_s3 + $0x98] ss:$12 sps:$4 sm:$0xff]   ;;  %v11187_v17 = vld [vmem:[%s12132_s3 + $0x34] ss:$12 sps:$4 sm:$0xff]   ;;  %v11189_v19 = vld [vmem:[%s12132_s3 + $0x30] ss:$12 sps:$4 sm:$0xff]  }
 0x102   : > { %10702 = vmatprep.subr.bf16.mxu1 %v13780_v6  ;;  %v11198_v18 = vld [vmem:[%s12132_s3 + $0x80] ss:$12 sps:$4 sm:$0xff]   ;;  %v11190_v20 = vld [vmem:[%s12132_s3 + $0x1c] ss:$12 sps:$4 sm:$0xff]   ;;  %v11192_v22 = vld [vmem:[%s12132_s3 + $0x18] ss:$12 sps:$4 sm:$0xff]  }
 0x103   : > { %v11199_v21 = vld [vmem:[%s12132_s3 + $0x68] ss:$12 sps:$4 sm:$0xff]   ;;  %v11193_v23 = vld [vmem:[%s12132_s3 + $0x4] ss:$12 sps:$4 sm:$0xff]   ;;  %v11195_v25 = vld [vmem:[%s12132_s3] ss:$12 sps:$4 sm:$0xff]  }
 0x104   : > { %981 = vmatpush1.bf16.msra.mxu0 %v11177_v8  ;;  %v11200_v24 = vld [vmem:[%s12132_s3 + $0x50] ss:$12 sps:$4 sm:$0xff]   ;;  %v799_v27 = vld [vmem:[#allocation2 + $0x8] sm:$0xff]  ;;  %vm11765_vm0 = vmmov 0   ;;  %v12227_v33 = vshrl.u32 %v835_v32, 7  ;;  %vm1186_vm1 = vcmask 261120  }
 0x105   : > { %982 = vmatprep.subr.bf16.mxu0 %v11178_v9  ;;  %10703 = vmatpush3.bf16.msra.mxu1 %v11197_v15  ;;  %v798_v26 = vld [vmem:[#allocation2] sm:$0xff]  ;;  %v11203_v31 = vld [vmem:[%s12132_s3 + $0x8] ss:$12 sps:$4 sm:$0xff]   ;;  %v11766_v35 = vmov 1983009808   ;;  %vm1880_vm2 = vcmask 1041408  }
 0x106   : > { %10704 = vmatprep.subr.bf16.mxu1 %v13780_v6  ;;  %v11201_v28 = vld [vmem:[%s12132_s3 + $0x38] ss:$12 sps:$4 sm:$0xff]   ;;  %v800_v29 = vpack.c.bf16 %v799_v27, %v798_v26  ;;  %v11202_v30 = vld [vmem:[%s12132_s3 + $0x20] ss:$12 sps:$4 sm:$0xff]   ;;  %10716 = vmatprep.mubr.msk.bf16.mxu1 %vm11765_vm0, %v13780_v6  ;;  %v12230_v34 = vsub.s32 0, %v12227_v33  ;;  %v1066_v36 = vunpack.c.l.s4 %v11766_v35  ;;  %v12236_v38 = vsub.s32 1, %v12227_v33 }
 0x107   : > { %v12233_v37 = vld [vmem:[%s12138_s10] sm:$0x7]  ;;  %vm1787_vm3 = vcmask 9216   ;;  %s11767_s0 = smov 96   ;;  %vm1876_vm4 = vcmask 15360   ;;  %s11768_s2 = smov 64  }
 0x108   : > { %983 = vmatpush1.bf16.msra.mxu0 %v11180_v10  ;;  %v838_v39 = vrot.slane %v12233_v37, %v12230_v34  ;;  %v1067_v40 = vunpack.c.0.s8 %v1066_v36  ;;  %v842_v41 = vrot.slane %v12233_v37, %v12236_v38  ;;  %s11769_s7 = smov 32   ;;  %vm6734_vm5 = vcmask 523264   ;;  %p10366_p2 = scmp.ne.s32.totalorder %s12000_s12, 1 }
 0x109   : > { %984 = vmatprep.subr.bf16.mxu0 %v11181_v11  ;;  %10705 = vmatpush3.bf16.msra.mxu1 %v11198_v18  ;;  %vm6743_vm6 = vcmask 785408  }
 0x10a   : > { %10706 = vmatprep.subr.bf16.mxu1 %v13780_v6  ;;  %v12243_v44 = vsub.s32 %v1067_v40, %v12227_v33 }
 0x10c   : > { %985 = vmatpush1.bf16.msra.mxu0 %v11183_v12 }
 0x10d   : > { %986 = vmatprep.subr.bf16.mxu0 %v11184_v13  ;;  %10707 = vmatpush3.bf16.msra.mxu1 %v11199_v21 }
 0x10e   : > { %10708 = vmatprep.subr.bf16.mxu1 %v13780_v6 }
 0x110   : > { %987 = vmatpush1.bf16.msra.mxu0 %v11186_v16 }
 0x111   : > { %988 = vmatprep.subr.bf16.mxu0 %v11187_v17  ;;  %10709 = vmatpush3.bf16.msra.mxu1 %v11200_v24  ;;  %v12350_v17 = vsub.s32 2, %v12227_v33 }
 0x112   : > { %10710 = vmatprep.subr.bf16.mxu1 %v13780_v6 }
 0x113   : > { %13829 = vst [vmem:[#allocation25_spill] sm:$0xff] %v12350_v17  ;;  %v846_v18 = vrot.slane %v12233_v37, %v12350_v17 }
 0x114   : > { %989 = vmatpush1.bf16.msra.mxu0 %v11189_v19 }
 0x115   : > { %990 = vmatprep.subr.bf16.mxu0 %v11190_v20  ;;  %10711 = vmatpush3.bf16.msra.mxu1 %v11201_v28 }
 0x116   : > { %10712 = vmatprep.subr.bf16.mxu1 %v13780_v6 }
 0x118   : > { %991 = vmatpush1.bf16.msra.mxu0 %v11192_v22 }
 0x119   : > { %992 = vmatprep.subr.bf16.mxu0 %v11193_v23  ;;  %10713 = vmatpush3.bf16.msra.mxu1 %v11202_v30 }
 0x11a   : > { %10714 = vmatprep.subr.bf16.mxu1 %v13780_v6 }
 0x11c   : > { %993 = vmatpush1.bf16.msra.mxu0 %v11195_v25 }
 0x11d   : > { %10760 = vmatprep.subr.mxu0 %v13780_v6  ;;  %10715 = vmatpush3.bf16.msra.mxu1 %v11203_v31 }
 0x11e   : > { %10720 = vmatprep.subr.mxu1 %v13780_v6 }
 0x11f   : > { %1011 = vmatmul.mubr.bf16.vlgmr.msra.gmra.mxu0 %v800_v29 }
 0x120   : > { %10762 = vmatprep.mubr.msk.f32.mxu0 %vm11765_vm0, %v13780_v6  ;;  %10717 = vmatmul.mubr.bf16.vlgmr.msra.gmra.mxu1 %v800_v29 }
 0x121   : > { %10722 = vmatprep.mubr.msk.f32.mxu1 %vm11765_vm0, %v13780_v6 }
 0x1df   : > { %v1012_v42 = vpop.f32.mrf.mxu0 }
 0x1e0   : > { %v1013_v43 = vadd.f32 %v1012_v42, %v838_v39  ;;  %v1055_v19 = vpop.f32.mrf.mxu1 }
 0x1e1   : > { %v1014_v45 = vpop.f32.mrf.mxu0  ;;  %v12354_v20 = vadd.f32 %v1055_v19, %v846_v18 }
 0x1e2   : > { %v1015_v46 = vadd.f32 %v1014_v45, %v842_v41  ;;  %v1071_v47 = vrot.slane %v1013_v43, %v12243_v44  ;;  %v1064_v49 = vcombine.high %v1013_v43, %v1013_v43  ;;  %v10718_v21 = vpop.f32.mrf.mxu1 }
 0x1e3   : > { %v1016_v54 = vpop.f32.mrf.mxu0  ;;  %v12358_v23 = vrot.slane %v12354_v20, %v12243_v44 }
 0x1e4   : > { %v12247_v48 = vrot.slane %v1015_v46, %v12243_v44  ;;  %v1079_v50 = vcombine.high %v1071_v47, %v1071_v47  ;;  %v12251_v51 = vmul.f32 0.17677669, %v1071_v47  ;;  %v1108_v52 = vcombine.high %v1015_v46, %v1015_v46  ;;  %v1058_v22 = vpop.f32.mrf.mxu1 }
 0x1e5   : > { %v1078_v55 = vrot.slane %v1064_v49, %v12243_v44  ;;  %v1018_v58 = vpop.f32.mrf.mxu0  ;;  %v1017_v61 = vadd.f32 %v1016_v54, %v838_v39  ;;  %v12360_v24 = vadd.f32 %v1058_v22, %v846_v18  ;;  %v12364_v26 = vcombine.high %v12358_v23, %v12358_v23  ;;  %10761 = vmatpush3.msk.msra.mxu0 %vm1880_vm2, %v12358_v23 }
 0x1e6   : > { %10721 = vmatpush3.xpose.msk.msra.mxu1 %vm1186_vm1, %v12247_v48  ;;  %v12256_v53 = vcombine.high %v12247_v48, %v12247_v48  ;;  %v12265_v56 = vmul.f32 0.17677669, %v1079_v50  ;;  %v12269_v57 = vrot.slane %v1108_v52, %v12243_v44  ;;  %v1019_v63 = vadd.f32 %v1018_v58, %v842_v41  ;;  %v10719_v25 = vpop.f32.mrf.mxu1  ;;  %10770 = vmatprep.subr.mxu0 %v13780_v6 }
 0x1e7   : > { %10725 = vmatprep.subr.mxu1 %v13780_v6  ;;  %v1080_v59 = vcombine.high %v1078_v55, %v1078_v55  ;;  %v12277_v60 = vmul.f32 0.17677669, %v1078_v55  ;;  %v1088_v1 = vrot.slane %v1017_v61, %v12243_v44  ;;  %v1081_v3 = vcombine.high %v1017_v61, %v1017_v61 }
 0x1e8   : > { %v12282_v62 = vcombine.high %v12269_v57, %v12269_v57  ;;  %v12295_v2 = vrot.slane %v1019_v63, %v12243_v44  ;;  %v1125_v8 = vcombine.high %v1019_v63, %v1019_v63  ;;  %v12389_v61 = vrot.slane %v12251_v51, %v12243_v44 }
 0x1e9   : > { %10723 = vmatmul.mubr.msk.f32.vlgmr.msra.gmra.mxu1 %vm1186_vm1, %v12251_v51  ;;  %v12290_v0 = vmul.f32 0.17677669, %v1080_v59  ;;  %v1096_v4 = vcombine.high %v1088_v1, %v1088_v1  ;;  %v12303_v7 = vmul.f32 0.17677669, %v1088_v1  ;;  %v1095_v10 = vrot.slane %v1081_v3, %v12243_v44 }
 0x1ea   : > { %10726 = vmatpush3.xpose.msk.msra.mxu1 %vm1186_vm1, %v12256_v53  ;;  %10727 = vmatprep.mubr.msk.f32.mxu1 %vm11765_vm0, %v13780_v6  ;;  %v12308_v9 = vcombine.high %v12295_v2, %v12295_v2  ;;  %v12321_v12 = vrot.slane %v1125_v8, %v12243_v44  ;;  %v12383_v59 = vrot.slane %v12256_v53, %v12243_v44 }
 0x1eb   : > { %10730 = vmatprep.subr.mxu1 %v13780_v6  ;;  %v12317_v11 = vmul.f32 0.17677669, %v1096_v4  ;;  %v1097_v13 = vcombine.high %v1095_v10, %v1095_v10  ;;  %v12329_v14 = vmul.f32 0.17677669, %v1095_v10  ;;  %v12395_v63 = vrot.slane %v12265_v56, %v12243_v44 }
 0x1ec   : > { %v12334_v15 = vcombine.high %v12321_v12, %v12321_v12  ;;  %v12399_v1 = vrot.slane %v12247_v48, %v12243_v44  ;;  %v12407_v51 = vrot.slane %v12269_v57, %v12243_v44  ;;  %v12415_v48 = vrot.slane %v12282_v62, %v12243_v44 }
 0x1ed   : > { %10728 = vmatmul.mubr.msk.f32.vlgmr.msra.gmra.mxu1 %vm1186_vm1, %v12265_v56  ;;  %v12342_v16 = vmul.f32 0.17677669, %v1097_v13 }
 0x1ee   : > { %10731 = vmatpush3.xpose.msk.msra.mxu1 %vm1186_vm1, %v12269_v57  ;;  %10732 = vmatprep.mubr.msk.f32.mxu1 %vm11765_vm0, %v13780_v6 }
 0x1ef   : > { %10735 = vmatprep.subr.mxu1 %v13780_v6 }
 0x1f1   : > { %10733 = vmatmul.mubr.msk.f32.vlgmr.msra.gmra.mxu1 %vm1186_vm1, %v12277_v60 }
 0x1f2   : > { %10736 = vmatpush3.xpose.msk.msra.mxu1 %vm1186_vm1, %v12282_v62  ;;  %10737 = vmatprep.mubr.msk.f32.mxu1 %vm11765_vm0, %v13780_v6 }
 0x1f3   : > { %10740 = vmatprep.subr.mxu1 %v13780_v6 }
 0x1f5   : > { %10738 = vmatmul.mubr.msk.f32.vlgmr.msra.gmra.mxu1 %vm1186_vm1, %v12290_v0 }
 0x1f6   : > { %10741 = vmatpush3.xpose.msk.msra.mxu1 %vm1186_vm1, %v12295_v2  ;;  %10742 = vmatprep.mubr.msk.f32.mxu1 %vm11765_vm0, %v13780_v6 }
 0x1f7   : > { %10745 = vmatprep.subr.mxu1 %v13780_v6 }
 0x1f9   : > { %10743 = vmatmul.mubr.msk.f32.vlgmr.msra.gmra.mxu1 %vm1186_vm1, %v12303_v7 }
 0x1fa   : > { %10746 = vmatpush3.xpose.msk.msra.mxu1 %vm1186_vm1, %v12308_v9  ;;  %10747 = vmatprep.mubr.msk.f32.mxu1 %vm11765_vm0, %v13780_v6 }
 0x1fb   : > { %10750 = vmatprep.subr.mxu1 %v13780_v6 }
 0x1fd   : > { %10748 = vmatmul.mubr.msk.f32.vlgmr.msra.gmra.mxu1 %vm1186_vm1, %v12317_v11 }
 0x1fe   : > { %10751 = vmatpush3.xpose.msk.msra.mxu1 %vm1186_vm1, %v12321_v12  ;;  %10752 = vmatprep.mubr.msk.f32.mxu1 %vm11765_vm0, %v13780_v6 }
 0x1ff   : > { %10755 = vmatprep.subr.mxu1 %v13780_v6 }
 0x201   : > { %10753 = vmatmul.mubr.msk.f32.vlgmr.msra.gmra.mxu1 %vm1186_vm1, %v12329_v14 }
 0x202   : > { %10756 = vmatpush3.xpose.msk.msra.mxu1 %vm1186_vm1, %v12334_v15  ;;  %10757 = vmatprep.mubr.msk.f32.mxu1 %vm11765_vm0, %v13780_v6 }
 0x203   : > { %10765 = vmatprep.subr.mxu1 %v13780_v6 }
 0x205   : > { %10758 = vmatmul.mubr.msk.f32.vlgmr.msra.gmra.mxu1 %vm1186_vm1, %v12342_v16 }
 0x206   : > { %10767 = vmatprep.mubr.msk.f32.mxu1 %vm11765_vm0, %v13780_v6  ;;  %10766 = vmatpush3.msk.msra.mxu1 %vm1880_vm2, %v12364_v26 }
 0x207   : > { %10775 = vmatprep.subr.mxu1 %v13780_v6 }
 0x2a9   : > { %v1258_v27 = vpop.f32.mrf.mxu1 }
 0x2aa   : > { %v1788_v28 = vsel %vm1787_vm3, %v1258_v27, -inf }
 0x2ab   : > { %1789 = vmax.xlane.f32.xlu0 %v1788_v28  ;;  %v10724_v29 = vpop.f32.mrf.mxu1 }
 0x2ad   : > { %v1333_v30 = vpop.f32.mrf.mxu1 }
 0x2ae   : > { %v1791_v31 = vsel %vm1787_vm3, %v1333_v30, -inf }
 0x2af   : > { %1792 = vmax.xlane.f32.xlu0 %v1791_v31  ;;  %v10729_v32 = vpop.f32.mrf.mxu1 }
 0x2b1   : > { %v1408_v35 = vpop.f32.mrf.mxu1 }
 0x2b2   : > { %v1794_v36 = vsel %vm1787_vm3, %v1408_v35, -inf }
 0x2b3   : > { %1795 = vmax.xlane.f32.xlu1 %v1794_v36  ;;  %v10734_v37 = vpop.f32.mrf.mxu1 }
 0x2b5   : > { %v1483_v39 = vpop.f32.mrf.mxu1 }
 0x2b6   : > { %v1797_v40 = vsel %vm1787_vm3, %v1483_v39, -inf }
 0x2b7   : > { %1798 = vmax.xlane.f32.xlu1 %v1797_v40  ;;  %v10739_v41 = vpop.f32.mrf.mxu1 }
 0x2b9   : > { %v1558_v42 = vpop.f32.mrf.mxu1 }
 0x2ba   : > { %v1800_v43 = vsel %vm1787_vm3, %v1558_v42, -inf }
 0x2bb   : > { %1801 = vmax.xlane.f32.xlu0 %v1800_v43  ;;  %v10744_v45 = vpop.f32.mrf.mxu1 }
 0x2bd   : > { %v1633_v46 = vpop.f32.mrf.mxu1 }
 0x2be   : > { %v1803_v47 = vsel %vm1787_vm3, %v1633_v46, -inf }
 0x2bf   : > { %1804 = vmax.xlane.f32.xlu1 %v1803_v47  ;;  %v10749_v49 = vpop.f32.mrf.mxu1 }
 0x2c1   : > { %v1708_v50 = vpop.f32.mrf.mxu1 }
 0x2c2   : > { %v1806_v52 = vsel %vm1787_vm3, %v1708_v50, -inf }
 0x2c3   : > { %1807 = vmax.xlane.f32.xlu0 %v1806_v52  ;;  %v10754_v54 = vpop.f32.mrf.mxu1 }
 0x2c5   : > { %v12379_v55 = vpop.f32.mrf.mxu1 }
 0x2c6   : > { %v1809_v53 = vsel %vm1787_vm3, %v12379_v55, -inf }
 0x2c7   : > { %v10759_v58 = vpop.f32.mrf.mxu1 }
 0x2d0   : > { %2586 = vrot.lane.b32.xlu1 %v12383_v59, %s11767_s0 }
 0x2d4   : > { %2485 = vrot.lane.b32.xlu1 %v12389_v61, %s11767_s0 }
 0x2d8   : > { %2577 = vrot.lane.b32.xlu1 %v12395_v63, %s11767_s0 }
 0x2d9   : > { %2494 = vrot.lane.b32.xlu0 %v12399_v1, %s11767_s0 }
 0x2dd   : > { %2678 = vrot.lane.b32.xlu0 %v12407_v51, %s11767_s0 }
 0x2fc   : > { %1810 = vmax.xlane.f32.xlu1 %v1809_v53  ;;  %v12449_v53 = vrot.slane %v12290_v0, %v12243_v44  ;;  %v12469_v0 = vrot.slane %v12295_v2, %v12243_v44  ;;  %v12491_v2 = vrot.slane %v12329_v14, %v12243_v44  ;;  %v12508_v14 = vrot.slane %v12334_v15, %v12243_v44 }
 0x30d   : > { %2770 = vrot.lane.b32.xlu1 %v12415_v48, %s11767_s0 }
 0x334   : > { %v1790_v56 = vpop.xlane.xlu0 %1789 }
 0x335   : > { %v1812_v3 = vsub.f32 %v1258_v27, %v1790_v56  ;;  %v12455_v56 = vrot.slane %v12308_v9, %v12243_v44 }
 0x337   : > { %v1820_v4 = vmul.f32 1.442695, %v1812_v3  ;;  %v12461_v3 = vrot.slane %v12277_v60, %v12243_v44  ;;  %v12483_v60 = vrot.slane %v12321_v12, %v12243_v44 }
 0x338   : > { %v1793_v8 = vpop.xlane.xlu0 %1792 }
 0x339   : > { %11340 = vpow2.f32 %v1820_v4  ;;  %v1813_v57 = vsub.f32 %v1333_v30, %v1793_v8  ;;  %v12477_v8 = vrot.slane %v12303_v7, %v12243_v44 }
 0x33b   : > { %v1822_v10 = vmul.f32 1.442695, %v1813_v57 }
 0x33c   : > { %v1796_v13 = vpop.xlane.xlu1 %1795 }
 0x33d   : > { %11342 = vpow2.f32 %v1822_v10  ;;  %v1814_v18 = vsub.f32 %v1408_v35, %v1796_v13 }
 0x33f   : > { %v1824_v19 = vmul.f32 1.442695, %v1814_v18 }
 0x340   : > { %v1799_v21 = vpop.xlane.xlu1 %1798 }
 0x341   : > { %11344 = vpow2.f32 %v1824_v19  ;;  %v1815_v22 = vsub.f32 %v1483_v39, %v1799_v21  ;;  %v12502_v19 = vrot.slane %v12317_v11, %v12243_v44 }
 0x343   : > { %v1826_v25 = vmul.f32 1.442695, %v1815_v22 }
 0x344   : > { %v1802_v62 = vpop.xlane.xlu0 %1801 }
 0x345   : > { %11346 = vpow2.f32 %v1826_v25  ;;  %v1816_v28 = vsub.f32 %v1558_v42, %v1802_v62 }
 0x346   : > { %v12419_v29 = vpop.eup %11340 }
 0x347   : > { %v1828_v31 = vmul.f32 1.442695, %v1816_v28  ;;  %v1836_v27 = vsel %vm1787_vm3, %v12419_v29, 0.0  ;;  %v1144_v28 = vcombine.high %v12354_v20, %v12354_v20 }
 0x348   : > { %v1805_v32 = vpop.xlane.xlu1 %1804  ;;  %1837 = vadd.xlane.f32.xlu0 %v1836_v27 }
 0x349   : > { %11348 = vpow2.f32 %v1828_v31  ;;  %v1817_v30 = vsub.f32 %v1633_v46, %v1805_v32  ;;  %v12528_v32 = vrot.slane %v1144_v28, %v12243_v44 }
 0x34a   : > { %v12423_v36 = vpop.eup %11342 }
 0x34b   : > { %v1830_v35 = vmul.f32 1.442695, %v1817_v30  ;;  %v1839_v37 = vsel %vm1787_vm3, %v12423_v36, 0.0 }
 0x34c   : > { %v1808_v39 = vpop.xlane.xlu0 %1807  ;;  %1840 = vadd.xlane.f32.xlu1 %v1839_v37  ;;  %v12463_v4 = vpop.permute.xlu1 %2586 }
 0x34d   : > { %11350 = vpow2.f32 %v1830_v35  ;;  %v1818_v40 = vsub.f32 %v1708_v50, %v1808_v39 }
 0x34e   : > { %v12427_v41 = vpop.eup %11344 }
 0x34f   : > { %v1832_v42 = vmul.f32 1.442695, %v1818_v40  ;;  %v1842_v43 = vsel %vm1787_vm3, %v12427_v41, 0.0 }
 0x350   : > { %1843 = vadd.xlane.f32.xlu0 %v1842_v43  ;;  %v12473_v9 = vpop.permute.xlu1 %2485  ;;  %v12518_v21 = vpop.permute.xlu0 %2494 }
 0x351   : > { %11352 = vpow2.f32 %v1832_v42 }
 0x352   : > { %v12431_v45 = vpop.eup %11346 }
 0x353   : > { %v1845_v46 = vsel %vm1787_vm3, %v12431_v45, 0.0 }
 0x354   : > { %1846 = vadd.xlane.f32.xlu1 %v1845_v46  ;;  %v12485_v57 = vpop.permute.xlu1 %2577  ;;  %v12520_v11 = vpop.permute.xlu0 %2678 }
 0x356   : > { %v12435_v47 = vpop.eup %11348 }
 0x357   : > { %v1848_v49 = vsel %vm1787_vm3, %v12435_v47, 0.0 }
 0x358   : > { %1849 = vadd.xlane.f32.xlu0 %v1848_v49 }
 0x35a   : > { %v12439_v50 = vpop.eup %11350 }
 0x35b   : > { %v1851_v52 = vsel %vm1787_vm3, %v12439_v50, 0.0 }
 0x35c   : > { %1852 = vadd.xlane.f32.xlu1 %v1851_v52 }
 0x35e   : > { %v12443_v54 = vpop.eup %11352 }
 0x35f   : > { %v1854_v58 = vsel %vm1787_vm3, %v12443_v54, 0.0 }
 0x360   : > { %1855 = vadd.xlane.f32.xlu0 %v1854_v58 }
 0x36d   : > { %2761 = vrot.lane.b32.xlu1 %v12449_v53, %s11767_s0 }
 0x371   : > { %2954 = vrot.lane.b32.xlu1 %v12455_v56, %s11767_s0 }
 0x376   : > { %2669 = vrot.lane.b32.xlu0 %v12461_v3, %s11767_s0 }
 0x37a   : > { %2862 = vrot.lane.b32.xlu0 %v12469_v0, %s11767_s0 }
 0x37e   : > { %2853 = vrot.lane.b32.xlu0 %v12477_v8, %s11767_s0 }
 0x382   : > { %3046 = vrot.lane.b32.xlu0 %v12483_v60, %s11767_s0 }
 0x385   : > { %v1811_v10 = vpop.xlane.xlu1 %1810 }
 0x386   : > { %v1819_v7 = vsub.f32 %v12379_v55, %v1811_v10  ;;  %3037 = vrot.lane.b32.xlu0 %v12491_v2, %s11767_s0  ;;  %v12514_v55 = vrot.slane %v12342_v16, %v12243_v44 }
 0x388   : > { %v1834_v13 = vmul.f32 1.442695, %v1819_v7 }
 0x389   : > { %v12522_v22 = vpop.permute.xlu1 %2770 }
 0x38a   : > { %11354 = vpow2.f32 %v1834_v13 }
 0x397   : > { %v12496_v18 = vpop.eup %11354 }
 0x398   : > { %v1857_v12 = vsel %vm1787_vm3, %v12496_v18, 0.0 }
 0x399   : > { %1858 = vadd.xlane.f32.xlu1 %v1857_v12 }
 0x3aa   : > { %2945 = vrot.lane.b32.xlu1 %v12502_v19, %s11767_s0 }
 0x3ae   : > { %3138 = vrot.lane.b32.xlu1 %v12508_v14, %s11767_s0 }
 0x3b2   : > { %3129 = vrot.lane.b32.xlu1 %v12514_v55, %s11767_s0 }
 0x3d1   : > { %v1838_v25 = vpop.xlane.xlu0 %1837 }
 0x3d2   : > { %11356 = vrcp.f32 %v1838_v25 }
 0x3d5   : > { %v1841_v15 = vpop.xlane.xlu1 %1840 }
 0x3d6   : > { %11358 = vrcp.f32 %v1841_v15 }
 0x3d9   : > { %v1844_v62 = vpop.xlane.xlu0 %1843 }
 0x3da   : > { %11360 = vrcp.f32 %v1844_v62 }
 0x3dd   : > { %v1847_v16 = vpop.xlane.xlu1 %1846 }
 0x3de   : > { %11362 = vrcp.f32 %v1847_v16 }
 0x3df   : > { %v11357_v31 = vpop.eup %11356 }
 0x3e0   : > { %v1868_v27 = vmul.f32 %v11357_v31, %v12419_v29  ;;  %v12539_v29 = vcombine.high %v12528_v32, %v12528_v32 }
 0x3e1   : > { %v1850_v30 = vpop.xlane.xlu0 %1849 }
 0x3e2   : > { %11364 = vrcp.f32 %v1850_v30  ;;  %10763 = vmatmul.mubr.msk.f32.vlgmr.msra.gmra.mxu0 %vm1876_vm4, %v1868_v27 }
 0x3e3   : > { %v11359_v35 = vpop.eup %11358  ;;  %10771 = vmatpush3.msk.msra.mxu0 %vm1880_vm2, %v12528_v32  ;;  %10772 = vmatprep.mubr.msk.f32.mxu0 %vm11765_vm0, %v13780_v6 }
 0x3e4   : > { %v1869_v20 = vmul.f32 %v11359_v35, %v12423_v36  ;;  %10780 = vmatprep.subr.mxu0 %v13780_v6  ;;  %v12550_v36 = vrot.slane %v12360_v24, %v12243_v44 }
 0x3e5   : > { %v1853_v37 = vpop.xlane.xlu1 %1852 }
 0x3e6   : > { %11366 = vrcp.f32 %v1853_v37  ;;  %10768 = vmatmul.mubr.msk.f32.vlgmr.msra.gmra.mxu1 %vm1876_vm4, %v1869_v20  ;;  %v12563_v49 = vcombine.high %v12550_v36, %v12550_v36 }
 0x3e7   : > { %v11361_v39 = vpop.eup %11360  ;;  %10776 = vmatpush3.msk.msra.mxu1 %vm1880_vm2, %v12539_v29  ;;  %10777 = vmatprep.mubr.msk.f32.mxu1 %vm11765_vm0, %v13780_v6 }
 0x3e8   : > { %v1870_v40 = vmul.f32 %v11361_v39, %v12427_v41  ;;  %10785 = vmatprep.subr.mxu1 %v13780_v6  ;;  %v1161_v41 = vcombine.high %v12360_v24, %v12360_v24 }
 0x3e9   : > { %v1856_v42 = vpop.xlane.xlu0 %1855 }
 0x3ea   : > { %11368 = vrcp.f32 %v1856_v42  ;;  %10773 = vmatmul.mubr.msk.f32.vlgmr.msra.gmra.mxu0 %vm1876_vm4, %v1870_v40  ;;  %v12573_v58 = vrot.slane %v1161_v41, %v12243_v44 }
 0x3eb   : > { %v11363_v43 = vpop.eup %11362  ;;  %10781 = vmatpush3.msk.msra.mxu0 %vm1880_vm2, %v12550_v36  ;;  %10782 = vmatprep.mubr.msk.f32.mxu0 %vm11765_vm0, %v13780_v6 }
 0x3ec   : > { %v1871_v46 = vmul.f32 %v11363_v43, %v12431_v45  ;;  %10790 = vmatprep.subr.mxu0 %v13780_v6 }
 0x3ed   : > { %v2670_v24 = vpop.permute.xlu0 %2669 }
 0x3ee   : > { %10778 = vmatmul.mubr.msk.f32.vlgmr.msra.gmra.mxu1 %vm1876_vm4, %v1871_v46 }
 0x3ef   : > { %v11365_v52 = vpop.eup %11364  ;;  %10786 = vmatpush3.msk.msra.mxu1 %vm1880_vm2, %v12563_v49  ;;  %10787 = vmatprep.mubr.msk.f32.mxu1 %vm11765_vm0, %v13780_v6 }
 0x3f0   : > { %v1872_v45 = vmul.f32 %v11365_v52, %v12435_v47  ;;  %10795 = vmatprep.subr.mxu1 %v13780_v6  ;;  %v12584_v47 = vcombine.high %v12573_v58, %v12573_v58 }
 0x3f1   : > { %v2863_v12 = vpop.permute.xlu0 %2862 }
 0x3f2   : > { %10783 = vmatmul.mubr.msk.f32.vlgmr.msra.gmra.mxu0 %vm1876_vm4, %v1872_v45 }
 0x3f3   : > { %v11367_v10 = vpop.eup %11366  ;;  %10791 = vmatpush3.msk.msra.mxu0 %vm1880_vm2, %v12573_v58  ;;  %10792 = vmatprep.mubr.msk.f32.mxu0 %vm11765_vm0, %v13780_v6 }
 0x3f4   : > { %v1873_v7 = vmul.f32 %v11367_v10, %v12439_v50  ;;  %10800 = vmatprep.subr.mxu0 %v13780_v6 }
 0x3f5   : > { %v2854_v50 = vpop.permute.xlu0 %2853 }
 0x3f6   : > { %10788 = vmatmul.mubr.msk.f32.vlgmr.msra.gmra.mxu1 %vm1876_vm4, %v1873_v7 }
 0x3f7   : > { %v11369_v13 = vpop.eup %11368  ;;  %10796 = vmatpush3.msk.msra.mxu1 %vm1880_vm2, %v12584_v47  ;;  %10797 = vmatprep.mubr.msk.f32.mxu1 %vm11765_vm0, %v13780_v6 }
 0x3f8   : > { %v1874_v25 = vmul.f32 %v11369_v13, %v12443_v54  ;;  %10805 = vmatprep.subr.mxu1 %v13780_v6 }
 0x3f9   : > { %v3047_v54 = vpop.permute.xlu0 %3046 }
 0x3fa   : > { %10793 = vmatmul.mubr.msk.f32.vlgmr.msra.gmra.mxu0 %vm1876_vm4, %v1874_v25 }
 0x3fb   : > { %10801 = vmatpush3.xpose.msk.msra.mxu0 %vm1186_vm1, %v12518_v21  ;;  %10802 = vmatprep.mubr.msk.f32.mxu0 %vm11765_vm0, %v13780_v6  ;;  %v2762_v21 = vpop.permute.xlu1 %2761 }
 0x3fc   : > { %10810 = vmatprep.subr.mxu0 %v13780_v6 }
 0x3fe   : > { %10803 = vmatmul.mubr.msk.f32.vlgmr.msra.gmra.mxu0 %vm1186_vm1, %v12473_v9  ;;  %v3038_v9 = vpop.permute.xlu0 %3037 }
 0x3ff   : > { %10811 = vmatpush3.xpose.msk.msra.mxu0 %vm1186_vm1, %v12520_v11  ;;  %10812 = vmatprep.mubr.msk.f32.mxu0 %vm11765_vm0, %v13780_v6  ;;  %v2955_v11 = vpop.permute.xlu1 %2954 }
 0x400   : > { %10820 = vmatprep.subr.mxu0 %v13780_v6 }
 0x402   : > { %10813 = vmatmul.mubr.msk.f32.vlgmr.msra.gmra.mxu0 %vm1186_vm1, %v2670_v24 }
 0x403   : > { %10821 = vmatpush3.xpose.msk.msra.mxu0 %vm1186_vm1, %v2863_v12  ;;  %10822 = vmatprep.mubr.msk.f32.mxu0 %vm11765_vm0, %v13780_v6 }
 0x404   : > { %10830 = vmatprep.subr.mxu0 %v13780_v6 }
 0x406   : > { %10823 = vmatmul.mubr.msk.f32.vlgmr.msra.gmra.mxu0 %vm1186_vm1, %v2854_v50 }
 0x407   : > { %10831 = vmatpush3.xpose.msk.msra.mxu0 %vm1186_vm1, %v3047_v54  ;;  %10832 = vmatprep.mubr.msk.f32.mxu0 %vm11765_vm0, %v13780_v6 }
 0x408   : > { %10840 = vmatprep.subr.mxu0 %v13780_v6 }
 0x40a   : > { %10833 = vmatmul.mubr.msk.f32.vlgmr.msra.gmra.mxu0 %vm1186_vm1, %v3038_v9 }
 0x40b   : > { %10842 = vmatprep.mubr.msk.f32.mxu0 %vm11765_vm0, %v13780_v6 }
 0x422   : > { %v1859_v15 = vpop.xlane.xlu1 %1858 }
 0x423   : > { %11370 = vrcp.f32 %v1859_v15 }
 0x426   : > { %v2946_v16 = vpop.permute.xlu1 %2945 }
 0x430   : > { %v11371_v62 = vpop.eup %11370 }
 0x431   : > { %v1875_v28 = vmul.f32 %v11371_v62, %v12496_v18 }
 0x433   : > { %10798 = vmatmul.mubr.msk.f32.vlgmr.msra.gmra.mxu1 %vm1876_vm4, %v1875_v28 }
 0x434   : > { %10806 = vmatpush3.xpose.msk.msra.mxu1 %vm1186_vm1, %v12463_v4  ;;  %10807 = vmatprep.mubr.msk.f32.mxu1 %vm11765_vm0, %v13780_v6  ;;  %v3139_v4 = vpop.permute.xlu1 %3138 }
 0x435   : > { %10815 = vmatprep.subr.mxu1 %v13780_v6 }
 0x437   : > { %10808 = vmatmul.mubr.msk.f32.vlgmr.msra.gmra.mxu1 %vm1186_vm1, %v12485_v57 }
 0x438   : > { %10816 = vmatpush3.xpose.msk.msra.mxu1 %vm1186_vm1, %v12522_v22  ;;  %10817 = vmatprep.mubr.msk.f32.mxu1 %vm11765_vm0, %v13780_v6  ;;  %v3130_v57 = vpop.permute.xlu1 %3129 }
 0x439   : > { %10825 = vmatprep.subr.mxu1 %v13780_v6 }
 0x43b   : > { %10818 = vmatmul.mubr.msk.f32.vlgmr.msra.gmra.mxu1 %vm1186_vm1, %v2762_v21 }
 0x43c   : > { %10826 = vmatpush3.xpose.msk.msra.mxu1 %vm1186_vm1, %v2955_v11  ;;  %10827 = vmatprep.mubr.msk.f32.mxu1 %vm11765_vm0, %v13780_v6 }
 0x43d   : > { %10835 = vmatprep.subr.mxu1 %v13780_v6 }
 0x43f   : > { %10828 = vmatmul.mubr.msk.f32.vlgmr.msra.gmra.mxu1 %vm1186_vm1, %v2946_v16 }
 0x440   : > { %10836 = vmatpush3.xpose.msk.msra.mxu1 %vm1186_vm1, %v3139_v4  ;;  %10837 = vmatprep.mubr.msk.f32.mxu1 %vm11765_vm0, %v13780_v6 }
 0x441   : > { %10845 = vmatprep.subr.mxu1 %v13780_v6 }
 0x443   : > { %10838 = vmatmul.mubr.msk.f32.vlgmr.msra.gmra.mxu1 %vm1186_vm1, %v3130_v57 }
 0x444   : > { %10847 = vmatprep.mubr.msk.f32.mxu1 %vm11765_vm0, %v13780_v6 }
 0x4a2   : > { %v12646_v18 = vpop.f32.mrf.mxu0 }
 0x4a4   : > { %v10764_v22 = vpop.f32.mrf.mxu0 }
 0x4a6   : > { %v12648_v31 = vpop.f32.mrf.mxu1 }
 0x4a8   : > { %v10769_v27 = vpop.f32.mrf.mxu1 }
 0x4aa   : > { %v12650_v30 = vpop.f32.mrf.mxu0 }
 0x4ac   : > { %v10774_v35 = vpop.f32.mrf.mxu0 }
 0x4ae   : > { %v12652_v20 = vpop.f32.mrf.mxu1 }
 0x4b0   : > { %v10779_v37 = vpop.f32.mrf.mxu1 }
 0x4b2   : > { %v12654_v39 = vpop.f32.mrf.mxu0 }
 0x4b4   : > { %v10784_v40 = vpop.f32.mrf.mxu0 }
 0x4b6   : > { %v12656_v42 = vpop.f32.mrf.mxu1 }
 0x4b8   : > { %v10789_v43 = vpop.f32.mrf.mxu1 }
 0x4ba   : > { %v12658_v46 = vpop.f32.mrf.mxu0 }
 0x4bc   : > { %v10794_v41 = vpop.f32.mrf.mxu0 }
 0x4bd   : > { %v12679_v41 = vrot.slane %v12364_v26, %v12243_v44  ;;  %v12703_v26 = vrot.slane %v12563_v49, %v12243_v44 }
 0x4be   : > { %v2566_v52 = vpop.f32.mrf.mxu0 }
 0x4bf   : > { %v3214_v45 = vsel %vm1787_vm3, %v2566_v52, -inf }
 0x4c0   : > { %3215 = vmax.xlane.f32.xlu0 %v3214_v45  ;;  %v10804_v24 = vpop.f32.mrf.mxu0  ;;  %v12685_v45 = vrot.slane %v12528_v32, %v12243_v44  ;;  %v12707_v32 = vrot.slane %v12550_v36, %v12243_v44 }
 0x4c1   : > { %v12691_v24 = vrot.slane %v12539_v29, %v12243_v44  ;;  %v12719_v29 = vrot.slane %v12573_v58, %v12243_v44 }
 0x4c2   : > { %v2750_v10 = vpop.f32.mrf.mxu0 }
 0x4c3   : > { %v3220_v7 = vsel %vm1787_vm3, %v2750_v10, -inf }
 0x4c4   : > { %3221 = vmax.xlane.f32.xlu0 %v3220_v7  ;;  %v10814_v13 = vpop.f32.mrf.mxu0  ;;  %v12695_v7 = vrot.slane %v12358_v23, %v12243_v44  ;;  %v12715_v23 = vrot.slane %v12584_v47, %v12243_v44 }
 0x4c6   : > { %v12662_v12 = vpop.f32.mrf.mxu0 }
 0x4c7   : > { %v3226_v22 = vsel %vm1787_vm3, %v12662_v12, -inf }
 0x4c8   : > { %v10824_v25 = vpop.f32.mrf.mxu0 }
 0x4ca   : > { %v12664_v50 = vpop.f32.mrf.mxu0 }
 0x4cb   : > { %v3232_v40 = vsel %vm1787_vm3, %v12664_v50, -inf }
 0x4cc   : > { %v10834_v54 = vpop.f32.mrf.mxu0 }
 0x4f3   : > { %v12666_v9 = vpop.f32.mrf.mxu1 }
 0x4f5   : > { %v10799_v21 = vpop.f32.mrf.mxu1 }
 0x4f7   : > { %v2658_v11 = vpop.f32.mrf.mxu1 }
 0x4f8   : > { %v3217_v15 = vsel %vm1787_vm3, %v2658_v11, -inf }
 0x4f9   : > { %3218 = vmax.xlane.f32.xlu1 %v3217_v15  ;;  %v10809_v62 = vpop.f32.mrf.mxu1 }
 0x4fb   : > { %v2842_v28 = vpop.f32.mrf.mxu1 }
 0x4fc   : > { %v3223_v16 = vsel %vm1787_vm3, %v2842_v28, -inf }
 0x4fd   : > { %3224 = vmax.xlane.f32.xlu0 %v3223_v16  ;;  %v10819_v4 = vpop.f32.mrf.mxu1 }
 0x4ff   : > { %v3026_v57 = vpop.f32.mrf.mxu1 }
 0x500   : > { %v3229_v27 = vsel %vm1787_vm3, %v3026_v57, -inf }
 0x501   : > { %3227 = vmax.xlane.f32.xlu0 %v3226_v22  ;;  %3230 = vmax.xlane.f32.xlu1 %v3229_v27  ;;  %v10829_v35 = vpop.f32.mrf.mxu1 }
 0x503   : > { %v12673_v37 = vpop.f32.mrf.mxu1 }
 0x504   : > { %v3235_v13 = vsel %vm1787_vm3, %v12673_v37, -inf }
 0x505   : > { %3233 = vmax.xlane.f32.xlu0 %v3232_v40  ;;  %v10839_v43 = vpop.f32.mrf.mxu1 }
 0x512   : > { %3393 = vrot.lane.b32.xlu1 %v12679_v41, %s11767_s0 }
 0x516   : > { %3477 = vrot.lane.b32.xlu1 %v12685_v45, %s11767_s0 }
 0x51a   : > { %3561 = vrot.lane.b32.xlu1 %v12691_v24, %s11767_s0 }
 0x51b   : > { %3309 = vrot.lane.b32.xlu0 %v12695_v7, %s11767_s0 }
 0x51e   : > { %3729 = vrot.lane.b32.xlu1 %v12703_v26, %s11767_s0 }
 0x51f   : > { %3645 = vrot.lane.b32.xlu0 %v12707_v32, %s11767_s0 }
 0x522   : > { %3897 = vrot.lane.b32.xlu1 %v12715_v23, %s11767_s0 }
 0x523   : > { %3813 = vrot.lane.b32.xlu0 %v12719_v29, %s11767_s0 }
 0x526   : > { %4054 = vrot.lane.b32.xlu1 %v12383_v59, %s11768_s2 }
 0x527   : > { %3976 = vrot.lane.b32.xlu0 %v12399_v1, %s11768_s2 }
 0x52a   : > { %4052 = vrot.lane.b32.xlu1 %v12395_v63, %s11768_s2 }
 0x52b   : > { %3974 = vrot.lane.b32.xlu0 %v12389_v61, %s11768_s2 }
 0x52f   : > { %4132 = vrot.lane.b32.xlu0 %v12407_v51, %s11768_s2 }
 0x549   : > { %v3216_v36 = vpop.xlane.xlu0 %3215 }
 0x54a   : > { %v3238_v49 = vsub.f32 %v2566_v52, %v3216_v36 }
 0x54c   : > { %v3246_v58 = vmul.f32 1.442695, %v3238_v49 }
 0x54d   : > { %v3222_v47 = vpop.xlane.xlu0 %3221 }
 0x54e   : > { %11372 = vpow2.f32 %v3246_v58  ;;  %v3240_v25 = vsub.f32 %v2750_v10, %v3222_v47  ;;  %3236 = vmax.xlane.f32.xlu1 %v3235_v13 }
 0x550   : > { %v3250_v54 = vmul.f32 1.442695, %v3240_v25 }
 0x552   : > { %11374 = vpow2.f32 %v3250_v54 }
 0x55b   : > { %v12737_v21 = vpop.eup %11372 }
 0x55c   : > { %v3262_v15 = vsel %vm1787_vm3, %v12737_v21, 0.0 }
 0x55d   : > { %3263 = vadd.xlane.f32.xlu0 %v3262_v15 }
 0x55f   : > { %v12741_v62 = vpop.eup %11374  ;;  %4210 = vrot.lane.b32.xlu1 %v12415_v48, %s11768_s2 }
 0x560   : > { %v3268_v52 = vsel %vm1787_vm3, %v12741_v62, 0.0 }
 0x561   : > { %3269 = vadd.xlane.f32.xlu0 %v3268_v52 }
 0x582   : > { %v3219_v16 = vpop.xlane.xlu1 %3218 }
 0x583   : > { %v3239_v10 = vsub.f32 %v2658_v11, %v3219_v16 }
 0x585   : > { %v3248_v4 = vmul.f32 1.442695, %v3239_v10 }
 0x586   : > { %v3225_v22 = vpop.xlane.xlu0 %3224 }
 0x587   : > { %11376 = vpow2.f32 %v3248_v4  ;;  %v3241_v27 = vsub.f32 %v2842_v28, %v3225_v22 }
 0x589   : > { %v3252_v35 = vmul.f32 1.442695, %v3241_v27 }
 0x58a   : > { %v3228_v40 = vpop.xlane.xlu0 %3227  ;;  %v3231_v43 = vpop.xlane.xlu1 %3230 }
 0x58b   : > { %11378 = vpow2.f32 %v3252_v35  ;;  %v3242_v36 = vsub.f32 %v12662_v12, %v3228_v40  ;;  %v3243_v49 = vsub.f32 %v3026_v57, %v3231_v43 }
 0x58d   : > { %v3254_v58 = vmul.f32 1.442695, %v3242_v36  ;;  %v3256_v47 = vmul.f32 1.442695, %v3243_v49 }
 0x58e   : > { %v3234_v13 = vpop.xlane.xlu0 %3233  ;;  %v3394_v25 = vpop.permute.xlu1 %3393 }
 0x58f   : > { %11380 = vpow2.f32 %v3254_v58  ;;  %v3244_v54 = vsub.f32 %v12664_v50, %v3234_v13  ;;  %10846 = vmatpush3.msk.msra.mxu1 %vm1880_vm2, %v3394_v25 }
 0x590   : > { %11382 = vpow2.f32 %v3256_v47  ;;  %10855 = vmatprep.subr.mxu1 %v13780_v6 }
 0x591   : > { %v3258_v11 = vmul.f32 1.442695, %v3244_v54 }
 0x592   : > { %v3310_v28 = vpop.permute.xlu0 %3309  ;;  %v3478_v35 = vpop.permute.xlu1 %3477 }
 0x593   : > { %11384 = vpow2.f32 %v3258_v11  ;;  %10841 = vmatpush3.msk.msra.mxu0 %vm1880_vm2, %v3310_v28 }
 0x594   : > { %v12752_v15 = vpop.eup %11376  ;;  %10850 = vmatprep.subr.mxu0 %v13780_v6 }
 0x595   : > { %v3265_v12 = vsel %vm1787_vm3, %v12752_v15, 0.0 }
 0x596   : > { %3266 = vadd.xlane.f32.xlu1 %v3265_v12  ;;  %v3562_v40 = vpop.permute.xlu1 %3561  ;;  %v3646_v49 = vpop.permute.xlu0 %3645 }
 0x598   : > { %v12757_v57 = vpop.eup %11378 }
 0x599   : > { %v3271_v50 = vsel %vm1787_vm3, %v12757_v57, 0.0 }
 0x59a   : > { %3272 = vadd.xlane.f32.xlu1 %v3271_v50  ;;  %v3730_v43 = vpop.permute.xlu1 %3729  ;;  %v12791_v47 = vpop.permute.xlu0 %3813 }
 0x59c   : > { %v12761_v52 = vpop.eup %11380 }
 0x59d   : > { %v12763_v16 = vpop.eup %11382  ;;  %v3274_v10 = vsel %vm1787_vm3, %v12761_v52, 0.0 }
 0x59e   : > { %3275 = vadd.xlane.f32.xlu0 %v3274_v10  ;;  %v3277_v4 = vsel %vm1787_vm3, %v12763_v16, 0.0  ;;  %v12785_v36 = vpop.permute.xlu1 %3897  ;;  %v12795_v25 = vpop.permute.xlu0 %3976 }
 0x59f   : > { %3278 = vadd.xlane.f32.xlu1 %v3277_v4 }
 0x5a0   : > { %v12769_v22 = vpop.eup %11384 }
 0x5a1   : > { %v3280_v27 = vsel %vm1787_vm3, %v12769_v22, 0.0 }
 0x5a2   : > { %3281 = vadd.xlane.f32.xlu0 %v3280_v27  ;;  %v12789_v58 = vpop.permute.xlu1 %4054  ;;  %v12798_v12 = vpop.permute.xlu0 %3974 }
 0x5a6   : > { %v12793_v13 = vpop.permute.xlu1 %4052  ;;  %v12800_v50 = vpop.permute.xlu0 %4132 }
 0x5b0   : > { %4208 = vrot.lane.b32.xlu1 %v12449_v53, %s11768_s2 }
 0x5b4   : > { %4366 = vrot.lane.b32.xlu1 %v12455_v56, %s11768_s2 }
 0x5b8   : > { %4130 = vrot.lane.b32.xlu0 %v12461_v3, %s11768_s2 }
 0x5bc   : > { %4288 = vrot.lane.b32.xlu0 %v12469_v0, %s11768_s2 }
 0x5c0   : > { %4286 = vrot.lane.b32.xlu0 %v12477_v8, %s11768_s2 }
 0x5c4   : > { %4444 = vrot.lane.b32.xlu0 %v12483_v60, %s11768_s2 }
 0x5c8   : > { %4442 = vrot.lane.b32.xlu0 %v12491_v2, %s11768_s2 }
 0x5d7   : > { %v3237_v54 = vpop.xlane.xlu1 %3236 }
 0x5d8   : > { %v3245_v11 = vsub.f32 %v12673_v37, %v3237_v54  ;;  %v13830_v54 = vmov 0.0  }
 0x5da   : > { %v3260_v28 = vmul.f32 1.442695, %v3245_v11 }
 0x5dc   : > { %11386 = vpow2.f32 %v3260_v28 }
 0x5e6   : > { %v3264_v10 = vpop.xlane.xlu0 %3263 }
 0x5e7   : > { %11388 = vrcp.f32 %v3264_v10 }
 0x5e9   : > { %v12802_v4 = vpop.eup %11386 }
 0x5ea   : > { %v3270_v27 = vpop.xlane.xlu0 %3269  ;;  %v3283_v5 = vsel %vm1787_vm3, %v12802_v4, 0.0 }
 0x5eb   : > { %11390 = vrcp.f32 %v3270_v27  ;;  %3284 = vadd.xlane.f32.xlu1 %v3283_v5  ;;  %v12824_v5 = vpop.permute.xlu1 %4210 }
 0x5f4   : > { %v11389_v6 = vpop.eup %11388 }
 0x5f5   : > { %v3294_v17 = vmul.f32 %v11389_v6, %v12737_v21 }
 0x5f7   : > { %10843 = vmatmul.mubr.msk.f32.vlgmr.msra.gmra.mxu0 %vm1876_vm4, %v3294_v17 }
 0x5f8   : > { %v11391_v37 = vpop.eup %11390  ;;  %10851 = vmatpush3.msk.msra.mxu0 %vm1880_vm2, %v3478_v35  ;;  %10852 = vmatprep.mubr.msk.f32.mxu0 %vm11765_vm0, %v13830_v54 }
 0x5f9   : > { %10860 = vmatprep.subr.mxu0 %v13830_v54  ;;  %v3296_v11 = vmul.f32 %v11391_v37, %v12741_v62 }
 0x5fb   : > { %10853 = vmatmul.mubr.msk.f32.vlgmr.msra.gmra.mxu0 %vm1876_vm4, %v3296_v11 }
 0x5fc   : > { %10861 = vmatpush3.msk.msra.mxu0 %vm1880_vm2, %v3646_v49  ;;  %4364 = vrot.lane.b32.xlu1 %v12502_v19, %s11768_s2 }
 0x5fd   : > { %10862 = vmatprep.mubr.msk.f32.mxu0 %vm11765_vm0, %v13830_v54  ;;  %10870 = vmatprep.subr.mxu0 %v13830_v54 }
 0x600   : > { %4522 = vrot.lane.b32.xlu1 %v12508_v14, %s11768_s2 }
 0x604   : > { %4520 = vrot.lane.b32.xlu1 %v12514_v55, %s11768_s2 }
 0x61f   : > { %v3267_v6 = vpop.xlane.xlu1 %3266 }
 0x620   : > { %11392 = vrcp.f32 %v3267_v6 }
 0x623   : > { %v3273_v17 = vpop.xlane.xlu1 %3272 }
 0x624   : > { %11394 = vrcp.f32 %v3273_v17 }
 0x627   : > { %v3276_v21 = vpop.xlane.xlu0 %3275 }
 0x628   : > { %11396 = vrcp.f32 %v3276_v21  ;;  %v3279_v62 = vpop.xlane.xlu1 %3278 }
 0x629   : > { %11398 = vrcp.f32 %v3279_v62 }
 0x62b   : > { %v3282_v35 = vpop.xlane.xlu0 %3281 }
 0x62c   : > { %11400 = vrcp.f32 %v3282_v35 }
 0x62d   : > { %v11393_v49 = vpop.eup %11392 }
 0x62e   : > { %v3295_v28 = vmul.f32 %v11393_v49, %v12752_v15 }
 0x62f   : > { %v4131_v37 = vpop.permute.xlu0 %4130 }
 0x630   : > { %10848 = vmatmul.mubr.msk.f32.vlgmr.msra.gmra.mxu1 %vm1876_vm4, %v3295_v28 }
 0x631   : > { %v11395_v10 = vpop.eup %11394  ;;  %10856 = vmatpush3.msk.msra.mxu1 %vm1880_vm2, %v3562_v40  ;;  %10857 = vmatprep.mubr.msk.f32.mxu1 %vm11765_vm0, %v13830_v54 }
 0x632   : > { %10865 = vmatprep.subr.mxu1 %v13830_v54  ;;  %v3297_v27 = vmul.f32 %v11395_v10, %v12757_v57 }
 0x633   : > { %v4289_v57 = vpop.permute.xlu0 %4288 }
 0x634   : > { %10858 = vmatmul.mubr.msk.f32.vlgmr.msra.gmra.mxu1 %vm1876_vm4, %v3297_v27 }
 0x635   : > { %v11397_v11 = vpop.eup %11396  ;;  %10866 = vmatpush3.msk.msra.mxu1 %vm1880_vm2, %v3730_v43  ;;  %10867 = vmatprep.mubr.msk.f32.mxu1 %vm11765_vm0, %v13830_v54 }
 0x636   : > { %v11399_v15 = vpop.eup %11398  ;;  %10875 = vmatprep.subr.mxu1 %v13830_v54  ;;  %v3298_v40 = vmul.f32 %v11397_v11, %v12761_v52 }
 0x637   : > { %v3299_v6 = vmul.f32 %v11399_v15, %v12763_v16  ;;  %v4287_v52 = vpop.permute.xlu0 %4286 }
 0x638   : > { %10863 = vmatmul.mubr.msk.f32.vlgmr.msra.gmra.mxu0 %vm1876_vm4, %v3298_v40 }
 0x639   : > { %v11401_v17 = vpop.eup %11400  ;;  %10868 = vmatmul.mubr.msk.f32.vlgmr.msra.gmra.mxu1 %vm1876_vm4, %v3299_v6  ;;  %10871 = vmatpush3.msk.msra.mxu0 %vm1880_vm2, %v12791_v47 }
 0x63a   : > { %10876 = vmatpush3.msk.msra.mxu1 %vm1880_vm2, %v12785_v36  ;;  %10872 = vmatprep.mubr.msk.f32.mxu0 %vm11765_vm0, %v13830_v54  ;;  %v3300_v43 = vmul.f32 %v11401_v17, %v12769_v22  ;;  %v4209_v36 = vpop.permute.xlu1 %4208 }
 0x63b   : > { %10880 = vmatprep.subr.mxu0 %v13830_v54  ;;  %10877 = vmatprep.mubr.msk.f32.mxu1 %vm11765_vm0, %v13830_v54  ;;  %v4445_v16 = vpop.permute.xlu0 %4444 }
 0x63c   : > { %10873 = vmatmul.mubr.msk.f32.vlgmr.msra.gmra.mxu0 %vm1876_vm4, %v3300_v43  ;;  %10885 = vmatprep.subr.mxu1 %v13830_v54 }
 0x63d   : > { %10881 = vmatpush3.xpose.msk.msra.mxu0 %vm1186_vm1, %v12795_v25  ;;  %10882 = vmatprep.mubr.msk.f32.mxu0 %vm11765_vm0, %v13830_v54 }
 0x63e   : > { %10890 = vmatprep.subr.mxu0 %v13830_v54  ;;  %v4367_v47 = vpop.permute.xlu1 %4366 }
 0x63f   : > { %v4443_v22 = vpop.permute.xlu0 %4442 }
 0x640   : > { %10883 = vmatmul.mubr.msk.f32.vlgmr.msra.gmra.mxu0 %vm1186_vm1, %v12798_v12 }
 0x641   : > { %10891 = vmatpush3.xpose.msk.msra.mxu0 %vm1186_vm1, %v12800_v50  ;;  %10892 = vmatprep.mubr.msk.f32.mxu0 %vm11765_vm0, %v13830_v54 }
 0x642   : > { %10900 = vmatprep.subr.mxu0 %v13830_v54 }
 0x644   : > { %10893 = vmatmul.mubr.msk.f32.vlgmr.msra.gmra.mxu0 %vm1186_vm1, %v4131_v37 }
 0x645   : > { %10901 = vmatpush3.xpose.msk.msra.mxu0 %vm1186_vm1, %v4289_v57  ;;  %10902 = vmatprep.mubr.msk.f32.mxu0 %vm11765_vm0, %v13830_v54 }
 0x646   : > { %10910 = vmatprep.subr.mxu0 %v13830_v54 }
 0x648   : > { %10903 = vmatmul.mubr.msk.f32.vlgmr.msra.gmra.mxu0 %vm1186_vm1, %v4287_v52 }
 0x649   : > { %10911 = vmatpush3.xpose.msk.msra.mxu0 %vm1186_vm1, %v4445_v16  ;;  %10912 = vmatprep.mubr.msk.f32.mxu0 %vm11765_vm0, %v13830_v54 }
 0x64a   : > { %10920 = vmatprep.subr.mxu0 %v13830_v54 }
 0x64c   : > { %10913 = vmatmul.mubr.msk.f32.vlgmr.msra.gmra.mxu0 %vm1186_vm1, %v4443_v22 }
 0x64d   : > { %10922 = vmatprep.mubr.msk.f32.mxu0 %vm11765_vm0, %v13830_v54 }
 0x674   : > { %v3285_v25 = vpop.xlane.xlu1 %3284 }
 0x675   : > { %11402 = vrcp.f32 %v3285_v25 }
 0x678   : > { %v4365_v21 = vpop.permute.xlu1 %4364 }
 0x682   : > { %v11403_v12 = vpop.eup %11402 }
 0x683   : > { %v3301_v50 = vmul.f32 %v11403_v12, %v12802_v4 }
 0x685   : > { %10878 = vmatmul.mubr.msk.f32.vlgmr.msra.gmra.mxu1 %vm1876_vm4, %v3301_v50 }
 0x686   : > { %10886 = vmatpush3.xpose.msk.msra.mxu1 %vm1186_vm1, %v12789_v58  ;;  %10887 = vmatprep.mubr.msk.f32.mxu1 %vm11765_vm0, %v13830_v54  ;;  %v4523_v58 = vpop.permute.xlu1 %4522 }
 0x687   : > { %10895 = vmatprep.subr.mxu1 %v13830_v54 }
 0x689   : > { %10888 = vmatmul.mubr.msk.f32.vlgmr.msra.gmra.mxu1 %vm1186_vm1, %v12793_v13 }
 0x68a   : > { %10896 = vmatpush3.xpose.msk.msra.mxu1 %vm1186_vm1, %v12824_v5  ;;  %10897 = vmatprep.mubr.msk.f32.mxu1 %vm11765_vm0, %v13830_v54  ;;  %v4521_v13 = vpop.permute.xlu1 %4520 }
 0x68b   : > { %10905 = vmatprep.subr.mxu1 %v13830_v54 }
 0x68d   : > { %10898 = vmatmul.mubr.msk.f32.vlgmr.msra.gmra.mxu1 %vm1186_vm1, %v4209_v36 }
 0x68e   : > { %10906 = vmatpush3.xpose.msk.msra.mxu1 %vm1186_vm1, %v4367_v47  ;;  %10907 = vmatprep.mubr.msk.f32.mxu1 %vm11765_vm0, %v13830_v54 }
 0x68f   : > { %10915 = vmatprep.subr.mxu1 %v13830_v54 }
 0x691   : > { %10908 = vmatmul.mubr.msk.f32.vlgmr.msra.gmra.mxu1 %vm1186_vm1, %v4365_v21 }
 0x692   : > { %10916 = vmatpush3.xpose.msk.msra.mxu1 %vm1186_vm1, %v4523_v58  ;;  %10917 = vmatprep.mubr.msk.f32.mxu1 %vm11765_vm0, %v13830_v54 }
 0x693   : > { %10925 = vmatprep.subr.mxu1 %v13830_v54 }
 0x695   : > { %10918 = vmatmul.mubr.msk.f32.vlgmr.msra.gmra.mxu1 %vm1186_vm1, %v4521_v13 }
 0x696   : > { %10927 = vmatprep.mubr.msk.f32.mxu1 %vm11765_vm0, %v13830_v54 }
 0x6b7   : > { %v12906_v4 = vpop.f32.mrf.mxu0 }
 0x6b9   : > { %v10844_v5 = vpop.f32.mrf.mxu0 }
 0x6bb   : > { %v12908_v62 = vpop.f32.mrf.mxu0 }
 0x6bd   : > { %v10854_v35 = vpop.f32.mrf.mxu0 }
 0x6f0   : > { %v12910_v49 = vpop.f32.mrf.mxu1 }
 0x6f2   : > { %v10849_v28 = vpop.f32.mrf.mxu1 }
 0x6f4   : > { %v12912_v10 = vpop.f32.mrf.mxu1 }
 0x6f6   : > { %v10859_v27 = vpop.f32.mrf.mxu1 }
 0x6f8   : > { %v12914_v37 = vpop.f32.mrf.mxu0 }
 0x6f9   : > { %v12916_v11 = vpop.f32.mrf.mxu1 }
 0x6fa   : > { %v10864_v15 = vpop.f32.mrf.mxu0 }
 0x6fb   : > { %v10869_v40 = vpop.f32.mrf.mxu1 }
 0x6fc   : > { %v12918_v6 = vpop.f32.mrf.mxu0 }
 0x6fe   : > { %v10874_v17 = vpop.f32.mrf.mxu0 }
 0x700   : > { %v4048_v57 = vpop.f32.mrf.mxu0 }
 0x701   : > { %v4598_v43 = vsel %vm1787_vm3, %v4048_v57, -inf }
 0x702   : > { %4599 = vmax.xlane.f32.xlu0 %v4598_v43  ;;  %v10884_v52 = vpop.f32.mrf.mxu0 }
 0x704   : > { %v4204_v16 = vpop.f32.mrf.mxu0 }
 0x705   : > { %v4604_v22 = vsel %vm1787_vm3, %v4204_v16, -inf }
 0x706   : > { %4605 = vmax.xlane.f32.xlu0 %v4604_v22  ;;  %v10894_v36 = vpop.f32.mrf.mxu0 }
 0x708   : > { %v12922_v47 = vpop.f32.mrf.mxu0 }
 0x709   : > { %v4610_v17 = vsel %vm1787_vm3, %v12922_v47, -inf }
 0x70a   : > { %v10904_v25 = vpop.f32.mrf.mxu0 }
 0x70c   : > { %v12924_v12 = vpop.f32.mrf.mxu0 }
 0x70d   : > { %v4616_v36 = vsel %vm1787_vm3, %v12924_v12, -inf }
 0x70e   : > { %v10914_v50 = vpop.f32.mrf.mxu0 }
 0x745   : > { %v12926_v21 = vpop.f32.mrf.mxu1 }
 0x747   : > { %v10879_v58 = vpop.f32.mrf.mxu1 }
 0x749   : > { %v4126_v13 = vpop.f32.mrf.mxu1 }
 0x74a   : > { %v4601_v5 = vsel %vm1787_vm3, %v4126_v13, -inf }
 0x74b   : > { %4602 = vmax.xlane.f32.xlu1 %v4601_v5  ;;  %v10889_v35 = vpop.f32.mrf.mxu1 }
 0x74d   : > { %v4282_v28 = vpop.f32.mrf.mxu1 }
 0x74e   : > { %v4607_v27 = vsel %vm1787_vm3, %v4282_v28, -inf }
 0x74f   : > { %4608 = vmax.xlane.f32.xlu0 %v4607_v27  ;;  %v10899_v15 = vpop.f32.mrf.mxu1 }
 0x751   : > { %v4438_v40 = vpop.f32.mrf.mxu1 }
 0x752   : > { %v4613_v43 = vsel %vm1787_vm3, %v4438_v40, -inf }
 0x753   : > { %4611 = vmax.xlane.f32.xlu0 %v4610_v17  ;;  %4614 = vmax.xlane.f32.xlu1 %v4613_v43  ;;  %v10909_v52 = vpop.f32.mrf.mxu1 }
 0x755   : > { %v12933_v22 = vpop.f32.mrf.mxu1 }
 0x757   : > { %4617 = vmax.xlane.f32.xlu0 %v4616_v36  ;;  %v10919_v25 = vpop.f32.mrf.mxu1 }
 0x764   : > { %4763 = vrot.lane.b32.xlu1 %v12679_v41, %s11768_s2 }
 0x768   : > { %4840 = vrot.lane.b32.xlu1 %v12685_v45, %s11768_s2 }
 0x76c   : > { %4917 = vrot.lane.b32.xlu1 %v12691_v24, %s11768_s2 }
 0x76d   : > { %4686 = vrot.lane.b32.xlu0 %v12695_v7, %s11768_s2 }
 0x770   : > { %5071 = vrot.lane.b32.xlu1 %v12703_v26, %s11768_s2 }
 0x771   : > { %4994 = vrot.lane.b32.xlu0 %v12707_v32, %s11768_s2 }
 0x774   : > { %5225 = vrot.lane.b32.xlu1 %v12715_v23, %s11768_s2 }
 0x775   : > { %5148 = vrot.lane.b32.xlu0 %v12719_v29, %s11768_s2 }
 0x778   : > { %5382 = vrot.lane.b32.xlu1 %v12383_v59, %s11769_s7 }
 0x779   : > { %5304 = vrot.lane.b32.xlu0 %v12399_v1, %s11769_s7 }
 0x77c   : > { %5380 = vrot.lane.b32.xlu1 %v12395_v63, %s11769_s7  ;;  %v4619_v63 = vsel %vm1787_vm3, %v12933_v22, -inf }
 0x77d   : > { %5302 = vrot.lane.b32.xlu0 %v12389_v61, %s11769_s7 }
 0x781   : > { %5460 = vrot.lane.b32.xlu0 %v12407_v51, %s11769_s7 }
 0x78b   : > { %v4600_v50 = vpop.xlane.xlu0 %4599 }
 0x78c   : > { %v4622_v58 = vsub.f32 %v4048_v57, %v4600_v50 }
 0x78e   : > { %v4630_v5 = vmul.f32 1.442695, %v4622_v58 }
 0x78f   : > { %v4606_v35 = vpop.xlane.xlu0 %4605 }
 0x790   : > { %11404 = vpow2.f32 %v4630_v5  ;;  %v4624_v27 = vsub.f32 %v4204_v16, %v4606_v35 }
 0x792   : > { %v4634_v15 = vmul.f32 1.442695, %v4624_v27 }
 0x794   : > { %11406 = vpow2.f32 %v4634_v15 }
 0x79d   : > { %v12963_v59 = vpop.eup %11404 }
 0x79e   : > { %v4646_v1 = vsel %vm1787_vm3, %v12963_v59, 0.0 }
 0x7a0   : > { %4647 = vadd.xlane.f32.xlu0 %v4646_v1  ;;  %4620 = vmax.xlane.f32.xlu1 %v4619_v63 }
 0x7a1   : > { %v12969_v61 = vpop.eup %11406 }
 0x7a2   : > { %v4652_v51 = vsel %vm1787_vm3, %v12969_v61, 0.0 }
 0x7a4   : > { %4653 = vadd.xlane.f32.xlu0 %v4652_v51 }
 0x7b1   : > { %5538 = vrot.lane.b32.xlu1 %v12415_v48, %s11769_s7 }
 0x7d4   : > { %v4603_v57 = vpop.xlane.xlu1 %4602 }
 0x7d5   : > { %v4623_v16 = vsub.f32 %v4126_v13, %v4603_v57 }
 0x7d7   : > { %v4632_v17 = vmul.f32 1.442695, %v4623_v16 }
 0x7d8   : > { %v4609_v43 = vpop.xlane.xlu0 %4608 }
 0x7d9   : > { %11408 = vpow2.f32 %v4632_v17  ;;  %v4625_v52 = vsub.f32 %v4282_v28, %v4609_v43 }
 0x7db   : > { %v4636_v36 = vmul.f32 1.442695, %v4625_v52 }
 0x7dc   : > { %v4612_v25 = vpop.xlane.xlu0 %4611  ;;  %v4615_v50 = vpop.xlane.xlu1 %4614 }
 0x7dd   : > { %11410 = vpow2.f32 %v4636_v36  ;;  %v4626_v58 = vsub.f32 %v12922_v47, %v4612_v25  ;;  %v4627_v5 = vsub.f32 %v4438_v40, %v4615_v50 }
 0x7df   : > { %v4638_v35 = vmul.f32 1.442695, %v4626_v58  ;;  %v4640_v27 = vmul.f32 1.442695, %v4627_v5 }
 0x7e0   : > { %v4618_v15 = vpop.xlane.xlu0 %4617  ;;  %v4764_v1 = vpop.permute.xlu1 %4763 }
 0x7e1   : > { %11412 = vpow2.f32 %v4638_v35  ;;  %v4628_v48 = vsub.f32 %v12924_v12, %v4618_v15  ;;  %10926 = vmatpush3.msk.msra.mxu1 %vm1880_vm2, %v4764_v1 }
 0x7e2   : > { %11414 = vpow2.f32 %v4640_v27  ;;  %10935 = vmatprep.subr.mxu1 %v13830_v54 }
 0x7e3   : > { %v4642_v13 = vmul.f32 1.442695, %v4628_v48 }
 0x7e4   : > { %v4687_v28 = vpop.permute.xlu0 %4686  ;;  %v4841_v36 = vpop.permute.xlu1 %4840 }
 0x7e5   : > { %11416 = vpow2.f32 %v4642_v13  ;;  %10921 = vmatpush3.msk.msra.mxu0 %vm1880_vm2, %v4687_v28 }
 0x7e6   : > { %v12980_v63 = vpop.eup %11408  ;;  %10930 = vmatprep.subr.mxu0 %v13830_v54 }
 0x7e7   : > { %v4649_v47 = vsel %vm1787_vm3, %v12980_v63, 0.0 }
 0x7e8   : > { %4650 = vadd.xlane.f32.xlu1 %v4649_v47  ;;  %v4995_v25 = vpop.permute.xlu0 %4994  ;;  %v4918_v50 = vpop.permute.xlu1 %4917 }
 0x7ea   : > { %v12985_v40 = vpop.eup %11410 }
 0x7eb   : > { %v4655_v12 = vsel %vm1787_vm3, %v12985_v40, 0.0 }
 0x7ec   : > { %4656 = vadd.xlane.f32.xlu1 %v4655_v12  ;;  %v13011_v58 = vpop.permute.xlu0 %5148  ;;  %v5072_v5 = vpop.permute.xlu1 %5071 }
 0x7ee   : > { %v12989_v51 = vpop.eup %11412 }
 0x7ef   : > { %v12991_v57 = vpop.eup %11414  ;;  %v4658_v16 = vsel %vm1787_vm3, %v12989_v51, 0.0 }
 0x7f0   : > { %4659 = vadd.xlane.f32.xlu0 %v4658_v16  ;;  %v4661_v17 = vsel %vm1787_vm3, %v12991_v57, 0.0 }
 0x7f1   : > { %4662 = vadd.xlane.f32.xlu1 %v4661_v17 }
 0x7f2   : > { %v12997_v43 = vpop.eup %11416 }
 0x7f3   : > { %v4664_v52 = vsel %vm1787_vm3, %v12997_v43, 0.0 }
 0x7f4   : > { %4665 = vadd.xlane.f32.xlu0 %v4664_v52 }
 0x802   : > { %5536 = vrot.lane.b32.xlu1 %v12449_v53, %s11769_s7  ;;  %v13015_v53 = vpop.permute.xlu0 %5304 }
 0x806   : > { %5694 = vrot.lane.b32.xlu1 %v12455_v56, %s11769_s7  ;;  %v13017_v56 = vpop.permute.xlu1 %5225 }
 0x80a   : > { %5458 = vrot.lane.b32.xlu0 %v12461_v3, %s11769_s7  ;;  %v13021_v3 = vpop.permute.xlu0 %5302  ;;  %v13023_v35 = vpop.permute.xlu1 %5382 }
 0x80e   : > { %5616 = vrot.lane.b32.xlu0 %v12469_v0, %s11769_s7  ;;  %v13025_v0 = vpop.permute.xlu0 %5460 }
 0x812   : > { %5614 = vrot.lane.b32.xlu0 %v12477_v8, %s11769_s7  ;;  %v13027_v8 = vpop.permute.xlu1 %5380 }
 0x816   : > { %5772 = vrot.lane.b32.xlu0 %v12483_v60, %s11769_s7 }
 0x81a   : > { %5770 = vrot.lane.b32.xlu0 %v12491_v2, %s11769_s7 }
 0x829   : > { %v4648_v27 = vpop.xlane.xlu0 %4647  ;;  %v4621_v15 = vpop.xlane.xlu1 %4620 }
 0x82a   : > { %11418 = vrcp.f32 %v4648_v27  ;;  %v4629_v60 = vsub.f32 %v12933_v22, %v4621_v15 }
 0x82c   : > { %v4644_v1 = vmul.f32 1.442695, %v4629_v60 }
 0x82d   : > { %v4654_v48 = vpop.xlane.xlu0 %4653 }
 0x82e   : > { %11420 = vpow2.f32 %v4644_v1 }
 0x82f   : > { %11422 = vrcp.f32 %v4654_v48 }
 0x837   : > { %v11419_v13 = vpop.eup %11418 }
 0x838   : > { %v4678_v2 = vmul.f32 %v11419_v13, %v12963_v59  ;;  %v13052_v59 = vpop.permute.xlu1 %5538 }
 0x83a   : > { %10923 = vmatmul.mubr.msk.f32.vlgmr.msra.gmra.mxu0 %vm1876_vm4, %v4678_v2 }
 0x83b   : > { %v13032_v28 = vpop.eup %11420  ;;  %10931 = vmatpush3.msk.msra.mxu0 %vm1880_vm2, %v4841_v36  ;;  %10932 = vmatprep.mubr.msk.f32.mxu0 %vm11765_vm0, %v13830_v54 }
 0x83c   : > { %v11423_v47 = vpop.eup %11422  ;;  %10940 = vmatprep.subr.mxu0 %v13830_v54  ;;  %v4667_v22 = vsel %vm1787_vm3, %v13032_v28, 0.0 }
 0x83d   : > { %4668 = vadd.xlane.f32.xlu1 %v4667_v22  ;;  %v4680_v12 = vmul.f32 %v11423_v47, %v12969_v61 }
 0x83f   : > { %10933 = vmatmul.mubr.msk.f32.vlgmr.msra.gmra.mxu0 %vm1876_vm4, %v4680_v12 }
 0x840   : > { %10941 = vmatpush3.msk.msra.mxu0 %vm1880_vm2, %v4995_v25  ;;  %10942 = vmatprep.mubr.msk.f32.mxu0 %vm11765_vm0, %v13830_v54 }
 0x841   : > { %10950 = vmatprep.subr.mxu0 %v13830_v54 }
 0x84e   : > { %5692 = vrot.lane.b32.xlu1 %v12502_v19, %s11769_s7 }
 0x852   : > { %5850 = vrot.lane.b32.xlu1 %v12508_v14, %s11769_s7 }
 0x856   : > { %5848 = vrot.lane.b32.xlu1 %v12514_v55, %s11769_s7 }
 0x871   : > { %v4651_v61 = vpop.xlane.xlu1 %4650 }
 0x872   : > { %11424 = vrcp.f32 %v4651_v61 }
 0x875   : > { %v4657_v16 = vpop.xlane.xlu1 %4656 }
 0x876   : > { %11426 = vrcp.f32 %v4657_v16 }
 0x879   : > { %v4660_v17 = vpop.xlane.xlu0 %4659 }
 0x87a   : > { %11428 = vrcp.f32 %v4660_v17  ;;  %v4663_v52 = vpop.xlane.xlu1 %4662 }
 0x87b   : > { %11430 = vrcp.f32 %v4663_v52 }
 0x87d   : > { %v4666_v36 = vpop.xlane.xlu0 %4665 }
 0x87e   : > { %11432 = vrcp.f32 %v4666_v36 }
 0x87f   : > { %v11425_v25 = vpop.eup %11424 }
 0x880   : > { %v4679_v19 = vmul.f32 %v11425_v25, %v12980_v63 }
 0x881   : > { %v5459_v27 = vpop.permute.xlu0 %5458 }
 0x882   : > { %10928 = vmatmul.mubr.msk.f32.vlgmr.msra.gmra.mxu1 %vm1876_vm4, %v4679_v19 }
 0x883   : > { %v11427_v14 = vpop.eup %11426  ;;  %10936 = vmatpush3.msk.msra.mxu1 %vm1880_vm2, %v4918_v50  ;;  %10937 = vmatprep.mubr.msk.f32.mxu1 %vm11765_vm0, %v13830_v54 }
 0x884   : > { %10945 = vmatprep.subr.mxu1 %v13830_v54  ;;  %v4681_v55 = vmul.f32 %v11427_v14, %v12985_v40 }
 0x885   : > { %v5617_v40 = vpop.permute.xlu0 %5616 }
 0x886   : > { %10938 = vmatmul.mubr.msk.f32.vlgmr.msra.gmra.mxu1 %vm1876_vm4, %v4681_v55 }
 0x887   : > { %v11429_v15 = vpop.eup %11428  ;;  %10946 = vmatpush3.msk.msra.mxu1 %vm1880_vm2, %v5072_v5  ;;  %10947 = vmatprep.mubr.msk.f32.mxu1 %vm11765_vm0, %v13830_v54 }
 0x888   : > { %v11431_v63 = vpop.eup %11430  ;;  %10955 = vmatprep.subr.mxu1 %v13830_v54  ;;  %v4682_v50 = vmul.f32 %v11429_v15, %v12989_v51 }
 0x889   : > { %v4683_v60 = vmul.f32 %v11431_v63, %v12991_v57  ;;  %v5615_v51 = vpop.permute.xlu0 %5614 }
 0x88a   : > { %10943 = vmatmul.mubr.msk.f32.vlgmr.msra.gmra.mxu0 %vm1876_vm4, %v4682_v50 }
 0x88b   : > { %v11433_v1 = vpop.eup %11432  ;;  %10948 = vmatmul.mubr.msk.f32.vlgmr.msra.gmra.mxu1 %vm1876_vm4, %v4683_v60  ;;  %10951 = vmatpush3.msk.msra.mxu0 %vm1880_vm2, %v13011_v58  ;;  %v5537_v58 = vpop.permute.xlu1 %5536 }
 0x88c   : > { %10956 = vmatpush3.msk.msra.mxu1 %vm1880_vm2, %v13017_v56  ;;  %10952 = vmatprep.mubr.msk.f32.mxu0 %vm11765_vm0, %v13830_v54  ;;  %v4684_v5 = vmul.f32 %v11433_v1, %v12997_v43 }
 0x88d   : > { %10960 = vmatprep.subr.mxu0 %v13830_v54  ;;  %10957 = vmatprep.mubr.msk.f32.mxu1 %vm11765_vm0, %v13830_v54  ;;  %v5773_v57 = vpop.permute.xlu0 %5772 }
 0x88e   : > { %10953 = vmatmul.mubr.msk.f32.vlgmr.msra.gmra.mxu0 %vm1876_vm4, %v4684_v5  ;;  %10965 = vmatprep.subr.mxu1 %v13830_v54 }
 0x88f   : > { %10961 = vmatpush3.xpose.msk.msra.mxu0 %vm1186_vm1, %v13015_v53  ;;  %10962 = vmatprep.mubr.msk.f32.mxu0 %vm11765_vm0, %v13830_v54  ;;  %v5695_v53 = vpop.permute.xlu1 %5694 }
 0x890   : > { %10970 = vmatprep.subr.mxu0 %v13830_v54 }
 0x891   : > { %v5771_v43 = vpop.permute.xlu0 %5770 }
 0x892   : > { %10963 = vmatmul.mubr.msk.f32.vlgmr.msra.gmra.mxu0 %vm1186_vm1, %v13021_v3 }
 0x893   : > { %10971 = vmatpush3.xpose.msk.msra.mxu0 %vm1186_vm1, %v13025_v0  ;;  %10972 = vmatprep.mubr.msk.f32.mxu0 %vm11765_vm0, %v13830_v54 }
 0x894   : > { %10980 = vmatprep.subr.mxu0 %v13830_v54 }
 0x896   : > { %10973 = vmatmul.mubr.msk.f32.vlgmr.msra.gmra.mxu0 %vm1186_vm1, %v5459_v27 }
 0x897   : > { %10981 = vmatpush3.xpose.msk.msra.mxu0 %vm1186_vm1, %v5617_v40  ;;  %10982 = vmatprep.mubr.msk.f32.mxu0 %vm11765_vm0, %v13830_v54 }
 0x898   : > { %10990 = vmatprep.subr.mxu0 %v13830_v54 }
 0x89a   : > { %10983 = vmatmul.mubr.msk.f32.vlgmr.msra.gmra.mxu0 %vm1186_vm1, %v5615_v51 }
 0x89b   : > { %10991 = vmatpush3.xpose.msk.msra.mxu0 %vm1186_vm1, %v5773_v57  ;;  %10992 = vmatprep.mubr.msk.f32.mxu0 %vm11765_vm0, %v13830_v54 }
 0x89c   : > { %11000 = vmatprep.subr.mxu0 %v13830_v54 }
 0x89e   : > { %10993 = vmatmul.mubr.msk.f32.vlgmr.msra.gmra.mxu0 %vm1186_vm1, %v5771_v43 }
 0x89f   : > { %11002 = vmatprep.mubr.msk.f32.mxu0 %vm11765_vm0, %v13830_v54 }
 0x8c6   : > { %v4669_v56 = vpop.xlane.xlu1 %4668 }
 0x8c7   : > { %11434 = vrcp.f32 %v4669_v56 }
 0x8ca   : > { %v5693_v48 = vpop.permute.xlu1 %5692 }
 0x8d4   : > { %v11435_v3 = vpop.eup %11434 }
 0x8d5   : > { %v4685_v0 = vmul.f32 %v11435_v3, %v13032_v28 }
 0x8d7   : > { %10958 = vmatmul.mubr.msk.f32.vlgmr.msra.gmra.mxu1 %vm1876_vm4, %v4685_v0 }
 0x8d8   : > { %10966 = vmatpush3.xpose.msk.msra.mxu1 %vm1186_vm1, %v13023_v35  ;;  %10967 = vmatprep.mubr.msk.f32.mxu1 %vm11765_vm0, %v13830_v54  ;;  %v5851_v35 = vpop.permute.xlu1 %5850 }
 0x8d9   : > { %10975 = vmatprep.subr.mxu1 %v13830_v54 }
 0x8db   : > { %10968 = vmatmul.mubr.msk.f32.vlgmr.msra.gmra.mxu1 %vm1186_vm1, %v13027_v8 }
 0x8dc   : > { %10976 = vmatpush3.xpose.msk.msra.mxu1 %vm1186_vm1, %v13052_v59  ;;  %10977 = vmatprep.mubr.msk.f32.mxu1 %vm11765_vm0, %v13830_v54  ;;  %v5849_v8 = vpop.permute.xlu1 %5848 }
 0x8dd   : > { %10985 = vmatprep.subr.mxu1 %v13830_v54 }
 0x8df   : > { %10978 = vmatmul.mubr.msk.f32.vlgmr.msra.gmra.mxu1 %vm1186_vm1, %v5537_v58 }
 0x8e0   : > { %10986 = vmatpush3.xpose.msk.msra.mxu1 %vm1186_vm1, %v5695_v53  ;;  %10987 = vmatprep.mubr.msk.f32.mxu1 %vm11765_vm0, %v13830_v54 }
 0x8e1   : > { %10995 = vmatprep.subr.mxu1 %v13830_v54 }
 0x8e3   : > { %10988 = vmatmul.mubr.msk.f32.vlgmr.msra.gmra.mxu1 %vm1186_vm1, %v5693_v48 }
 0x8e4   : > { %10996 = vmatpush3.xpose.msk.msra.mxu1 %vm1186_vm1, %v5851_v35  ;;  %10997 = vmatprep.mubr.msk.f32.mxu1 %vm11765_vm0, %v13830_v54 }
 0x8e5   : > { %11005 = vmatprep.subr.mxu1 %v13830_v54 }
 0x8e7   : > { %10998 = vmatmul.mubr.msk.f32.vlgmr.msra.gmra.mxu1 %vm1186_vm1, %v5849_v8 }
 0x8e8   : > { %11007 = vmatprep.mubr.msk.f32.mxu1 %vm11765_vm0, %v13830_v54 }
 0x8fa   : > { %v13134_v13 = vpop.f32.mrf.mxu0 }
 0x8fc   : > { %v10924_v2 = vpop.f32.mrf.mxu0 }
 0x8ff   : > { %v13136_v28 = vpop.f32.mrf.mxu0 }
 0x901   : > { %v10934_v47 = vpop.f32.mrf.mxu0 }
 0x942   : > { %v13138_v22 = vpop.f32.mrf.mxu1 }
 0x944   : > { %v10929_v12 = vpop.f32.mrf.mxu1 }
 0x946   : > { %v13140_v59 = vpop.f32.mrf.mxu1 }
 0x948   : > { %v10939_v61 = vpop.f32.mrf.mxu1 }
 0x94a   : > { %v13142_v16 = vpop.f32.mrf.mxu0 }
 0x94b   : > { %v13144_v17 = vpop.f32.mrf.mxu1 }
 0x94c   : > { %v10944_v52 = vpop.f32.mrf.mxu0 }
 0x94d   : > { %v10949_v36 = vpop.f32.mrf.mxu1 }
 0x94e   : > { %v13146_v25 = vpop.f32.mrf.mxu0 }
 0x950   : > { %v10954_v19 = vpop.f32.mrf.mxu0 }
 0x952   : > { %v5376_v14 = vpop.f32.mrf.mxu0 }
 0x953   : > { %v5926_v55 = vsel %vm1787_vm3, %v5376_v14, -inf }
 0x954   : > { %5927 = vmax.xlane.f32.xlu0 %v5926_v55  ;;  %v10964_v27 = vpop.f32.mrf.mxu0 }
 0x956   : > { %v5532_v15 = vpop.f32.mrf.mxu0 }
 0x957   : > { %v5932_v63 = vsel %vm1787_vm3, %v5532_v15, -inf }
 0x958   : > { %5933 = vmax.xlane.f32.xlu0 %v5932_v63  ;;  %v10974_v50 = vpop.f32.mrf.mxu0 }
 0x95a   : > { %v5688_v60 = vpop.f32.mrf.mxu0 }
 0x95b   : > { %v5938_v35 = vsel %vm1787_vm3, %v5688_v60, -inf }
 0x95c   : > { %v10984_v1 = vpop.f32.mrf.mxu0 }
 0x95e   : > { %v13150_v40 = vpop.f32.mrf.mxu0 }
 0x95f   : > { %v5944_v12 = vsel %vm1787_vm3, %v13150_v40, -inf }
 0x960   : > { %v10994_v5 = vpop.f32.mrf.mxu0 }
 0x997   : > { %v13152_v51 = vpop.f32.mrf.mxu1 }
 0x999   : > { %v10959_v57 = vpop.f32.mrf.mxu1 }
 0x99b   : > { %v5454_v43 = vpop.f32.mrf.mxu1 }
 0x99c   : > { %v5929_v58 = vsel %vm1787_vm3, %v5454_v43, -inf }
 0x99d   : > { %5930 = vmax.xlane.f32.xlu1 %v5929_v58  ;;  %v10969_v53 = vpop.f32.mrf.mxu1 }
 0x99f   : > { %v5610_v56 = vpop.f32.mrf.mxu1 }
 0x9a0   : > { %v5935_v3 = vsel %vm1787_vm3, %v5610_v56, -inf }
 0x9a1   : > { %5936 = vmax.xlane.f32.xlu0 %v5935_v3  ;;  %v10979_v0 = vpop.f32.mrf.mxu1 }
 0x9a3   : > { %v5766_v48 = vpop.f32.mrf.mxu1 }
 0x9a4   : > { %v5941_v8 = vsel %vm1787_vm3, %v5766_v48, -inf }
 0x9a5   : > { %5939 = vmax.xlane.f32.xlu0 %v5938_v35  ;;  %5942 = vmax.xlane.f32.xlu1 %v5941_v8  ;;  %v10989_v2 = vpop.f32.mrf.mxu1 }
 0x9a7   : > { %v5922_v47 = vpop.f32.mrf.mxu1 }
 0x9a8   : > { %v5947_v61 = vsel %vm1787_vm3, %v5922_v47, -inf }
 0x9a9   : > { %5945 = vmax.xlane.f32.xlu0 %v5944_v12  ;;  %5948 = vmax.xlane.f32.xlu1 %v5947_v61  ;;  %v10999_v52 = vpop.f32.mrf.mxu1 }
 0x9ba   : > { %6091 = vrot.lane.b32.xlu1 %v12679_v41, %s11769_s7 }
 0x9be   : > { %6168 = vrot.lane.b32.xlu1 %v12685_v45, %s11769_s7 }
 0x9bf   : > { %6014 = vrot.lane.b32.xlu0 %v12695_v7, %s11769_s7 }
 0x9c2   : > { %6245 = vrot.lane.b32.xlu1 %v12691_v24, %s11769_s7 }
 0x9c3   : > { %6322 = vrot.lane.b32.xlu0 %v12707_v32, %s11769_s7 }
 0x9c6   : > { %6399 = vrot.lane.b32.xlu1 %v12703_v26, %s11769_s7 }
 0x9dd   : > { %v5928_v36 = vpop.xlane.xlu0 %5927 }
 0x9de   : > { %v5950_v19 = vsub.f32 %v5376_v14, %v5928_v36 }
 0x9e0   : > { %v5958_v55 = vmul.f32 1.442695, %v5950_v19 }
 0x9e1   : > { %v5934_v27 = vpop.xlane.xlu0 %5933 }
 0x9e2   : > { %11436 = vpow2.f32 %v5958_v55  ;;  %v5952_v41 = vsub.f32 %v5532_v15, %v5934_v27 }
 0x9e4   : > { %v5962_v63 = vmul.f32 1.442695, %v5952_v41 }
 0x9e6   : > { %11438 = vpow2.f32 %v5962_v63 }
 0x9ef   : > { %v13173_v45 = vpop.eup %11436 }
 0x9f0   : > { %v5974_v7 = vsel %vm1787_vm3, %v13173_v45, 0.0 }
 0x9f1   : > { %5975 = vadd.xlane.f32.xlu0 %v5974_v7 }
 0x9f3   : > { %v13177_v24 = vpop.eup %11438 }
 0x9f4   : > { %v5980_v32 = vsel %vm1787_vm3, %v13177_v24, 0.0 }
 0x9f5   : > { %5981 = vadd.xlane.f32.xlu0 %v5980_v32 }
 0xa26   : > { %v5931_v26 = vpop.xlane.xlu1 %5930 }
 0xa27   : > { %v5951_v14 = vsub.f32 %v5454_v43, %v5931_v26 }
 0xa29   : > { %v5960_v50 = vmul.f32 1.442695, %v5951_v14 }
 0xa2a   : > { %v5937_v1 = vpop.xlane.xlu0 %5936 }
 0xa2b   : > { %11440 = vpow2.f32 %v5960_v50  ;;  %v5953_v15 = vsub.f32 %v5610_v56, %v5937_v1 }
 0xa2d   : > { %v5964_v5 = vmul.f32 1.442695, %v5953_v15 }
 0xa2e   : > { %v5940_v57 = vpop.xlane.xlu0 %5939  ;;  %v5943_v58 = vpop.xlane.xlu1 %5942 }
 0xa2f   : > { %11442 = vpow2.f32 %v5964_v5  ;;  %v5954_v53 = vsub.f32 %v5688_v60, %v5940_v57  ;;  %v5955_v3 = vsub.f32 %v5766_v48, %v5943_v58 }
 0xa31   : > { %v5966_v0 = vmul.f32 1.442695, %v5954_v53  ;;  %v5968_v35 = vmul.f32 1.442695, %v5955_v3 }
 0xa32   : > { %v5946_v8 = vpop.xlane.xlu0 %5945  ;;  %v5949_v2 = vpop.xlane.xlu1 %5948 }
 0xa33   : > { %11444 = vpow2.f32 %v5966_v0  ;;  %v5956_v12 = vsub.f32 %v13150_v40, %v5946_v8  ;;  %v5957_v61 = vsub.f32 %v5922_v47, %v5949_v2  ;;  %v11204_v8 = vld [vmem:[%s12140_s24 + $0x38] sm:$0xff]   ;;  %v11205_v2 = vld [vmem:[%s12140_s24 + $0x30] sm:$0xff]  }
 0xa34   : > { %11446 = vpow2.f32 %v5968_v35  ;;  %v13831_v35 = vmov 0  }
 0xa35   : > { %v5970_v43 = vmul.f32 1.442695, %v5956_v12  ;;  %v5972_v52 = vmul.f32 1.442695, %v5957_v61  ;;  %v11206_v12 = vld [vmem:[%s12140_s24 + $0x28] sm:$0xff]  }
 0xa36   : > { %v6015_v36 = vpop.permute.xlu0 %6014  ;;  %v6092_v19 = vpop.permute.xlu1 %6091 }
 0xa37   : > { %11448 = vpow2.f32 %v5970_v43  ;;  %11001 = vmatpush3.msk.msra.mxu0 %vm1880_vm2, %v6015_v36  ;;  %11006 = vmatpush3.msk.msra.mxu1 %vm1880_vm2, %v6092_v19  ;;  %v11207_v19 = vld [vmem:[%s12140_s24 + $0x20] sm:$0xff]  }
 0xa38   : > { %v13184_v60 = vpop.eup %11440  ;;  %11450 = vpow2.f32 %v5972_v52  ;;  %11010 = vmatprep.subr.mxu0 %v13830_v54  ;;  %11015 = vmatprep.subr.mxu1 %v13830_v54 }
 0xa39   : > { %v5977_v40 = vsel %vm1787_vm3, %v13184_v60, 0.0 }
 0xa3a   : > { %5978 = vadd.xlane.f32.xlu1 %v5977_v40  ;;  %v11209_v40 = vld [vmem:[%s12140_s24 + $0x10] sm:$0xff]  }
 0xa3c   : > { %v13190_v56 = vpop.eup %11442 }
 0xa3d   : > { %v5983_v48 = vsel %vm1787_vm3, %v13190_v56, 0.0 }
 0xa3e   : > { %5984 = vadd.xlane.f32.xlu1 %v5983_v48 }
 0xa40   : > { %v13194_v47 = vpop.eup %11444 }
 0xa41   : > { %v13196_v55 = vpop.eup %11446  ;;  %v5986_v27 = vsel %vm1787_vm3, %v13194_v47, 0.0 }
 0xa42   : > { %5987 = vadd.xlane.f32.xlu0 %v5986_v27  ;;  %v5989_v41 = vsel %vm1787_vm3, %v13196_v55, 0.0 }
 0xa43   : > { %5990 = vadd.xlane.f32.xlu1 %v5989_v41  ;;  %v11211_v41 = vld [vmem:[%s12140_s24] sm:$0xff]  }
 0xa44   : > { %v13202_v63 = vpop.eup %11448 }
 0xa45   : > { %v13204_v7 = vpop.eup %11450  ;;  %v5992_v32 = vsel %vm1787_vm3, %v13202_v63, 0.0 }
 0xa46   : > { %5993 = vadd.xlane.f32.xlu0 %v5992_v32  ;;  %v5995_v26 = vsel %vm1787_vm3, %v13204_v7, 0.0 }
 0xa47   : > { %5996 = vadd.xlane.f32.xlu1 %v5995_v26 }
 0xa58   : > { %6553 = vrot.lane.b32.xlu1 %v12715_v23, %s11769_s7  ;;  %v6323_v23 = vpop.permute.xlu0 %6322 }
 0xa5c   : > { %6640 = vrot.lane.b32.xlu1 %v12910_v49, %s11769_s7  ;;  %6476 = vrot.lane.b32.xlu0 %v12719_v29, %s11769_s7 }
 0xa60   : > { %6644 = vrot.lane.b32.xlu1 %v12912_v10, %s11769_s7  ;;  %6638 = vrot.lane.b32.xlu0 %v12906_v4, %s11769_s7  ;;  %v6169_v10 = vpop.permute.xlu1 %6168 }
 0xa64   : > { %6648 = vrot.lane.b32.xlu1 %v12916_v11, %s11769_s7  ;;  %6642 = vrot.lane.b32.xlu0 %v12908_v62, %s11769_s7 }
 0xa68   : > { %6652 = vrot.lane.b32.xlu1 %v12926_v21, %s11769_s7  ;;  %6646 = vrot.lane.b32.xlu0 %v12914_v37, %s11769_s7 }
 0xa6c   : > { %6672 = vrot.lane.b32.xlu1 %v13138_v22, %s11768_s2  ;;  %6650 = vrot.lane.b32.xlu0 %v12918_v6, %s11769_s7  ;;  %v6246_v6 = vpop.permute.xlu1 %6245 }
 0xa70   : > { %6676 = vrot.lane.b32.xlu1 %v13140_v59, %s11768_s2  ;;  %6670 = vrot.lane.b32.xlu0 %v13134_v13, %s11768_s2  ;;  %v6400_v21 = vpop.permute.xlu1 %6399 }
 0xa74   : > { %6680 = vrot.lane.b32.xlu1 %v13144_v17, %s11768_s2  ;;  %6674 = vrot.lane.b32.xlu0 %v13136_v28, %s11768_s2 }
 0xa78   : > { %6684 = vrot.lane.b32.xlu1 %v13152_v51, %s11768_s2  ;;  %6678 = vrot.lane.b32.xlu0 %v13142_v16, %s11768_s2 }
 0xa7a   : > { %v5976_v29 = vpop.xlane.xlu0 %5975 }
 0xa7b   : > { %11452 = vrcp.f32 %v5976_v29 }
 0xa7c   : > { %6682 = vrot.lane.b32.xlu0 %v13146_v25, %s11768_s2 }
 0xa7e   : > { %v5982_v4 = vpop.xlane.xlu0 %5981 }
 0xa7f   : > { %11454 = vrcp.f32 %v5982_v4 }
 0xa88   : > { %v11453_v62 = vpop.eup %11452 }
 0xa89   : > { %v6006_v49 = vmul.f32 %v11453_v62, %v13173_v45 }
 0xa8b   : > { %11003 = vmatmul.mubr.msk.f32.vlgmr.msra.gmra.mxu0 %vm1876_vm4, %v6006_v49 }
 0xa8c   : > { %v11455_v37 = vpop.eup %11454  ;;  %11011 = vmatpush3.msk.msra.mxu0 %vm1880_vm2, %v6169_v10  ;;  %11012 = vmatprep.mubr.msk.f32.mxu0 %vm11765_vm0, %v13830_v54 }
 0xa8d   : > { %11020 = vmatprep.subr.mxu0 %v13830_v54  ;;  %v6008_v11 = vmul.f32 %v11455_v37, %v13177_v24 }
 0xa8f   : > { %11013 = vmatmul.mubr.msk.f32.vlgmr.msra.gmra.mxu0 %vm1876_vm4, %v6008_v11 }
 0xa90   : > { %11021 = vmatpush3.msk.msra.mxu0 %vm1880_vm2, %v6323_v23  ;;  %11022 = vmatprep.mubr.msk.f32.mxu0 %vm11765_vm0, %v13830_v54 }
 0xa91   : > { %11030 = vmatprep.subr.mxu0 %v13830_v54 }
 0xac3   : > { %v5979_v13 = vpop.xlane.xlu1 %5978 }
 0xac4   : > { %11456 = vrcp.f32 %v5979_v13 }
 0xac7   : > { %v5985_v28 = vpop.xlane.xlu1 %5984 }
 0xac8   : > { %11458 = vrcp.f32 %v5985_v28 }
 0xacb   : > { %v5988_v22 = vpop.xlane.xlu0 %5987 }
 0xacc   : > { %11460 = vrcp.f32 %v5988_v22  ;;  %v5991_v59 = vpop.xlane.xlu1 %5990 }
 0xacd   : > { %11462 = vrcp.f32 %v5991_v59 }
 0xacf   : > { %v5994_v16 = vpop.xlane.xlu0 %5993 }
 0xad0   : > { %11464 = vrcp.f32 %v5994_v16  ;;  %v5997_v17 = vpop.xlane.xlu1 %5996 }
 0xad1   : > { %v11457_v25 = vpop.eup %11456  ;;  %11466 = vrcp.f32 %v5997_v17 }
 0xad2   : > { %v6007_v51 = vmul.f32 %v11457_v25, %v13184_v60  ;;  %v11208_v60 = vld [vmem:[%s12140_s24 + $0x18] sm:$0xff]  }
 0xad3   : > { %v6477_v5 = vpop.permute.xlu0 %6476 }
 0xad4   : > { %11008 = vmatmul.mubr.msk.f32.vlgmr.msra.gmra.mxu1 %vm1876_vm4, %v6007_v51  ;;  %v6554_v58 = vpop.permute.xlu1 %6553 }
 0xad5   : > { %v11459_v45 = vpop.eup %11458  ;;  %11016 = vmatpush3.msk.msra.mxu1 %vm1880_vm2, %v6246_v6  ;;  %11017 = vmatprep.mubr.msk.f32.mxu1 %vm11765_vm0, %v13830_v54 }
 0xad6   : > { %11025 = vmatprep.subr.mxu1 %v13830_v54  ;;  %v6009_v24 = vmul.f32 %v11459_v45, %v13190_v56 }
 0xad7   : > { %v6639_v49 = vpop.permute.xlu0 %6638 }
 0xad8   : > { %11018 = vmatmul.mubr.msk.f32.vlgmr.msra.gmra.mxu1 %vm1876_vm4, %v6009_v24 }
 0xad9   : > { %v11461_v14 = vpop.eup %11460  ;;  %11026 = vmatpush3.msk.msra.mxu1 %vm1880_vm2, %v6400_v21  ;;  %11027 = vmatprep.mubr.msk.f32.mxu1 %vm11765_vm0, %v13830_v54 }
 0xada   : > { %v11463_v50 = vpop.eup %11462  ;;  %11035 = vmatprep.subr.mxu1 %v13830_v54  ;;  %v6010_v1 = vmul.f32 %v11461_v14, %v13194_v47  ;;  %v11210_v47 = vld [vmem:[%s12140_s24 + $0x8] sm:$0xff]   ;;  %s13832_s24 = scalar_lea.vmem %s13755_s4, %s12156_s13 }
 0xadb   : > { %v6011_v15 = vmul.f32 %v11463_v50, %v13196_v55  ;;  %v6643_v10 = vpop.permute.xlu0 %6642 }
 0xadc   : > { %11023 = vmatmul.mubr.msk.f32.vlgmr.msra.gmra.mxu0 %vm1876_vm4, %v6010_v1 }
 0xadd   : > { %v11465_v57 = vpop.eup %11464  ;;  %11028 = vmatmul.mubr.msk.f32.vlgmr.msra.gmra.mxu1 %vm1876_vm4, %v6011_v15  ;;  %11031 = vmatpush3.msk.msra.mxu0 %vm1880_vm2, %v6477_v5  ;;  %v6726_v5 = vsel %vm1186_vm1, %v12646_v18, %v6639_v49  ;;  %v10096_v49 = vld [vmem:[%s13832_s24] ss:$0 sm:$0xff] }
 0xade   : > { %v11467_v53 = vpop.eup %11466  ;;  %11036 = vmatpush3.msk.msra.mxu1 %vm1880_vm2, %v6554_v58  ;;  %11032 = vmatprep.mubr.msk.f32.mxu0 %vm11765_vm0, %v13830_v54  ;;  %v6012_v3 = vmul.f32 %v11465_v57, %v13202_v63 }
 0xadf   : > { %11037 = vmatprep.mubr.msk.f32.mxu1 %vm11765_vm0, %v13830_v54  ;;  %v6013_v0 = vmul.f32 %v11467_v53, %v13204_v7  ;;  %11040 = vmatprep.subr.bf16.mxu0 %v13830_v54  ;;  %v6647_v11 = vpop.permute.xlu0 %6646  ;;  %v6728_v53 = vsel %vm1186_vm1, %v12650_v30, %v6643_v10 }
 0xae0   : > { %11033 = vmatmul.mubr.msk.f32.vlgmr.msra.gmra.mxu0 %vm1876_vm4, %v6012_v3  ;;  %v6730_v3 = vsel %vm1186_vm1, %v12654_v39, %v6647_v11  ;;  %v11476_v11 = vld [vmem:[#allocation2] sm:$0xff] }
 0xae1   : > { %11038 = vmatmul.mubr.msk.f32.vlgmr.msra.gmra.mxu1 %vm1876_vm4, %v6013_v0  ;;  %11056 = vmatprep.mubr.msk.bf16.mxu0 %vm11765_vm0, %v13830_v54 }
 0xae2   : > { %7837 = vmatprep.mubr.bf16.mxu1 %v13831_v35  ;;  %11041 = vmatpush3.bf16.msra.mxu0 %v11204_v8 }
 0xae3   : > { %11042 = vmatprep.subr.bf16.mxu0 %v13830_v54  ;;  %v6651_v21 = vpop.permute.xlu0 %6650 }
 0xae6   : > { %11043 = vmatpush3.bf16.msra.mxu0 %v11205_v2 }
 0xae7   : > { %11044 = vmatprep.subr.bf16.mxu0 %v13830_v54  ;;  %v6671_v28 = vpop.permute.xlu0 %6670 }
 0xaea   : > { %11045 = vmatpush3.bf16.msra.mxu0 %v11206_v12 }
 0xaeb   : > { %11046 = vmatprep.subr.bf16.mxu0 %v13830_v54  ;;  %v6675_v59 = vpop.permute.xlu0 %6674 }
 0xaec   : > { %v6737_v2 = vsel %vm6734_vm5, %v6728_v53, %v6675_v59  ;;  %v7065_v59 = vld [vmem:[%s12146_s8 + $0x380] sm:$0xff] }
 0xaee   : > { %11047 = vmatpush3.bf16.msra.mxu0 %v11207_v19 }
 0xaef   : > { %11048 = vmatprep.subr.bf16.mxu0 %v13830_v54  ;;  %v6679_v17 = vpop.permute.xlu0 %6678 }
 0xaf2   : > { %11049 = vmatpush3.bf16.msra.mxu0 %v11208_v60 }
 0xaf3   : > { %11050 = vmatprep.subr.bf16.mxu0 %v13830_v54  ;;  %v6683_v51 = vpop.permute.xlu0 %6682 }
 0xaf6   : > { %11051 = vmatpush3.bf16.msra.mxu0 %v11209_v40 }
 0xaf7   : > { %11052 = vmatprep.subr.bf16.mxu0 %v13830_v54 }
 0xafa   : > { %11053 = vmatpush3.bf16.msra.mxu0 %v11210_v47 }
 0xafb   : > { %11054 = vmatprep.subr.bf16.mxu0 %v13830_v54  ;;  %v6641_v54 = vpop.permute.xlu1 %6640 }
 0xafc   : > { %v6727_v57 = vsel %vm1186_vm1, %v12648_v31, %v6641_v54  ;;  %v6739_v31 = vsel %vm6734_vm5, %v6730_v3, %v6679_v17  ;;  %v7066_v17 = vld [vmem:[%s12146_s8 + $0x388] sm:$0xff] }
 0xafe   : > { %11055 = vmatpush3.bf16.msra.mxu0 %v11211_v41 }
 0xaff   : > { %v6645_v37 = vpop.permute.xlu1 %6644 }
 0xb00   : > { %v6729_v15 = vsel %vm1186_vm1, %v12652_v20, %v6645_v37 }
 0xb03   : > { %v6649_v6 = vpop.permute.xlu1 %6648 }
 0xb04   : > { %v6731_v0 = vsel %vm1186_vm1, %v12656_v42, %v6649_v6 }
 0xb07   : > { %v6653_v13 = vpop.permute.xlu1 %6652 }
 0xb08   : > { %v6733_v60 = vsel %vm1186_vm1, %v12666_v9, %v6653_v13 }
 0xb0b   : > { %v6673_v22 = vpop.permute.xlu1 %6672 }
 0xb0c   : > { %v6736_v18 = vsel %vm6734_vm5, %v6727_v57, %v6673_v22 }
 0xb0f   : > { %v6677_v16 = vpop.permute.xlu1 %6676 }
 0xb10   : > { %v6738_v58 = vsel %vm6734_vm5, %v6729_v15, %v6677_v16  ;;  %v7073_v16 = vld [vmem:[%s12146_s8 + $0x3c0] sm:$0xff] }
 0xb13   : > { %v6681_v25 = vpop.permute.xlu1 %6680 }
 0xb14   : > { %v6740_v12 = vsel %vm6734_vm5, %v6731_v0, %v6681_v25  ;;  %v10219_v25 = vcombine.low %v7065_v59, %v7073_v16  ;;  %v7049_v0 = vld [vmem:[%s12146_s8 + $0x300] sm:$0xff] }
 0xb17   : > { %v6685_v45 = vpop.permute.xlu1 %6684 }
 0xb18   : > { %v6742_v47 = vsel %vm6734_vm5, %v6733_v60, %v6685_v45  ;;  %v7074_v45 = vld [vmem:[%s12146_s8 + $0x3c8] sm:$0xff] }
 0xb4b   : > { %v6087_v61 = vpop.f32.mrf.mxu0 }
 0xb4c   : > { %6702 = vrot.lane.b32.xlu0 %v6087_v61, %s11767_s0 }
 0xb4d   : > { %v11004_v43 = vpop.f32.mrf.mxu0 }
 0xb4f   : > { %v6241_v52 = vpop.f32.mrf.mxu0 }
 0xb50   : > { %6706 = vrot.lane.b32.xlu0 %v6241_v52, %s11767_s0  ;;  %v6732_v52 = vsel %vm1186_vm1, %v12658_v46, %v6651_v21 }
 0xb51   : > { %v11014_v36 = vpop.f32.mrf.mxu0  ;;  %v6741_v40 = vsel %vm6734_vm5, %v6732_v52, %v6683_v51  ;;  %v10220_v51 = vcombine.high %v7065_v59, %v7073_v16  ;;  %v7042_v52 = vld [vmem:[%s12146_s8 + $0x2c8] sm:$0xff] }
 0xb52   : > { %v6735_v36 = vsel %vm6734_vm5, %v6726_v5, %v6671_v28  ;;  %v11477_v28 = vld [vmem:[#allocation2 + $0x8] sm:$0xff] }
 0xb53   : > { %7805 = vmatprep.subr.bf16.mxu1 %v10220_v51  ;;  %v6978_v59 = vld [vmem:[%s12146_s8 + $0xc8] sm:$0xff]  ;;  %v6953_v51 = vld [vmem:[%s12146_s8] sm:$0xff] }
 0xb54   : > { %7806 = vmatpush1.bf16.msra.mxu1 %v10219_v25 }
 0xb94   : > { %v6164_v56 = vpop.f32.mrf.mxu1 }
 0xb95   : > { %6704 = vrot.lane.b32.xlu1 %v6164_v56, %s11767_s0 }
 0xb96   : > { %v11009_v48 = vpop.f32.mrf.mxu1 }
 0xb98   : > { %v6318_v55 = vpop.f32.mrf.mxu1 }
 0xb99   : > { %6708 = vrot.lane.b32.xlu1 %v6318_v55, %s11767_s0 }
 0xb9a   : > { %v11019_v27 = vpop.f32.mrf.mxu1 }
 0xb9c   : > { %v6395_v63 = vpop.f32.mrf.mxu0 }
 0xb9d   : > { %v6472_v7 = vpop.f32.mrf.mxu1  ;;  %6710 = vrot.lane.b32.xlu0 %v6395_v63, %s11767_s0 }
 0xb9e   : > { %6712 = vrot.lane.b32.xlu1 %v6472_v7, %s11767_s0  ;;  %v11024_v32 = vpop.f32.mrf.mxu0 }
 0xb9f   : > { %v11029_v26 = vpop.f32.mrf.mxu1 }
 0xba0   : > { %v6549_v23 = vpop.f32.mrf.mxu0 }
 0xba1   : > { %v6626_v29 = vpop.f32.mrf.mxu1  ;;  %6714 = vrot.lane.b32.xlu0 %v6549_v23, %s11767_s0 }
 0xba2   : > { %6716 = vrot.lane.b32.xlu1 %v6626_v29, %s11767_s0  ;;  %v11034_v4 = vpop.f32.mrf.mxu0 }
 0xba3   : > { %v11039_v62 = vpop.f32.mrf.mxu1 }
 0xbbe   : > { %v6703_v24 = vpop.permute.xlu0 %6702 }
 0xbbf   : > { %v6744_v56 = vsel %vm6743_vm6, %v6735_v36, %v6703_v24  ;;  %v10221_v24 = vcombine.low %v7066_v17, %v7074_v45 }
 0xbc2   : > { %v6707_v50 = vpop.permute.xlu0 %6706 }
 0xbc3   : > { %v6746_v30 = vsel %vm6743_vm6, %v6737_v2, %v6707_v50  ;;  %v7058_v2 = vld [vmem:[%s12146_s8 + $0x348] sm:$0xff] }
 0xc07   : > { %v6705_v14 = vpop.permute.xlu1 %6704 }
 0xc08   : > { %v6745_v43 = vsel %vm6743_vm6, %v6736_v18, %v6705_v14  ;;  %v10222_v14 = vcombine.high %v7066_v17, %v7074_v45  ;;  %v6961_v45 = vld [vmem:[%s12146_s8 + $0x40] sm:$0xff] }
 0xc09   : > { %v6760_v55 = vcombine.low %v6744_v56, %v6745_v43  ;;  %v7041_v43 = vld [vmem:[%s12146_s8 + $0x2c0] sm:$0xff] }
 0xc0a   : > { %7848 = vmatprep.subr.bf16.mxu0 %v10222_v14  ;;  %v7025_v56 = vld [vmem:[%s12146_s8 + $0x240] sm:$0xff]  ;;  %v10108_v14 = vcombine.high %v6953_v51, %v6961_v45 }
 0xc0b   : > { %v6709_v1 = vpop.permute.xlu1 %6708  ;;  %v6768_v9 = vrot.slane %v6760_v55, %v12243_v44  ;;  %v7026_v55 = vld [vmem:[%s12146_s8 + $0x248] sm:$0xff] }
 0xc0c   : > { %v6747_v20 = vsel %vm6743_vm6, %v6738_v58, %v6709_v1 }
 0xc0d   : > { %v6761_v19 = vcombine.low %v6746_v30, %v6747_v20  ;;  %v7057_v20 = vld [vmem:[%s12146_s8 + $0x340] sm:$0xff] }
 0xc0e   : > { %v10204_v18 = vcombine.high %v7049_v0, %v7057_v20  ;;  %v7033_v30 = vld [vmem:[%s12146_s8 + $0x280] sm:$0xff] }
 0xc0f   : > { %v6711_v8 = vpop.permute.xlu0 %6710  ;;  %v6775_v7 = vrot.slane %v6761_v19, %v12243_v44  ;;  %v10187_v36 = vcombine.low %v7033_v30, %v7041_v43 }
 0xc10   : > { %v6713_v61 = vpop.permute.xlu1 %6712  ;;  %v6748_v39 = vsel %vm6743_vm6, %v6739_v31, %v6711_v8  ;;  %v7050_v8 = vld [vmem:[%s12146_s8 + $0x308] sm:$0xff]  ;;  %v10203_v31 = vcombine.low %v7049_v0, %v7057_v20  ;;  %7807 = vmatprep.subr.bf16.mxu1 %v10204_v18  ;;  %v7068_v0 = vld [vmem:[%s12146_s8 + $0x398] sm:$0xff] }
 0xc11   : > { %v6749_v42 = vsel %vm6743_vm6, %v6740_v12, %v6713_v61  ;;  %v6776_v29 = vcombine.low %v6768_v9, %v6775_v7  ;;  %v10205_v12 = vcombine.low %v7050_v8, %v7058_v2  ;;  %v10206_v61 = vcombine.high %v7050_v8, %v7058_v2  ;;  %v7009_v7 = vld [vmem:[%s12146_s8 + $0x1c0] sm:$0xff]  ;;  %v7076_v18 = vld [vmem:[%s12146_s8 + $0x3d8] sm:$0xff] }
 0xc12   : > { %v6777_v27 = vcombine.low %v6748_v39, %v6749_v42  ;;  %7808 = vmatpush1.bf16.msra.mxu1 %v10203_v31  ;;  %v7034_v39 = vld [vmem:[%s12146_s8 + $0x288] sm:$0xff]  ;;  %v10188_v42 = vcombine.high %v7033_v30, %v7041_v43  ;;  %v10225_v2 = vcombine.low %v7068_v0, %v7076_v18  ;;  %v10226_v31 = vcombine.high %v7068_v0, %v7076_v18  ;;  %v6972_v18 = vld [vmem:[%s12146_s8 + $0x98] sm:$0xff] }
 0xc13   : > { %v6715_v48 = vpop.permute.xlu0 %6714  ;;  %v10189_v19 = vcombine.low %v7034_v39, %v7042_v52  ;;  %v10190_v60 = vcombine.high %v7034_v39, %v7042_v52 }
 0xc14   : > { %v6750_v41 = vsel %vm6743_vm6, %v6741_v40, %v6715_v48  ;;  %v6717_v63 = vpop.permute.xlu1 %6716  ;;  %v6785_v26 = vrot.slane %v6777_v27, %v12243_v44  ;;  %7809 = vmatprep.subr.bf16.mxu1 %v10188_v42  ;;  %v7017_v40 = vld [vmem:[%s12146_s8 + $0x200] sm:$0xff]  ;;  %v7018_v48 = vld [vmem:[%s12146_s8 + $0x208] sm:$0xff] }
 0xc15   : > { %v6751_v46 = vsel %vm6743_vm6, %v6742_v47, %v6717_v63  ;;  %v10172_v47 = vcombine.high %v7017_v40, %v7025_v56  ;;  %v10171_v27 = vcombine.low %v7017_v40, %v7025_v56  ;;  %v10174_v63 = vcombine.high %v7018_v48, %v7026_v55 }
 0xc16   : > { %v6778_v32 = vcombine.low %v6750_v41, %v6751_v46  ;;  %7810 = vmatpush1.bf16.msra.mxu1 %v10187_v36  ;;  %v10173_v41 = vcombine.low %v7018_v48, %v7026_v55  ;;  %v7001_v46 = vld [vmem:[%s12146_s8 + $0x180] sm:$0xff]  ;;  %v10106_v48 = vld [vmem:[%s779_s19] ss:$0 sm:$0xff]  ;;  %v7059_v55 = vld [vmem:[%s12146_s8 + $0x350] sm:$0xff] }
 0xc17   : > { %7811 = vmatprep.subr.bf16.mxu1 %v10172_v47  ;;  %v10156_v9 = vcombine.high %v7001_v46, %v7009_v7 }
 0xc18   : > { %v6792_v23 = vrot.slane %v6778_v32, %v12243_v44  ;;  %v7002_v32 = vld [vmem:[%s12146_s8 + $0x188] sm:$0xff] }
 0xc1a   : > { %v6793_v4 = vcombine.low %v6785_v26, %v6792_v23  ;;  %7812 = vmatpush1.bf16.msra.mxu1 %v10171_v27  ;;  %v7010_v26 = vld [vmem:[%s12146_s8 + $0x1c8] sm:$0xff]  ;;  %v10155_v23 = vcombine.low %v7001_v46, %v7009_v7  ;;  %v7052_v27 = vld [vmem:[%s12146_s8 + $0x318] sm:$0xff] }
 0xc1b   : > { %7813 = vmatprep.subr.bf16.mxu1 %v10156_v9  ;;  %v7035_v9 = vld [vmem:[%s12146_s8 + $0x290] sm:$0xff] }
 0xc1c   : > { %v6796_v62 = vpack.c.bf16 %v6793_v4, %v6776_v29  ;;  %v10157_v29 = vcombine.low %v7002_v32, %v7010_v26  ;;  %v10158_v4 = vcombine.high %v7002_v32, %v7010_v26  ;;  %v7043_v26 = vld [vmem:[%s12146_s8 + $0x2d0] sm:$0xff] }
 0xc1e   : > { %11057 = vmatmul.mubr.bf16.vlgmr.msra.gmra.mxu0 %v6796_v62  ;;  %7814 = vmatpush1.bf16.msra.mxu1 %v10155_v23  ;;  %v6985_v62 = vld [vmem:[%s12146_s8 + $0x100] sm:$0xff]  ;;  %v7036_v23 = vld [vmem:[%s12146_s8 + $0x298] sm:$0xff] }
 0xc1f   : > { %7880 = vmatprep.mubr.bf16.mxu0 %v13831_v35  ;;  %7849 = vmatpush1.bf16.msra.mxu0 %v10221_v24  ;;  %v6954_v24 = vld [vmem:[%s12146_s8 + $0x8] sm:$0xff] }
 0xc20   : > { %7850 = vmatprep.subr.bf16.mxu0 %v10206_v61 }
 0xc23   : > { %7851 = vmatpush1.bf16.msra.mxu0 %v10205_v12 }
 0xc24   : > { %7852 = vmatprep.subr.bf16.mxu0 %v10190_v60 }
 0xc27   : > { %7853 = vmatpush1.bf16.msra.mxu0 %v10189_v19  ;;  %v10105_v19 = vld [vmem:[%s776_s26] ss:$0 sm:$0xff] }
 0xc28   : > { %7854 = vmatprep.subr.bf16.mxu0 %v10174_v63 }
 0xc2b   : > { %7855 = vmatpush1.bf16.msra.mxu0 %v10173_v41  ;;  %v7060_v41 = vld [vmem:[%s12146_s8 + $0x358] sm:$0xff] }
 0xc2c   : > { %7856 = vmatprep.subr.bf16.mxu0 %v10158_v4 }
 0xc2f   : > { %7857 = vmatpush1.bf16.msra.mxu0 %v10157_v29  ;;  %v7044_v29 = vld [vmem:[%s12146_s8 + $0x2d8] sm:$0xff] }
 0xcde   : > { %v6902_v54 = vpop.f32.mrf.mxu0 }
 0xcdf   : > { %v6903_v10 = vadd.f32 %v10096_v49, %v6902_v54  ;;  %v6986_v54 = vld [vmem:[%s12146_s8 + $0x108] sm:$0xff] }
 0xce0   : > { %v11058_v37 = vpop.f32.mrf.mxu0 }
 0xce1   : > { %v6909_v44 = vadd.f32 %v11476_v11, %v6903_v10  ;;  %v6994_v37 = vld [vmem:[%s12146_s8 + $0x148] sm:$0xff] }
 0xce2   : > { %v6905_v6 = vpop.f32.mrf.mxu0 }
 0xce3   : > { %v6906_v21 = vadd.f32 %v10096_v49, %v6905_v6  ;;  %6911 = vadd.xlane.f32.xlu0 %v6909_v44  ;;  %v6993_v49 = vld [vmem:[%s12146_s8 + $0x140] sm:$0xff]  ;;  %v10142_v6 = vcombine.high %v6986_v54, %v6994_v37 }
 0xce4   : > { %v11059_v13 = vpop.f32.mrf.mxu0  ;;  %v10140_v10 = vcombine.high %v6985_v62, %v6993_v49  ;;  %v10139_v11 = vcombine.low %v6985_v62, %v6993_v49  ;;  %v10209_v62 = vcombine.low %v7052_v27, %v7060_v41  ;;  %v10192_v49 = vcombine.high %v7035_v9, %v7043_v26 }
 0xce5   : > { %v6910_v22 = vadd.f32 %v11477_v28, %v6906_v21  ;;  %7858 = vmatprep.subr.bf16.mxu0 %v10142_v6  ;;  %v6969_v21 = vld [vmem:[%s12146_s8 + $0x80] sm:$0xff]  ;;  %v6970_v28 = vld [vmem:[%s12146_s8 + $0x88] sm:$0xff]  ;;  %v10191_v6 = vcombine.low %v7035_v9, %v7043_v26 }
 0xce6   : > { %7815 = vmatprep.subr.bf16.mxu1 %v10140_v10  ;;  %v6977_v13 = vld [vmem:[%s12146_s8 + $0xc0] sm:$0xff]  ;;  %v10125_v17 = vcombine.low %v6970_v28, %v6978_v59  ;;  %v10126_v25 = vcombine.high %v6970_v28, %v6978_v59  ;;  %v7019_v10 = vld [vmem:[%s12146_s8 + $0x210] sm:$0xff]  ;;  %v7054_v26 = vld [vmem:[%s12146_s8 + $0x328] sm:$0xff] }
 0xce7   : > { %6913 = vadd.xlane.f32.xlu1 %v6910_v22  ;;  %7816 = vmatpush1.bf16.msra.mxu1 %v10139_v11  ;;  %v10123_v16 = vcombine.low %v6969_v21, %v6977_v13  ;;  %v7020_v11 = vld [vmem:[%s12146_s8 + $0x218] sm:$0xff]  ;;  %v7011_v59 = vld [vmem:[%s12146_s8 + $0x1d0] sm:$0xff]  ;;  %v7061_v9 = vld [vmem:[%s12146_s8 + $0x360] sm:$0xff] }
 0xd6c   : > { %v6912_v50 = vpop.xlane.xlu0 %6911 }
 0xd6d   : > { %v6916_v1 = vmul.f32 0.0078125, %v6912_v50  ;;  %v6962_v50 = vld [vmem:[%s12146_s8 + $0x48] sm:$0xff] }
 0xd6f   : > { %v13357_v15 = vsub.f32 %v6909_v44, %v6916_v1  ;;  %v10141_v44 = vcombine.low %v6986_v54, %v6994_v37  ;;  %v10107_v1 = vcombine.low %v6953_v51, %v6961_v45  ;;  %v10194_v54 = vcombine.high %v7036_v23, %v7044_v29  ;;  %v7027_v37 = vld [vmem:[%s12146_s8 + $0x250] sm:$0xff] }
 0xd70   : > { %v6914_v5 = vpop.xlane.xlu1 %6913 }
 0xd71   : > { %v6917_v57 = vmul.f32 0.0078125, %v6914_v5  ;;  %v6920_v58 = vmul.f32 %v13357_v15, %v13357_v15  ;;  %7859 = vmatpush1.bf16.msra.mxu0 %v10141_v44  ;;  %v10109_v5 = vcombine.low %v6954_v24, %v6962_v50  ;;  %v7028_v44 = vld [vmem:[%s12146_s8 + $0x258] sm:$0xff] }
 0xd72   : > { %7860 = vmatprep.subr.bf16.mxu0 %v10126_v25  ;;  %v10178_v28 = vcombine.high %v7020_v11, %v7028_v44  ;;  %v10175_v25 = vcombine.low %v7019_v10, %v7027_v37  ;;  %v10177_v51 = vcombine.low %v7020_v11, %v7028_v44  ;;  %v7046_v11 = vld [vmem:[%s12146_s8 + $0x2e8] sm:$0xff] }
 0xd73   : > { %v13361_v53 = vsub.f32 %v6910_v22, %v6917_v57  ;;  %6922 = vadd.xlane.f32.xlu0 %v6920_v58  ;;  %v10124_v22 = vcombine.high %v6969_v21, %v6977_v13  ;;  %v10110_v57 = vcombine.high %v6954_v24, %v6962_v50  ;;  %v7067_v58 = vld [vmem:[%s12146_s8 + $0x390] sm:$0xff]  ;;  %v10193_v21 = vcombine.low %v7036_v23, %v7044_v29  ;;  %v7062_v23 = vld [vmem:[%s12146_s8 + $0x368] sm:$0xff] }
 0xd74   : > { %v10176_v13 = vcombine.high %v7019_v10, %v7027_v37  ;;  %v6995_v50 = vld [vmem:[%s12146_s8 + $0x150] sm:$0xff]  ;;  %v7045_v10 = vld [vmem:[%s12146_s8 + $0x2e0] sm:$0xff]  ;;  %v7038_v37 = vld [vmem:[%s12146_s8 + $0x2a8] sm:$0xff] }
 0xd75   : > { %v6921_v3 = vmul.f32 %v13361_v53, %v13361_v53  ;;  %7817 = vmatprep.subr.bf16.mxu1 %v10124_v22  ;;  %7861 = vmatpush1.bf16.msra.mxu0 %v10125_v17  ;;  %v7003_v22 = vld [vmem:[%s12146_s8 + $0x190] sm:$0xff]  ;;  %v7012_v17 = vld [vmem:[%s12146_s8 + $0x1d8] sm:$0xff] }
 0xd76   : > { %7818 = vmatpush1.bf16.msra.mxu1 %v10123_v16  ;;  %7862 = vmatprep.subr.bf16.mxu0 %v10110_v57  ;;  %v7004_v16 = vld [vmem:[%s12146_s8 + $0x198] sm:$0xff]  ;;  %v10160_v45 = vcombine.high %v7003_v22, %v7011_v59  ;;  %v10159_v57 = vcombine.low %v7003_v22, %v7011_v59  ;;  %v7029_v22 = vld [vmem:[%s12146_s8 + $0x260] sm:$0xff]  ;;  %v7022_v59 = vld [vmem:[%s12146_s8 + $0x228] sm:$0xff] }
 0xd77   : > { %6924 = vadd.xlane.f32.xlu0 %v6921_v3  ;;  %7819 = vmatprep.subr.bf16.mxu1 %v10108_v14  ;;  %v7075_v3 = vld [vmem:[%s12146_s8 + $0x3d0] sm:$0xff]  ;;  %v10162_v24 = vcombine.high %v7004_v16, %v7012_v17 }
 0xd78   : > { %v10223_v20 = vcombine.low %v7067_v58, %v7075_v3  ;;  %v10224_v8 = vcombine.high %v7067_v58, %v7075_v3  ;;  %v6987_v14 = vld [vmem:[%s12146_s8 + $0x110] sm:$0xff]  ;;  %v10161_v58 = vcombine.low %v7004_v16, %v7012_v17  ;;  %v7030_v16 = vld [vmem:[%s12146_s8 + $0x268] sm:$0xff] }
 0xd79   : > { %7863 = vmatpush1.bf16.msra.mxu0 %v10109_v5  ;;  %v6996_v5 = vld [vmem:[%s12146_s8 + $0x158] sm:$0xff]  ;;  %v10144_v3 = vcombine.high %v6987_v14, %v6995_v50 }
 0xd7a   : > { %7820 = vmatpush1.bf16.msra.mxu1 %v10107_v1  ;;  %7934 = vmatprep.subr.bf16.mxu0 %v10226_v31  ;;  %v6988_v1 = vld [vmem:[%s12146_s8 + $0x118] sm:$0xff]  ;;  %v10143_v31 = vcombine.low %v6987_v14, %v6995_v50  ;;  %v7013_v14 = vld [vmem:[%s12146_s8 + $0x1e0] sm:$0xff]  ;;  %v7006_v50 = vld [vmem:[%s12146_s8 + $0x1a8] sm:$0xff] }
 0xd7b   : > { %7891 = vmatprep.subr.bf16.mxu1 %v10224_v8  ;;  %v10146_v0 = vcombine.high %v6988_v1, %v6996_v5  ;;  %v6979_v8 = vld [vmem:[%s12146_s8 + $0xd0] sm:$0xff] }
 0xdfc   : > { %v6923_v12 = vpop.xlane.xlu0 %6922 }
 0xdfd   : > { %v6926_v61 = vmul.f32 0.0078125, %v6923_v12  ;;  %v10145_v12 = vcombine.low %v6988_v1, %v6996_v5  ;;  %v7014_v1 = vld [vmem:[%s12146_s8 + $0x1e8] sm:$0xff] }
 0xdff   : > { %v6928_v30 = vadd.f32 1e-05, %v6926_v61 }
 0xe00   : > { %v6925_v43 = vpop.xlane.xlu0 %6924 }
 0xe01   : > { %11468 = vrsqrt.f32 %v6928_v30  ;;  %v6927_v39 = vmul.f32 0.0078125, %v6925_v43  ;;  %v6955_v43 = vld [vmem:[%s12146_s8 + $0x10] sm:$0xff] }
 0xe03   : > { %v6929_v42 = vadd.f32 1e-05, %v6927_v39  ;;  %v6963_v39 = vld [vmem:[%s12146_s8 + $0x50] sm:$0xff] }
 0xe05   : > { %11470 = vrsqrt.f32 %v6929_v42  ;;  %v6956_v42 = vld [vmem:[%s12146_s8 + $0x18] sm:$0xff] }
 0xe0e   : > { %v11469_v52 = vpop.eup %11468 }
 0xe0f   : > { %v6932_v36 = vmul.f32 %v11469_v52, %v13357_v15  ;;  %v7051_v15 = vld [vmem:[%s12146_s8 + $0x310] sm:$0xff]  ;;  %v6964_v52 = vld [vmem:[%s12146_s8 + $0x58] sm:$0xff] }
 0xe10   : > { %v10208_v32 = vcombine.high %v7051_v15, %v7059_v55  ;;  %v10207_v4 = vcombine.low %v7051_v15, %v7059_v55  ;;  %v7078_v15 = vld [vmem:[%s12146_s8 + $0x3e8] sm:$0xff]  ;;  %v10111_v55 = vcombine.low %v6955_v43, %v6963_v39 }
 0xe11   : > { %v6941_v40 = vmul.f32 %v10105_v19, %v6932_v36 }
 0xe12   : > { %v11471_v60 = vpop.eup %11470 }
 0xe13   : > { %v6933_v56 = vmul.f32 %v11471_v60, %v13361_v53  ;;  %v13413_v63 = vadd.f32 %v10106_v48, %v6941_v40  ;;  %v10210_v53 = vcombine.high %v7052_v27, %v7060_v41  ;;  %v10112_v60 = vcombine.high %v6955_v43, %v6963_v39  ;;  %v6981_v43 = vld [vmem:[%s12146_s8 + $0xe0] sm:$0xff]  ;;  %v6974_v39 = vld [vmem:[%s12146_s8 + $0xa8] sm:$0xff] }
 0xe14   : > { %v10114_v40 = vcombine.high %v6956_v42, %v6964_v52  ;;  %v10113_v27 = vcombine.low %v6956_v42, %v6964_v52  ;;  %v6982_v42 = vld [vmem:[%s12146_s8 + $0xe8] sm:$0xff] }
 0xe15   : > { %v6942_v47 = vmul.f32 %v10105_v19, %v6933_v56  ;;  %v7069_v56 = vld [vmem:[%s12146_s8 + $0x3a0] sm:$0xff] }
 0xe17   : > { %v13415_v46 = vadd.f32 %v10106_v48, %v6942_v47  ;;  %v7077_v48 = vld [vmem:[%s12146_s8 + $0x3e0] sm:$0xff]  ;;  %v7070_v47 = vld [vmem:[%s12146_s8 + $0x3a8] sm:$0xff] }
 0xe18   : > { %v10228_v41 = vcombine.high %v7069_v56, %v7077_v48  ;;  %v10227_v29 = vcombine.low %v7069_v56, %v7077_v48  ;;  %v6965_v56 = vld [vmem:[%s12146_s8 + $0x60] sm:$0xff]  ;;  %v6958_v48 = vld [vmem:[%s12146_s8 + $0x28] sm:$0xff] }
 0xe19   : > { %v13419_v7 = vpack.c.bf16 %v13415_v46, %v13413_v63 }
 0xe1b   : > { %7838 = vmatmul.mubr.bf16.vlgmr.msra.gmra.mxu1 %v13419_v7  ;;  %7881 = vmatmul.mubr.bf16.vlgmr.msra.gmra.mxu0 %v13419_v7 }
 0xe1c   : > { %7892 = vmatpush1.bf16.msra.mxu1 %v10223_v20  ;;  %7935 = vmatpush1.bf16.msra.mxu0 %v10225_v2  ;;  %v6971_v20 = vld [vmem:[%s12146_s8 + $0x90] sm:$0xff]  ;;  %v6980_v2 = vld [vmem:[%s12146_s8 + $0xd8] sm:$0xff] }
 0xe1d   : > { %7893 = vmatprep.subr.bf16.mxu1 %v10208_v32  ;;  %7936 = vmatprep.subr.bf16.mxu0 %v10210_v53  ;;  %v10128_v61 = vcombine.high %v6971_v20, %v6979_v8  ;;  %v10130_v30 = vcombine.high %v6972_v18, %v6980_v2  ;;  %v10127_v36 = vcombine.low %v6971_v20, %v6979_v8  ;;  %v7053_v53 = vld [vmem:[%s12146_s8 + $0x320] sm:$0xff]  ;;  %v6990_v8 = vld [vmem:[%s12146_s8 + $0x128] sm:$0xff] }
 0xe1e   : > { %7923 = vmatprep.mubr.bf16.mxu1 %v13831_v35  ;;  %7966 = vmatprep.mubr.bf16.mxu0 %v13831_v35  ;;  %v10129_v19 = vcombine.low %v6972_v18, %v6980_v2  ;;  %v10230_v32 = vcombine.high %v7070_v47, %v7078_v15  ;;  %v10211_v44 = vcombine.low %v7053_v53, %v7061_v9  ;;  %v6997_v20 = vld [vmem:[%s12146_s8 + $0x160] sm:$0xff]  ;;  %v6998_v18 = vld [vmem:[%s12146_s8 + $0x168] sm:$0xff] }
 0xe20   : > { %7894 = vmatpush1.bf16.msra.mxu1 %v10207_v4  ;;  %7937 = vmatpush1.bf16.msra.mxu0 %v10209_v62  ;;  %v10229_v4 = vcombine.low %v7070_v47, %v7078_v15  ;;  %v10212_v62 = vcombine.high %v7053_v53, %v7061_v9  ;;  %v6966_v47 = vld [vmem:[%s12146_s8 + $0x68] sm:$0xff]  ;;  %v7079_v53 = vld [vmem:[%s12146_s8 + $0x3f0] sm:$0xff]  ;;  %v7072_v9 = vld [vmem:[%s12146_s8 + $0x3b8] sm:$0xff] }
 0xe21   : > { %7895 = vmatprep.subr.bf16.mxu1 %v10192_v49  ;;  %7938 = vmatprep.subr.bf16.mxu0 %v10194_v54  ;;  %v10214_v49 = vcombine.high %v7054_v26, %v7062_v23  ;;  %v7037_v54 = vld [vmem:[%s12146_s8 + $0x2a0] sm:$0xff] }
 0xe22   : > { %v10195_v17 = vcombine.low %v7037_v54, %v7045_v10 }
 0xe24   : > { %7896 = vmatpush1.bf16.msra.mxu1 %v10191_v6  ;;  %7939 = vmatpush1.bf16.msra.mxu0 %v10193_v21  ;;  %v10213_v6 = vcombine.low %v7054_v26, %v7062_v23  ;;  %v10196_v21 = vcombine.high %v7037_v54, %v7045_v10  ;;  %v7080_v26 = vld [vmem:[%s12146_s8 + $0x3f8] sm:$0xff]  ;;  %v7063_v54 = vld [vmem:[%s12146_s8 + $0x370] sm:$0xff] }
 0xe25   : > { %7897 = vmatprep.subr.bf16.mxu1 %v10176_v13  ;;  %7940 = vmatprep.subr.bf16.mxu0 %v10178_v28  ;;  %v10198_v13 = vcombine.high %v7038_v37, %v7046_v11  ;;  %v7021_v28 = vld [vmem:[%s12146_s8 + $0x220] sm:$0xff]  ;;  %v7056_v10 = vld [vmem:[%s12146_s8 + $0x338] sm:$0xff] }
 0xe26   : > { %v10179_v5 = vcombine.low %v7021_v28, %v7029_v22 }
 0xe28   : > { %7898 = vmatpush1.bf16.msra.mxu1 %v10175_v25  ;;  %7941 = vmatpush1.bf16.msra.mxu0 %v10177_v51  ;;  %v10197_v25 = vcombine.low %v7038_v37, %v7046_v11  ;;  %v10180_v51 = vcombine.high %v7021_v28, %v7029_v22  ;;  %v7064_v37 = vld [vmem:[%s12146_s8 + $0x378] sm:$0xff]  ;;  %v7047_v28 = vld [vmem:[%s12146_s8 + $0x2f0] sm:$0xff] }
 0xe29   : > { %7899 = vmatprep.subr.bf16.mxu1 %v10160_v45  ;;  %7942 = vmatprep.subr.bf16.mxu0 %v10162_v24  ;;  %v10182_v45 = vcombine.high %v7022_v59, %v7030_v16  ;;  %v7005_v24 = vld [vmem:[%s12146_s8 + $0x1a0] sm:$0xff]  ;;  %v7040_v22 = vld [vmem:[%s12146_s8 + $0x2b8] sm:$0xff] }
 0xe2a   : > { %v10163_v2 = vcombine.low %v7005_v24, %v7013_v14 }
 0xe2c   : > { %7900 = vmatpush1.bf16.msra.mxu1 %v10159_v57  ;;  %7943 = vmatpush1.bf16.msra.mxu0 %v10161_v58  ;;  %v10181_v57 = vcombine.low %v7022_v59, %v7030_v16  ;;  %v10164_v58 = vcombine.high %v7005_v24, %v7013_v14  ;;  %v7048_v59 = vld [vmem:[%s12146_s8 + $0x2f8] sm:$0xff]  ;;  %v7031_v24 = vld [vmem:[%s12146_s8 + $0x270] sm:$0xff] }
 0xe2d   : > { %7901 = vmatprep.subr.bf16.mxu1 %v10144_v3  ;;  %7944 = vmatprep.subr.bf16.mxu0 %v10146_v0  ;;  %v10166_v3 = vcombine.high %v7006_v50, %v7014_v1  ;;  %v6989_v0 = vld [vmem:[%s12146_s8 + $0x120] sm:$0xff]  ;;  %v7024_v14 = vld [vmem:[%s12146_s8 + $0x238] sm:$0xff] }
 0xe2e   : > { %v10147_v52 = vcombine.low %v6989_v0, %v6997_v20 }
 0xe30   : > { %7902 = vmatpush1.bf16.msra.mxu1 %v10143_v31  ;;  %7945 = vmatpush1.bf16.msra.mxu0 %v10145_v12  ;;  %v10165_v31 = vcombine.low %v7006_v50, %v7014_v1  ;;  %v10148_v12 = vcombine.high %v6989_v0, %v6997_v20  ;;  %v7032_v50 = vld [vmem:[%s12146_s8 + $0x278] sm:$0xff]  ;;  %v7015_v0 = vld [vmem:[%s12146_s8 + $0x1f0] sm:$0xff] }
 0xe31   : > { %7903 = vmatprep.subr.bf16.mxu1 %v10128_v61  ;;  %7946 = vmatprep.subr.bf16.mxu0 %v10130_v30  ;;  %v10150_v61 = vcombine.high %v6990_v8, %v6998_v18  ;;  %v6973_v30 = vld [vmem:[%s12146_s8 + $0xa0] sm:$0xff]  ;;  %v7008_v20 = vld [vmem:[%s12146_s8 + $0x1b8] sm:$0xff] }
 0xe32   : > { %v10131_v15 = vcombine.low %v6973_v30, %v6981_v43 }
 0xe34   : > { %7904 = vmatpush1.bf16.msra.mxu1 %v10127_v36  ;;  %7947 = vmatpush1.bf16.msra.mxu0 %v10129_v19  ;;  %v10149_v36 = vcombine.low %v6990_v8, %v6998_v18  ;;  %v10132_v19 = vcombine.high %v6973_v30, %v6981_v43  ;;  %v7016_v8 = vld [vmem:[%s12146_s8 + $0x1f8] sm:$0xff] }
 0xe35   : > { %7905 = vmatprep.subr.bf16.mxu1 %v10112_v60  ;;  %7948 = vmatprep.subr.bf16.mxu0 %v10114_v40  ;;  %v10134_v60 = vcombine.high %v6974_v39, %v6982_v42  ;;  %v6957_v40 = vld [vmem:[%s12146_s8 + $0x20] sm:$0xff]  ;;  %v6992_v30 = vld [vmem:[%s12146_s8 + $0x138] sm:$0xff] }
 0xe36   : > { %v10115_v23 = vcombine.low %v6957_v40, %v6965_v56  ;;  %v7000_v43 = vld [vmem:[%s12146_s8 + $0x178] sm:$0xff] }
 0xe38   : > { %7906 = vmatpush1.bf16.msra.mxu1 %v10111_v55  ;;  %7949 = vmatpush1.bf16.msra.mxu0 %v10113_v27  ;;  %v10133_v55 = vcombine.low %v6974_v39, %v6982_v42  ;;  %v10116_v27 = vcombine.high %v6957_v40, %v6965_v56  ;;  %v10169_v42 = vcombine.low %v7008_v20, %v7016_v8  ;;  %v6976_v40 = vld [vmem:[%s12146_s8 + $0xb8] sm:$0xff] }
 0xe39   : > { %7977 = vmatprep.subr.bf16.mxu1 %v10228_v41  ;;  %8020 = vmatprep.subr.bf16.mxu0 %v10230_v32  ;;  %v10118_v41 = vcombine.high %v6958_v48, %v6966_v47  ;;  %v7071_v32 = vld [vmem:[%s12146_s8 + $0x3b0] sm:$0xff]  ;;  %v6984_v56 = vld [vmem:[%s12146_s8 + $0xf8] sm:$0xff] }
 0xe3a   : > { %v10231_v11 = vcombine.low %v7071_v32, %v7079_v53 }
 0xe3b   : > { %7924 = vmatmul.mubr.bf16.vlgmr.msra.gmra.mxu1 %v13419_v7  ;;  %7967 = vmatmul.mubr.bf16.vlgmr.msra.gmra.mxu0 %v13419_v7 }
 0xe3c   : > { %7978 = vmatpush1.bf16.msra.mxu1 %v10227_v29  ;;  %8021 = vmatpush1.bf16.msra.mxu0 %v10229_v4  ;;  %v10117_v29 = vcombine.low %v6958_v48, %v6966_v47  ;;  %v10232_v4 = vcombine.high %v7071_v32, %v7079_v53  ;;  %v10153_v47 = vcombine.low %v6992_v30, %v7000_v43  ;;  %v6960_v32 = vld [vmem:[%s12146_s8 + $0x38] sm:$0xff] }
 0xe3d   : > { %7979 = vmatprep.subr.bf16.mxu1 %v10212_v62  ;;  %8022 = vmatprep.subr.bf16.mxu0 %v10214_v49  ;;  %v10234_v62 = vcombine.high %v7072_v9, %v7080_v26  ;;  %v7055_v49 = vld [vmem:[%s12146_s8 + $0x330] sm:$0xff]  ;;  %v6968_v53 = vld [vmem:[%s12146_s8 + $0x78] sm:$0xff] }
 0xe3e   : > { %8009 = vmatprep.mubr.bf16.mxu1 %v13831_v35  ;;  %8052 = vmatprep.mubr.bf16.mxu0 %v13831_v35  ;;  %v10215_v16 = vcombine.low %v7055_v49, %v7063_v54 }
 0xe40   : > { %7980 = vmatpush1.bf16.msra.mxu1 %v10211_v44  ;;  %8023 = vmatpush1.bf16.msra.mxu0 %v10213_v6  ;;  %v10233_v44 = vcombine.low %v7072_v9, %v7080_v26  ;;  %v10216_v6 = vcombine.high %v7055_v49, %v7063_v54  ;;  %v10137_v26 = vcombine.low %v6976_v40, %v6984_v56  ;;  %v11212_v49 = vld [vmem:[%s12182_s9 + $0x78] sm:$0xff]  }
 0xe41   : > { %7981 = vmatprep.subr.bf16.mxu1 %v10196_v21  ;;  %8024 = vmatprep.subr.bf16.mxu0 %v10198_v13  ;;  %v10218_v21 = vcombine.high %v7056_v10, %v7064_v37  ;;  %v7039_v13 = vld [vmem:[%s12146_s8 + $0x2b0] sm:$0xff]  ;;  %v11213_v54 = vld [vmem:[%s12182_s9 + $0xf8] sm:$0xff]  }
 0xe42   : > { %v10199_v1 = vcombine.low %v7039_v13, %v7047_v28 }
 0xe44   : > { %7982 = vmatpush1.bf16.msra.mxu1 %v10195_v17  ;;  %8025 = vmatpush1.bf16.msra.mxu0 %v10197_v25  ;;  %v10217_v17 = vcombine.low %v7056_v10, %v7064_v37  ;;  %v10200_v25 = vcombine.high %v7039_v13, %v7047_v28  ;;  %v11214_v10 = vld [vmem:[%s12182_s9 + $0x38] sm:$0xff]   ;;  %v11220_v13 = vld [vmem:[%s12182_s9 + $0x68] sm:$0xff]  }
 0xe45   : > { %7983 = vmatprep.subr.bf16.mxu1 %v10180_v51  ;;  %8026 = vmatprep.subr.bf16.mxu0 %v10182_v45  ;;  %v10202_v51 = vcombine.high %v7040_v22, %v7048_v59  ;;  %v7023_v45 = vld [vmem:[%s12146_s8 + $0x230] sm:$0xff]  ;;  %v11215_v37 = vld [vmem:[%s12182_s9 + $0xb8] sm:$0xff]   ;;  %v11221_v28 = vld [vmem:[%s12182_s9 + $0xe8] sm:$0xff]  }
 0xe46   : > { %v10183_v18 = vcombine.low %v7023_v45, %v7031_v24 }
 0xe48   : > { %7984 = vmatpush1.bf16.msra.mxu1 %v10179_v5  ;;  %8027 = vmatpush1.bf16.msra.mxu0 %v10181_v57  ;;  %v10201_v5 = vcombine.low %v7040_v22, %v7048_v59  ;;  %v10184_v57 = vcombine.high %v7023_v45, %v7031_v24  ;;  %v11222_v22 = vld [vmem:[%s12182_s9 + $0x28] sm:$0xff]   ;;  %v11229_v45 = vld [vmem:[%s12182_s9 + $0xd8] sm:$0xff]  }
 0xe49   : > { %7985 = vmatprep.subr.bf16.mxu1 %v10164_v58  ;;  %8028 = vmatprep.subr.bf16.mxu0 %v10166_v3  ;;  %v10186_v58 = vcombine.high %v7024_v14, %v7032_v50  ;;  %v7007_v3 = vld [vmem:[%s12146_s8 + $0x1b0] sm:$0xff]  ;;  %v11223_v59 = vld [vmem:[%s12182_s9 + $0xa8] sm:$0xff]   ;;  %v11230_v24 = vld [vmem:[%s12182_s9 + $0x18] sm:$0xff]  }
 0xe4a   : > { %v10167_v39 = vcombine.low %v7007_v3, %v7015_v0 }
 0xe4c   : > { %7986 = vmatpush1.bf16.msra.mxu1 %v10163_v2  ;;  %8029 = vmatpush1.bf16.msra.mxu0 %v10165_v31  ;;  %v10168_v2 = vcombine.high %v7007_v3, %v7015_v0  ;;  %v10170_v31 = vcombine.high %v7008_v20, %v7016_v8  ;;  %v11237_v3 = vld [vmem:[%s12182_s9 + $0xc8] sm:$0xff]   ;;  %v11240_v8 = vld [vmem:[%s12182_s9 + $0x40] sm:$0xff]  }
 0xe4d   : > { %7987 = vmatprep.subr.bf16.mxu1 %v10148_v12  ;;  %8030 = vmatprep.subr.bf16.mxu0 %v10150_v61  ;;  %v6991_v12 = vld [vmem:[%s12146_s8 + $0x130] sm:$0xff]  ;;  %v11238_v0 = vld [vmem:[%s12182_s9 + $0x8] sm:$0xff]  }
 0xe4e   : > { %v6999_v61 = vld [vmem:[%s12146_s8 + $0x170] sm:$0xff]  ;;  %v11239_v20 = vld [vmem:[%s12182_s9 + $0x88] sm:$0xff]  }
 0xe4f   : > { %v10151_v48 = vcombine.low %v6991_v12, %v6999_v61 }
 0xe50   : > { %7988 = vmatpush1.bf16.msra.mxu1 %v10147_v52  ;;  %8031 = vmatpush1.bf16.msra.mxu0 %v10149_v36  ;;  %v10152_v52 = vcombine.high %v6991_v12, %v6999_v61  ;;  %v10154_v36 = vcombine.high %v6992_v30, %v7000_v43  ;;  %v11245_v12 = vld [vmem:[%s12182_s9 + $0x1f8] sm:$0xff]   ;;  %v7099_v61 = vsub.s32 3, %v12227_v33  ;;  %v13559_v30 = vld [vmem:[%s12148_s25] sm:$0xff] }
 0xe51   : > { %7989 = vmatprep.subr.bf16.mxu1 %v10132_v19  ;;  %8032 = vmatprep.subr.bf16.mxu0 %v10134_v60  ;;  %v6975_v19 = vld [vmem:[%s12146_s8 + $0xb0] sm:$0xff] }
 0xe52   : > { %v6983_v60 = vld [vmem:[%s12146_s8 + $0xf0] sm:$0xff] }
 0xe53   : > { %v10135_v9 = vcombine.low %v6975_v19, %v6983_v60 }
 0xe54   : > { %7990 = vmatpush1.bf16.msra.mxu1 %v10131_v15  ;;  %8033 = vmatpush1.bf16.msra.mxu0 %v10133_v55  ;;  %v10136_v15 = vcombine.high %v6975_v19, %v6983_v60  ;;  %v10138_v55 = vcombine.high %v6976_v40, %v6984_v56  ;;  %v13834_v19 = vld [vmem:[#allocation25_spill] sm:$0xff] }
 0xe55   : > { %7991 = vmatprep.subr.bf16.mxu1 %v10116_v27  ;;  %8034 = vmatprep.subr.bf16.mxu0 %v10118_v41  ;;  %v6959_v27 = vld [vmem:[%s12146_s8 + $0x30] sm:$0xff]  ;;  %v7096_v60 = vrot.slane %v13559_v30, %v13834_v19 }
 0xe56   : > { %v6967_v41 = vld [vmem:[%s12146_s8 + $0x70] sm:$0xff] }
 0xe58   : > { %7992 = vmatpush1.bf16.msra.mxu1 %v10115_v23  ;;  %8035 = vmatpush1.bf16.msra.mxu0 %v10117_v29  ;;  %v10120_v23 = vcombine.high %v6959_v27, %v6967_v41  ;;  %v10122_v29 = vcombine.high %v6960_v32, %v6968_v53 }
 0xe59   : > { %8063 = vmatprep.subr.bf16.mxu1 %v10232_v4  ;;  %8106 = vmatprep.subr.bf16.mxu0 %v10234_v62  ;;  %v10119_v4 = vcombine.low %v6959_v27, %v6967_v41  ;;  %v10121_v62 = vcombine.low %v6960_v32, %v6968_v53 }
 0xe5b   : > { %8010 = vmatmul.mubr.bf16.vlgmr.msra.gmra.mxu1 %v13419_v7  ;;  %8053 = vmatmul.mubr.bf16.vlgmr.msra.gmra.mxu0 %v13419_v7 }
 0xe5c   : > { %8064 = vmatpush1.bf16.msra.mxu1 %v10231_v11  ;;  %8107 = vmatpush1.bf16.msra.mxu0 %v10233_v44  ;;  %v11216_v11 = vld [vmem:[%s12182_s9 + $0x70] sm:$0xff]  }
 0xe5d   : > { %8065 = vmatprep.subr.bf16.mxu1 %v10216_v6  ;;  %8108 = vmatprep.subr.bf16.mxu0 %v10218_v21  ;;  %v11217_v44 = vld [vmem:[%s12182_s9 + $0xf0] sm:$0xff]  }
 0xe5e   : > { %8095 = vmatprep.mubr.bf16.mxu1 %v13831_v35  ;;  %8138 = vmatprep.mubr.bf16.mxu0 %v13831_v35  ;;  %v10185_v35 = vcombine.low %v7024_v14, %v7032_v50  ;;  %v11218_v6 = vld [vmem:[%s12182_s9 + $0x30] sm:$0xff]   ;;  %v11231_v14 = vld [vmem:[%s12182_s9 + $0x98] sm:$0xff]  }
 0xe5f   : > { %v11219_v21 = vld [vmem:[%s12182_s9 + $0xb0] sm:$0xff]  }
 0xe60   : > { %8066 = vmatpush1.bf16.msra.mxu1 %v10215_v16  ;;  %8109 = vmatpush1.bf16.msra.mxu0 %v10217_v17  ;;  %v11225_v16 = vld [vmem:[%s12182_s9 + $0xe0] sm:$0xff]   ;;  %v11232_v50 = vld [vmem:[%s12182_s9 + $0x50] sm:$0xff]  }
 0xe61   : > { %8067 = vmatprep.subr.bf16.mxu1 %v10200_v25  ;;  %8110 = vmatprep.subr.bf16.mxu0 %v10202_v51  ;;  %v11226_v17 = vld [vmem:[%s12182_s9 + $0x20] sm:$0xff]   ;;  %v11228_v51 = vld [vmem:[%s12182_s9 + $0x58] sm:$0xff]  }
 0xe62   : > { %v11227_v25 = vld [vmem:[%s12182_s9 + $0xa0] sm:$0xff]  }
 0xe64   : > { %8068 = vmatpush1.bf16.msra.mxu1 %v10199_v1  ;;  %8111 = vmatpush1.bf16.msra.mxu0 %v10201_v5  ;;  %v11233_v1 = vld [vmem:[%s12182_s9 + $0xd0] sm:$0xff]  }
 0xe65   : > { %8069 = vmatprep.subr.bf16.mxu1 %v10184_v57  ;;  %8112 = vmatprep.subr.bf16.mxu0 %v10186_v58  ;;  %v11234_v5 = vld [vmem:[%s12182_s9 + $0x10] sm:$0xff]   ;;  %v11236_v58 = vld [vmem:[%s12182_s9 + $0x48] sm:$0xff]  }
 0xe66   : > { %v11235_v57 = vld [vmem:[%s12182_s9 + $0x90] sm:$0xff]  }
 0xe68   : > { %8070 = vmatpush1.bf16.msra.mxu1 %v10183_v18  ;;  %8113 = vmatpush1.bf16.msra.mxu0 %v10185_v35  ;;  %v11241_v18 = vld [vmem:[%s12182_s9 + $0xc0] sm:$0xff]  }
 0xe69   : > { %8071 = vmatprep.subr.bf16.mxu1 %v10168_v2  ;;  %8114 = vmatprep.subr.bf16.mxu0 %v10170_v31  ;;  %v11242_v35 = vld [vmem:[%s12182_s9] sm:$0xff]   ;;  %v11244_v31 = vld [vmem:[%s12182_s9 + $0x178] sm:$0xff]  }
 0xe6a   : > { %v11243_v2 = vld [vmem:[%s12182_s9 + $0x80] sm:$0xff]  }
 0xe6c   : > { %8072 = vmatpush1.bf16.msra.mxu1 %v10167_v39  ;;  %8115 = vmatpush1.bf16.msra.mxu0 %v10169_v42  ;;  %v7092_v42 = vrot.slane %v13559_v30, %v12236_v38 }
 0xe6d   : > { %8073 = vmatprep.subr.bf16.mxu1 %v10152_v52  ;;  %8116 = vmatprep.subr.bf16.mxu0 %v10154_v36  ;;  %v7100_v52 = vrot.slane %v13559_v30, %v7099_v61  ;;  %v7088_v36 = vrot.slane %v13559_v30, %v12230_v34 }
 0xe70   : > { %8074 = vmatpush1.bf16.msra.mxu1 %v10151_v48  ;;  %8117 = vmatpush1.bf16.msra.mxu0 %v10153_v47 }
 0xe71   : > { %8075 = vmatprep.subr.bf16.mxu1 %v10136_v15  ;;  %8118 = vmatprep.subr.bf16.mxu0 %v10138_v55 }
 0xe74   : > { %8076 = vmatpush1.bf16.msra.mxu1 %v10135_v9  ;;  %8119 = vmatpush1.bf16.msra.mxu0 %v10137_v26 }
 0xe75   : > { %8077 = vmatprep.subr.bf16.mxu1 %v10120_v23  ;;  %8120 = vmatprep.subr.bf16.mxu0 %v10122_v29 }
 0xe78   : > { %8078 = vmatpush1.bf16.msra.mxu1 %v10119_v4  ;;  %8121 = vmatpush1.bf16.msra.mxu0 %v10121_v62 }
 0xe79   : > { %10521 = vmatprep.subr.bf16.mxu1 %v11212_v49  ;;  %10543 = vmatprep.subr.bf16.mxu0 %v11213_v54 }
 0xe7b   : > { %8096 = vmatmul.mubr.bf16.vlgmr.msra.gmra.mxu1 %v13419_v7  ;;  %8139 = vmatmul.mubr.bf16.vlgmr.msra.gmra.mxu0 %v13419_v7  ;;  %v11224_v7 = vld [vmem:[%s12182_s9 + $0x60] sm:$0xff]  }
 0xe7c   : > { %10522 = vmatpush3.bf16.msra.mxu1 %v11214_v10  ;;  %10544 = vmatpush3.bf16.msra.mxu0 %v11215_v37 }
 0xe7d   : > { %10523 = vmatprep.subr.bf16.mxu1 %v11216_v11  ;;  %10545 = vmatprep.subr.bf16.mxu0 %v11217_v44 }
 0xe80   : > { %10524 = vmatpush3.bf16.msra.mxu1 %v11218_v6  ;;  %10546 = vmatpush3.bf16.msra.mxu0 %v11219_v21 }
 0xe81   : > { %10525 = vmatprep.subr.bf16.mxu1 %v11220_v13  ;;  %10547 = vmatprep.subr.bf16.mxu0 %v11221_v28  ;;  %v11246_v13 = vld [vmem:[%s12182_s9 + $0x138] sm:$0xff]  }
 0xe82   : > { %v11247_v28 = vld [vmem:[%s12182_s9 + $0x1b8] sm:$0xff]  }
 0xe84   : > { %10526 = vmatpush3.bf16.msra.mxu1 %v11222_v22  ;;  %10548 = vmatpush3.bf16.msra.mxu0 %v11223_v59 }
 0xe85   : > { %10527 = vmatprep.subr.bf16.mxu1 %v11224_v7  ;;  %10549 = vmatprep.subr.bf16.mxu0 %v11225_v16  ;;  %v11248_v7 = vld [vmem:[%s12182_s9 + $0x170] sm:$0xff]  }
 0xe86   : > { %v11249_v16 = vld [vmem:[%s12182_s9 + $0x1f0] sm:$0xff]  }
 0xe88   : > { %10528 = vmatpush3.bf16.msra.mxu1 %v11226_v17  ;;  %10550 = vmatpush3.bf16.msra.mxu0 %v11227_v25  ;;  %v11250_v17 = vld [vmem:[%s12182_s9 + $0x130] sm:$0xff]  }
 0xe89   : > { %10529 = vmatprep.subr.bf16.mxu1 %v11228_v51  ;;  %10551 = vmatprep.subr.bf16.mxu0 %v11229_v45  ;;  %v11251_v25 = vld [vmem:[%s12182_s9 + $0x1b0] sm:$0xff]   ;;  %v11252_v51 = vld [vmem:[%s12182_s9 + $0x168] sm:$0xff]  }
 0xe8a   : > { %v11253_v45 = vld [vmem:[%s12182_s9 + $0x1e8] sm:$0xff]  }
 0xe8c   : > { %10530 = vmatpush3.bf16.msra.mxu1 %v11230_v24  ;;  %10552 = vmatpush3.bf16.msra.mxu0 %v11231_v14  ;;  %v11254_v24 = vld [vmem:[%s12182_s9 + $0x128] sm:$0xff]  }
 0xe8d   : > { %10531 = vmatprep.subr.bf16.mxu1 %v11232_v50  ;;  %10553 = vmatprep.subr.bf16.mxu0 %v11233_v1  ;;  %v11255_v14 = vld [vmem:[%s12182_s9 + $0x1a8] sm:$0xff]   ;;  %v11256_v50 = vld [vmem:[%s12182_s9 + $0x160] sm:$0xff]  }
 0xe8e   : > { %v11257_v1 = vld [vmem:[%s12182_s9 + $0x1e0] sm:$0xff]  }
 0xe90   : > { %10532 = vmatpush3.bf16.msra.mxu1 %v11234_v5  ;;  %10554 = vmatpush3.bf16.msra.mxu0 %v11235_v57  ;;  %v11258_v5 = vld [vmem:[%s12182_s9 + $0x120] sm:$0xff]  }
 0xe91   : > { %10533 = vmatprep.subr.bf16.mxu1 %v11236_v58  ;;  %10555 = vmatprep.subr.bf16.mxu0 %v11237_v3  ;;  %v11259_v57 = vld [vmem:[%s12182_s9 + $0x1a0] sm:$0xff]   ;;  %v11260_v58 = vld [vmem:[%s12182_s9 + $0x158] sm:$0xff]  }
 0xe92   : > { %v11261_v3 = vld [vmem:[%s12182_s9 + $0x1d8] sm:$0xff]  }
 0xe94   : > { %10534 = vmatpush3.bf16.msra.mxu1 %v11238_v0  ;;  %10556 = vmatpush3.bf16.msra.mxu0 %v11239_v20  ;;  %v11262_v0 = vld [vmem:[%s12182_s9 + $0x118] sm:$0xff]  }
 0xe95   : > { %10535 = vmatprep.subr.bf16.mxu1 %v11240_v8  ;;  %10557 = vmatprep.subr.bf16.mxu0 %v11241_v18  ;;  %v11263_v20 = vld [vmem:[%s12182_s9 + $0x198] sm:$0xff]   ;;  %v11264_v8 = vld [vmem:[%s12182_s9 + $0x150] sm:$0xff]  }
 0xe96   : > { %v11265_v18 = vld [vmem:[%s12182_s9 + $0x1d0] sm:$0xff]  }
 0xe98   : > { %10536 = vmatpush3.bf16.msra.mxu1 %v11242_v35  ;;  %10558 = vmatpush3.bf16.msra.mxu0 %v11243_v2  ;;  %v7107_v35 = vsub.s32 5, %v12227_v33  ;;  %v7115_v2 = vsub.s32 7, %v12227_v33 }
 0xe99   : > { %10565 = vmatprep.subr.bf16.mxu1 %v11244_v31  ;;  %10587 = vmatprep.subr.bf16.mxu0 %v11245_v12  ;;  %v7103_v31 = vsub.s32 4, %v12227_v33  ;;  %v7111_v12 = vsub.s32 6, %v12227_v33 }
 0xedb   : > { %v7839_v43 = vpop.f32.mrf.mxu1  ;;  %v7882_v39 = vpop.f32.mrf.mxu0 }
 0xedc   : > { %v7840_v32 = vadd.f32 %v7839_v43, %v7088_v36  ;;  %v7883_v53 = vadd.f32 %v7882_v39, %v7096_v60  ;;  %v11266_v43 = vld [vmem:[%s12182_s9 + $0x110] sm:$0xff]  }
 0xedd   : > { %v7841_v40 = vpop.f32.mrf.mxu1  ;;  %v7884_v56 = vpop.f32.mrf.mxu0  ;;  %v11267_v39 = vld [vmem:[%s12182_s9 + $0x190] sm:$0xff]  }
 0xede   : > { %v7842_v15 = vadd.f32 %v7841_v40, %v7092_v42  ;;  %v7885_v55 = vadd.f32 %v7884_v56, %v7100_v52  ;;  %v8149_v11 = vmax.f32 %v7840_v32, 0.0  ;;  %v8151_v44 = vmax.f32 %v7883_v53, 0.0 }
 0xedf   : > { %v7843_v48 = vpop.f32.mrf.mxu1  ;;  %v7886_v47 = vpop.f32.mrf.mxu0  ;;  %v7108_v40 = vrot.slane %v13559_v30, %v7107_v35  ;;  %v7116_v56 = vrot.slane %v13559_v30, %v7115_v2 }
 0xee0   : > { %v7844_v27 = vadd.f32 %v7843_v48, %v7088_v36  ;;  %v7887_v41 = vadd.f32 %v7886_v47, %v7096_v60  ;;  %v8150_v49 = vmax.f32 %v7842_v15, 0.0  ;;  %v8152_v54 = vmax.f32 %v7885_v55, 0.0  ;;  %v11268_v36 = vld [vmem:[%s12182_s9 + $0x148] sm:$0xff]  }
 0xee1   : > { %v7845_v9 = vpop.f32.mrf.mxu1  ;;  %v7888_v26 = vpop.f32.mrf.mxu0  ;;  %v11269_v60 = vld [vmem:[%s12182_s9 + $0x1c8] sm:$0xff]   ;;  %v7104_v48 = vrot.slane %v13559_v30, %v7103_v31  ;;  %v7112_v47 = vrot.slane %v13559_v30, %v7111_v12 }
 0xee2   : > { %v7846_v23 = vadd.f32 %v7845_v9, %v7092_v42  ;;  %v7889_v29 = vadd.f32 %v7888_v26, %v7100_v52  ;;  %v8165_v4 = vmax.f32 %v7844_v27, 0.0  ;;  %v8167_v62 = vmax.f32 %v7887_v41, 0.0  ;;  %v11270_v27 = vld [vmem:[%s12182_s9 + $0x108] sm:$0xff]   ;;  %v11272_v9 = vld [vmem:[%s12182_s9 + $0x140] sm:$0xff]  }
 0xee3   : > { %v11271_v41 = vld [vmem:[%s12182_s9 + $0x188] sm:$0xff]   ;;  %v11273_v26 = vld [vmem:[%s12182_s9 + $0x1c0] sm:$0xff]  }
 0xee4   : > { %v8166_v10 = vmax.f32 %v7846_v23, 0.0  ;;  %v8168_v37 = vmax.f32 %v7889_v29, 0.0  ;;  %v8181_v22 = vpack.c.bf16 %v8165_v4, %v8149_v11  ;;  %v8183_v59 = vpack.c.bf16 %v8167_v62, %v8151_v44  ;;  %v11274_v44 = vld [vmem:[%s12182_s9 + $0x100] sm:$0xff]  }
 0xee6   : > { %v8182_v6 = vpack.c.bf16 %v8166_v10, %v8150_v49  ;;  %v8184_v21 = vpack.c.bf16 %v8168_v37, %v8152_v54 }
 0xee8   : > { %9260 = vmatprep.mubr.bf16.mxu1 %v8182_v6  ;;  %9301 = vmatprep.mubr.bf16.mxu0 %v8184_v21  ;;  %v11275_v6 = vld [vmem:[%s12182_s9 + $0x180] sm:$0xff]  }
 0xee9   : > { %9261 = vmatmul.mubr.bf16.vlgmr.msra.gmra.mxu1 %v8181_v22  ;;  %9302 = vmatmul.mubr.bf16.vlgmr.msra.gmra.mxu0 %v8183_v59  ;;  %v11277_v22 = vld [vmem:[%s12182_s9 + $0x2f8] sm:$0xff]  }
 0xeea   : > { %10566 = vmatpush3.bf16.msra.mxu1 %v11246_v13  ;;  %10588 = vmatpush3.bf16.msra.mxu0 %v11247_v28  ;;  %v11276_v28 = vld [vmem:[%s12182_s9 + $0x278] sm:$0xff]  }
 0xeeb   : > { %10567 = vmatprep.subr.bf16.mxu1 %v11248_v7  ;;  %10589 = vmatprep.subr.bf16.mxu0 %v11249_v16 }
 0xeee   : > { %10568 = vmatpush3.bf16.msra.mxu1 %v11250_v17  ;;  %10590 = vmatpush3.bf16.msra.mxu0 %v11251_v25 }
 0xeef   : > { %10569 = vmatprep.subr.bf16.mxu1 %v11252_v51  ;;  %10591 = vmatprep.subr.bf16.mxu0 %v11253_v45 }
 0xef2   : > { %10570 = vmatpush3.bf16.msra.mxu1 %v11254_v24  ;;  %10592 = vmatpush3.bf16.msra.mxu0 %v11255_v14  ;;  %v11278_v14 = vld [vmem:[%s12182_s9 + $0x238] sm:$0xff]  }
 0xef3   : > { %10571 = vmatprep.subr.bf16.mxu1 %v11256_v50  ;;  %10593 = vmatprep.subr.bf16.mxu0 %v11257_v1  ;;  %v11279_v50 = vld [vmem:[%s12182_s9 + $0x2b8] sm:$0xff]  }
 0xef6   : > { %10572 = vmatpush3.bf16.msra.mxu1 %v11258_v5  ;;  %10594 = vmatpush3.bf16.msra.mxu0 %v11259_v57  ;;  %v11280_v57 = vld [vmem:[%s12182_s9 + $0x270] sm:$0xff]  }
 0xef7   : > { %10573 = vmatprep.subr.bf16.mxu1 %v11260_v58  ;;  %10595 = vmatprep.subr.bf16.mxu0 %v11261_v3  ;;  %v11281_v58 = vld [vmem:[%s12182_s9 + $0x2f0] sm:$0xff]  }
 0xef8   : > { %v11282_v3 = vld [vmem:[%s12182_s9 + $0x230] sm:$0xff]  }
 0xefa   : > { %10574 = vmatpush3.bf16.msra.mxu1 %v11262_v0  ;;  %10596 = vmatpush3.bf16.msra.mxu0 %v11263_v20  ;;  %v11283_v0 = vld [vmem:[%s12182_s9 + $0x2b0] sm:$0xff]   ;;  %v11284_v20 = vld [vmem:[%s12182_s9 + $0x268] sm:$0xff]  }
 0xefb   : > { %v7925_v42 = vpop.f32.mrf.mxu1  ;;  %v7968_v52 = vpop.f32.mrf.mxu0  ;;  %10575 = vmatprep.subr.bf16.mxu1 %v11264_v8  ;;  %10597 = vmatprep.subr.bf16.mxu0 %v11265_v18  ;;  %v11285_v8 = vld [vmem:[%s12182_s9 + $0x2e8] sm:$0xff]  }
 0xefc   : > { %v7926_v30 = vadd.f32 %v7925_v42, %v7104_v48  ;;  %v7969_v49 = vadd.f32 %v7968_v52, %v7112_v47  ;;  %v11286_v18 = vld [vmem:[%s12182_s9 + $0x228] sm:$0xff]   ;;  %v11289_v42 = vld [vmem:[%s12182_s9 + $0x2e0] sm:$0xff]  }
 0xefd   : > { %v7927_v15 = vpop.f32.mrf.mxu1  ;;  %v7970_v55 = vpop.f32.mrf.mxu0  ;;  %v11290_v52 = vld [vmem:[%s12182_s9 + $0x220] sm:$0xff]  }
 0xefe   : > { %10576 = vmatpush3.bf16.msra.mxu1 %v11266_v43  ;;  %10598 = vmatpush3.bf16.msra.mxu0 %v11267_v39  ;;  %v7928_v23 = vadd.f32 %v7927_v15, %v7108_v40  ;;  %v7971_v29 = vadd.f32 %v7970_v55, %v7116_v56  ;;  %v8153_v25 = vmax.f32 %v7926_v30, 0.0  ;;  %v8155_v51 = vmax.f32 %v7969_v49, 0.0  ;;  %v11287_v43 = vld [vmem:[%s12182_s9 + $0x2a8] sm:$0xff]   ;;  %v11288_v39 = vld [vmem:[%s12182_s9 + $0x260] sm:$0xff]   ;;  %v11297_v15 = vld [vmem:[%s12182_s9 + $0x2d0] sm:$0xff]  }
 0xeff   : > { %v7929_v32 = vpop.f32.mrf.mxu1  ;;  %v7972_v53 = vpop.f32.mrf.mxu0  ;;  %10577 = vmatprep.subr.bf16.mxu1 %v11268_v36  ;;  %10599 = vmatprep.subr.bf16.mxu0 %v11269_v60  ;;  %v11291_v36 = vld [vmem:[%s12182_s9 + $0x2a0] sm:$0xff]   ;;  %v11292_v60 = vld [vmem:[%s12182_s9 + $0x258] sm:$0xff]  }
 0xf00   : > { %v7930_v4 = vadd.f32 %v7929_v32, %v7104_v48  ;;  %v7973_v62 = vadd.f32 %v7972_v53, %v7112_v47  ;;  %v8154_v59 = vmax.f32 %v7928_v23, 0.0  ;;  %v8156_v7 = vmax.f32 %v7971_v29, 0.0  ;;  %v11295_v48 = vld [vmem:[%s12182_s9 + $0x298] sm:$0xff]   ;;  %v11296_v47 = vld [vmem:[%s12182_s9 + $0x250] sm:$0xff]  }
 0xf01   : > { %v7931_v54 = vpop.f32.mrf.mxu1  ;;  %v7974_v10 = vpop.f32.mrf.mxu0  ;;  %v13639_v55 = vld [vmem:[%s12148_s25 + $0x8] sm:$0xff] }
 0xf02   : > { %v7932_v37 = vadd.f32 %v7931_v54, %v7108_v40  ;;  %v7975_v11 = vadd.f32 %v7974_v10, %v7116_v56  ;;  %10578 = vmatpush3.bf16.msra.mxu1 %v11270_v27  ;;  %10600 = vmatpush3.bf16.msra.mxu0 %v11271_v41  ;;  %v8169_v21 = vmax.f32 %v7930_v4, 0.0  ;;  %v8171_v13 = vmax.f32 %v7973_v62, 0.0  ;;  %v11293_v40 = vld [vmem:[%s12182_s9 + $0x2d8] sm:$0xff]   ;;  %v11298_v27 = vld [vmem:[%s12182_s9 + $0x210] sm:$0xff]   ;;  %v11302_v54 = vld [vmem:[%s12182_s9 + $0x208] sm:$0xff]  }
 0xf03   : > { %10579 = vmatprep.subr.bf16.mxu1 %v11272_v9  ;;  %10601 = vmatprep.subr.bf16.mxu0 %v11273_v26  ;;  %v11294_v56 = vld [vmem:[%s12182_s9 + $0x218] sm:$0xff]   ;;  %v11299_v41 = vld [vmem:[%s12182_s9 + $0x290] sm:$0xff]   ;;  %v11300_v9 = vld [vmem:[%s12182_s9 + $0x248] sm:$0xff]   ;;  %v7124_v23 = vrot.slane %v13639_v55, %v12236_v38  ;;  %v7132_v29 = vrot.slane %v13639_v55, %v7099_v61  ;;  %v7120_v4 = vrot.slane %v13639_v55, %v12230_v34 }
 0xf04   : > { %v8170_v16 = vmax.f32 %v7932_v37, 0.0  ;;  %v8172_v17 = vmax.f32 %v7975_v11, 0.0  ;;  %v8185_v1 = vpack.c.bf16 %v8169_v21, %v8153_v25  ;;  %v8187_v5 = vpack.c.bf16 %v8171_v13, %v8155_v51  ;;  %v11301_v26 = vld [vmem:[%s12182_s9 + $0x2c8] sm:$0xff]   ;;  %v11304_v38 = vld [vmem:[%s12182_s9 + $0x240] sm:$0xff]  }
 0xf05   : > { %v7128_v62 = vrot.slane %v13639_v55, %v13834_v19  ;;  %v11303_v10 = vld [vmem:[%s12182_s9 + $0x288] sm:$0xff]   ;;  %v11305_v61 = vld [vmem:[%s12182_s9 + $0x2c0] sm:$0xff]  }
 0xf06   : > { %v8186_v45 = vpack.c.bf16 %v8170_v16, %v8154_v59  ;;  %v8188_v24 = vpack.c.bf16 %v8172_v17, %v8156_v7  ;;  %10580 = vmatpush3.bf16.msra.mxu1 %v11274_v44  ;;  %10602 = vmatpush3.bf16.msra.mxu0 %v11275_v6  ;;  %v11306_v17 = vld [vmem:[%s12182_s9 + $0x200] sm:$0xff]  }
 0xf07   : > { %10609 = vmatprep.subr.bf16.mxu1 %v11276_v28  ;;  %10631 = vmatprep.subr.bf16.mxu0 %v11277_v22  ;;  %v11307_v25 = vld [vmem:[%s12182_s9 + $0x280] sm:$0xff]  }
 0xf08   : > { %9342 = vmatprep.mubr.bf16.mxu1 %v8186_v45  ;;  %9383 = vmatprep.mubr.bf16.mxu0 %v8188_v24  ;;  %v11308_v24 = vld [vmem:[%s12182_s9 + $0x378] sm:$0xff]  }
 0xf09   : > { %9343 = vmatmul.mubr.bf16.vlgmr.msra.gmra.mxu1 %v8185_v1  ;;  %9384 = vmatmul.mubr.bf16.vlgmr.msra.gmra.mxu0 %v8187_v5 }
 0xf0a   : > { %10610 = vmatpush3.bf16.msra.mxu1 %v11278_v14  ;;  %10632 = vmatpush3.bf16.msra.mxu0 %v11279_v50  ;;  %v11309_v14 = vld [vmem:[%s12182_s9 + $0x3f8] sm:$0xff]  }
 0xf0b   : > { %10611 = vmatprep.subr.bf16.mxu1 %v11280_v57  ;;  %10633 = vmatprep.subr.bf16.mxu0 %v11281_v58 }
 0xf0e   : > { %10612 = vmatpush3.bf16.msra.mxu1 %v11282_v3  ;;  %10634 = vmatpush3.bf16.msra.mxu0 %v11283_v0 }
 0xf0f   : > { %10613 = vmatprep.subr.bf16.mxu1 %v11284_v20  ;;  %10635 = vmatprep.subr.bf16.mxu0 %v11285_v8  ;;  %v11310_v8 = vld [vmem:[%s12182_s9 + $0x338] sm:$0xff]  }
 0xf12   : > { %10614 = vmatpush3.bf16.msra.mxu1 %v11286_v18  ;;  %10636 = vmatpush3.bf16.msra.mxu0 %v11287_v43  ;;  %v11311_v18 = vld [vmem:[%s12182_s9 + $0x3b8] sm:$0xff]  }
 0xf13   : > { %10615 = vmatprep.subr.bf16.mxu1 %v11288_v39  ;;  %10637 = vmatprep.subr.bf16.mxu0 %v11289_v42  ;;  %v11312_v42 = vld [vmem:[%s12182_s9 + $0x370] sm:$0xff]  }
 0xf16   : > { %10616 = vmatpush3.bf16.msra.mxu1 %v11290_v52  ;;  %10638 = vmatpush3.bf16.msra.mxu0 %v11291_v36  ;;  %v11313_v52 = vld [vmem:[%s12182_s9 + $0x3f0] sm:$0xff]  }
 0xf17   : > { %10617 = vmatprep.subr.bf16.mxu1 %v11292_v60  ;;  %10639 = vmatprep.subr.bf16.mxu0 %v11293_v40  ;;  %v11314_v36 = vld [vmem:[%s12182_s9 + $0x330] sm:$0xff]   ;;  %v11316_v40 = vld [vmem:[%s12182_s9 + $0x368] sm:$0xff]  }
 0xf18   : > { %v11315_v60 = vld [vmem:[%s12182_s9 + $0x3b0] sm:$0xff]  }
 0xf1a   : > { %10618 = vmatpush3.bf16.msra.mxu1 %v11294_v56  ;;  %10640 = vmatpush3.bf16.msra.mxu0 %v11295_v48  ;;  %v11317_v56 = vld [vmem:[%s12182_s9 + $0x3e8] sm:$0xff]  }
 0xf1b   : > { %v8011_v32 = vpop.f32.mrf.mxu1  ;;  %v8054_v53 = vpop.f32.mrf.mxu0  ;;  %10619 = vmatprep.subr.bf16.mxu1 %v11296_v47  ;;  %10641 = vmatprep.subr.bf16.mxu0 %v11297_v15  ;;  %v11318_v48 = vld [vmem:[%s12182_s9 + $0x328] sm:$0xff]   ;;  %v11320_v15 = vld [vmem:[%s12182_s9 + $0x360] sm:$0xff]  }
 0xf1c   : > { %v8012_v19 = vadd.f32 %v8011_v32, %v7120_v4  ;;  %v8055_v28 = vadd.f32 %v8054_v53, %v7128_v62  ;;  %v11319_v47 = vld [vmem:[%s12182_s9 + $0x3a8] sm:$0xff]   ;;  %v11323_v32 = vld [vmem:[%s12182_s9 + $0x3a0] sm:$0xff]   ;;  %v11324_v53 = vld [vmem:[%s12182_s9 + $0x358] sm:$0xff]  }
 0xf1d   : > { %v8013_v30 = vpop.f32.mrf.mxu1  ;;  %v8056_v49 = vpop.f32.mrf.mxu0 }
 0xf1e   : > { %10620 = vmatpush3.bf16.msra.mxu1 %v11298_v27  ;;  %10642 = vmatpush3.bf16.msra.mxu0 %v11299_v41  ;;  %v8014_v44 = vadd.f32 %v8013_v30, %v7124_v23  ;;  %v8057_v6 = vadd.f32 %v8056_v49, %v7132_v29  ;;  %v8157_v58 = vmax.f32 %v8012_v19, 0.0  ;;  %v8159_v3 = vmax.f32 %v8055_v28, 0.0  ;;  %v11321_v27 = vld [vmem:[%s12182_s9 + $0x3e0] sm:$0xff]   ;;  %v11331_v30 = vld [vmem:[%s12182_s9 + $0x390] sm:$0xff]   ;;  %v11335_v19 = vld [vmem:[%s12182_s9 + $0x388] sm:$0xff]  }
 0xf1f   : > { %v8015_v37 = vpop.f32.mrf.mxu1  ;;  %v8058_v11 = vpop.f32.mrf.mxu0  ;;  %10621 = vmatprep.subr.bf16.mxu1 %v11300_v9  ;;  %10643 = vmatprep.subr.bf16.mxu0 %v11301_v26  ;;  %v11322_v41 = vld [vmem:[%s12182_s9 + $0x320] sm:$0xff]   ;;  %v11325_v9 = vld [vmem:[%s12182_s9 + $0x3d8] sm:$0xff]  }
 0xf20   : > { %v8016_v21 = vadd.f32 %v8015_v37, %v7120_v4  ;;  %v8059_v13 = vadd.f32 %v8058_v11, %v7128_v62  ;;  %v8158_v50 = vmax.f32 %v8014_v44, 0.0  ;;  %v8160_v1 = vmax.f32 %v8057_v6, 0.0  ;;  %v11326_v26 = vld [vmem:[%s12182_s9 + $0x318] sm:$0xff]   ;;  %v11329_v4 = vld [vmem:[%s12182_s9 + $0x3d0] sm:$0xff]   ;;  %v11333_v37 = vld [vmem:[%s12182_s9 + $0x3c8] sm:$0xff]  }
 0xf21   : > { %v8017_v22 = vpop.f32.mrf.mxu1  ;;  %v8060_v59 = vpop.f32.mrf.mxu0  ;;  %v11330_v62 = vld [vmem:[%s12182_s9 + $0x310] sm:$0xff]   ;;  %v7140_v11 = vrot.slane %v13639_v55, %v7107_v35  ;;  %v7144_v44 = vrot.slane %v13639_v55, %v7111_v12 }
 0xf22   : > { %v8018_v7 = vadd.f32 %v8017_v22, %v7124_v23  ;;  %v8061_v16 = vadd.f32 %v8060_v59, %v7132_v29  ;;  %10622 = vmatpush3.bf16.msra.mxu1 %v11302_v54  ;;  %10644 = vmatpush3.bf16.msra.mxu0 %v11303_v10  ;;  %v8173_v51 = vmax.f32 %v8016_v21, 0.0  ;;  %v8175_v45 = vmax.f32 %v8059_v13, 0.0  ;;  %v11327_v23 = vld [vmem:[%s12182_s9 + $0x398] sm:$0xff]   ;;  %v11328_v29 = vld [vmem:[%s12182_s9 + $0x350] sm:$0xff]   ;;  %v11332_v10 = vld [vmem:[%s12182_s9 + $0x348] sm:$0xff]  }
 0xf23   : > { %10623 = vmatprep.subr.bf16.mxu1 %v11304_v38  ;;  %10645 = vmatprep.subr.bf16.mxu0 %v11305_v61  ;;  %v7148_v38 = vrot.slane %v13639_v55, %v7115_v2  ;;  %v7136_v61 = vrot.slane %v13639_v55, %v7103_v31  ;;  %v11334_v13 = vld [vmem:[%s12182_s9 + $0x308] sm:$0xff]   ;;  %v11336_v2 = vld [vmem:[%s12182_s9 + $0x340] sm:$0xff]  }
 0xf24   : > { %v8174_v5 = vmax.f32 %v8018_v7, 0.0  ;;  %v8176_v57 = vmax.f32 %v8061_v16, 0.0  ;;  %v8189_v43 = vpack.c.bf16 %v8173_v51, %v8157_v58  ;;  %v8191_v39 = vpack.c.bf16 %v8175_v45, %v8159_v3  ;;  %v11337_v22 = vld [vmem:[%s12182_s9 + $0x3c0] sm:$0xff]  }
 0xf25   : > { %v11338_v45 = vld [vmem:[%s12182_s9 + $0x300] sm:$0xff]  }
 0xf26   : > { %v8190_v0 = vpack.c.bf16 %v8174_v5, %v8158_v50  ;;  %v8192_v20 = vpack.c.bf16 %v8176_v57, %v8160_v1  ;;  %10624 = vmatpush3.bf16.msra.mxu1 %v11306_v17  ;;  %10646 = vmatpush3.bf16.msra.mxu0 %v11307_v25 }
 0xf27   : > { %10653 = vmatprep.subr.bf16.mxu1 %v11308_v24  ;;  %10675 = vmatprep.subr.bf16.mxu0 %v11309_v14  ;;  %v11339_v24 = vld [vmem:[%s12182_s9 + $0x380] sm:$0xff]  }
 0xf28   : > { %9424 = vmatprep.mubr.bf16.mxu1 %v8190_v0  ;;  %9465 = vmatprep.mubr.bf16.mxu0 %v8192_v20 }
 0xf29   : > { %9425 = vmatmul.mubr.bf16.vlgmr.msra.gmra.mxu1 %v8189_v43  ;;  %9466 = vmatmul.mubr.bf16.vlgmr.msra.gmra.mxu0 %v8191_v39 }
 0xf2a   : > { %10654 = vmatpush3.bf16.msra.mxu1 %v11310_v8  ;;  %10676 = vmatpush3.bf16.msra.mxu0 %v11311_v18 }
 0xf2b   : > { %10655 = vmatprep.subr.bf16.mxu1 %v11312_v42  ;;  %10677 = vmatprep.subr.bf16.mxu0 %v11313_v52 }
 0xf2e   : > { %10656 = vmatpush3.bf16.msra.mxu1 %v11314_v36  ;;  %10678 = vmatpush3.bf16.msra.mxu0 %v11315_v60 }
 0xf2f   : > { %10657 = vmatprep.subr.bf16.mxu1 %v11316_v40  ;;  %10679 = vmatprep.subr.bf16.mxu0 %v11317_v56 }
 0xf32   : > { %10658 = vmatpush3.bf16.msra.mxu1 %v11318_v48  ;;  %10680 = vmatpush3.bf16.msra.mxu0 %v11319_v47 }
 0xf33   : > { %10659 = vmatprep.subr.bf16.mxu1 %v11320_v15  ;;  %10681 = vmatprep.subr.bf16.mxu0 %v11321_v27 }
 0xf36   : > { %10660 = vmatpush3.bf16.msra.mxu1 %v11322_v41  ;;  %10682 = vmatpush3.bf16.msra.mxu0 %v11323_v32 }
 0xf37   : > { %10661 = vmatprep.subr.bf16.mxu1 %v11324_v53  ;;  %10683 = vmatprep.subr.bf16.mxu0 %v11325_v9 }
 0xf3a   : > { %10662 = vmatpush3.bf16.msra.mxu1 %v11326_v26  ;;  %10684 = vmatpush3.bf16.msra.mxu0 %v11327_v23  ;;  %v10235_v23 = vld [vmem:[%s782_s15] ss:$0 sm:$0xff]  ;;  %s13838_s15 = sld [smem:[#allocation37_spill]] (!%p10366_p2) }
 0xf3b   : > { %v8097_v49 = vpop.f32.mrf.mxu1  ;;  %v8140_v54 = vpop.f32.mrf.mxu0  ;;  %10663 = vmatprep.subr.bf16.mxu1 %v11328_v29  ;;  %10685 = vmatprep.subr.bf16.mxu0 %v11329_v4 }
 0xf3c   : > { %v8098_v16 = vadd.f32 %v8097_v49, %v7136_v61  ;;  %v8141_v12 = vadd.f32 %v8140_v54, %v7144_v44 }
 0xf3d   : > { %v8099_v6 = vpop.f32.mrf.mxu1  ;;  %v8142_v21 = vpop.f32.mrf.mxu0 }
 0xf3e   : > { %10664 = vmatpush3.bf16.msra.mxu1 %v11330_v62  ;;  %10686 = vmatpush3.bf16.msra.mxu0 %v11331_v30  ;;  %v8100_v59 = vadd.f32 %v8099_v6, %v7140_v11  ;;  %v8143_v31 = vadd.f32 %v8142_v21, %v7148_v38  ;;  %v8161_v3 = vmax.f32 %v8098_v16, 0.0  ;;  %v8163_v0 = vmax.f32 %v8141_v12, 0.0 }
 0xf3f   : > { %v8101_v28 = vpop.f32.mrf.mxu1  ;;  %v8144_v35 = vpop.f32.mrf.mxu0  ;;  %10665 = vmatprep.subr.bf16.mxu1 %v11332_v10  ;;  %10687 = vmatprep.subr.bf16.mxu0 %v11333_v37 }
 0xf40   : > { %v8102_v7 = vadd.f32 %v8101_v28, %v7136_v61  ;;  %v8145_v33 = vadd.f32 %v8144_v35, %v7144_v44  ;;  %v8162_v1 = vmax.f32 %v8100_v59, 0.0  ;;  %v8164_v5 = vmax.f32 %v8143_v31, 0.0 }
 0xf41   : > { %v8103_v55 = vpop.f32.mrf.mxu1  ;;  %v8146_v17 = vpop.f32.mrf.mxu0 }
 0xf42   : > { %v8104_v25 = vadd.f32 %v8103_v55, %v7140_v11  ;;  %v8147_v51 = vadd.f32 %v8146_v17, %v7148_v38  ;;  %10666 = vmatpush3.bf16.msra.mxu1 %v11334_v13  ;;  %10688 = vmatpush3.bf16.msra.mxu0 %v11335_v19  ;;  %v8177_v14 = vmax.f32 %v8102_v7, 0.0  ;;  %v8179_v50 = vmax.f32 %v8145_v33, 0.0 }
 0xf43   : > { %10667 = vmatprep.subr.bf16.mxu1 %v11336_v2  ;;  %10689 = vmatprep.subr.bf16.mxu0 %v11337_v22 }
 0xf44   : > { %v8178_v57 = vmax.f32 %v8104_v25, 0.0  ;;  %v8180_v58 = vmax.f32 %v8147_v51, 0.0  ;;  %v8193_v18 = vpack.c.bf16 %v8177_v14, %v8161_v3  ;;  %v8195_v43 = vpack.c.bf16 %v8179_v50, %v8163_v0 }
 0xf46   : > { %v8194_v20 = vpack.c.bf16 %v8178_v57, %v8162_v1  ;;  %v8196_v8 = vpack.c.bf16 %v8180_v58, %v8164_v5  ;;  %10668 = vmatpush3.bf16.msra.mxu1 %v11338_v45  ;;  %10690 = vmatpush3.bf16.msra.mxu0 %v11339_v24 }
 0xf48   : > { %9506 = vmatprep.mubr.bf16.mxu1 %v8194_v20  ;;  %9547 = vmatprep.mubr.bf16.mxu0 %v8196_v8 }
 0xf49   : > { %9507 = vmatmul.mubr.bf16.vlgmr.msra.gmra.mxu1 %v8193_v18  ;;  %9548 = vmatmul.mubr.bf16.vlgmr.msra.gmra.mxu0 %v8195_v43 }
 0xfa9   : > { %v10537_v39 = vpop.f32.mrf.mxu1  ;;  %v10559_v42 = vpop.f32.mrf.mxu0 }
 0xfab   : > { %v10538_v52 = vpop.f32.mrf.mxu1  ;;  %v10560_v36 = vpop.f32.mrf.mxu0 }
 0xfac   : > { %v10539_v26 = vadd.f32 %v10538_v52, %v10537_v39  ;;  %v10561_v10 = vadd.f32 %v10560_v36, %v10559_v42 }
 0xfad   : > { %v10540_v60 = vpop.f32.mrf.mxu1  ;;  %v10562_v40 = vpop.f32.mrf.mxu0 }
 0xfae   : > { %v9263_v30 = vadd.f32 %v10539_v26, %v10235_v23 }
 0xfaf   : > { %v10541_v56 = vpop.f32.mrf.mxu1  ;;  %v10563_v48 = vpop.f32.mrf.mxu0 }
 0xfb0   : > { %v10542_v49 = vadd.f32 %v10541_v56, %v10540_v60  ;;  %v9304_v38 = vadd.f32 %v10561_v10, %v9263_v30  ;;  %v10564_v6 = vadd.f32 %v10563_v48, %v10562_v40 }
 0xfb2   : > { %v9266_v61 = vadd.f32 %v10542_v49, %v10235_v23  ;;  %v10365_v49 = vld [vmem:[%s788_s29] ss:$0 sm:$0xff] }
 0xfb4   : > { %v9307_v28 = vadd.f32 %v10564_v6, %v9266_v61 }
 0xfc9   : > { %v10581_v47 = vpop.f32.mrf.mxu1  ;;  %v10603_v15 = vpop.f32.mrf.mxu0 }
 0xfcb   : > { %v10582_v27 = vpop.f32.mrf.mxu1  ;;  %v10604_v41 = vpop.f32.mrf.mxu0 }
 0xfcc   : > { %v10583_v37 = vadd.f32 %v10582_v27, %v10581_v47  ;;  %v10605_v35 = vadd.f32 %v10604_v41, %v10603_v15 }
 0xfcd   : > { %v10584_v32 = vpop.f32.mrf.mxu1  ;;  %v10606_v53 = vpop.f32.mrf.mxu0 }
 0xfce   : > { %v9345_v21 = vadd.f32 %v10583_v37, %v9304_v38 }
 0xfcf   : > { %v10585_v9 = vpop.f32.mrf.mxu1  ;;  %v10607_v29 = vpop.f32.mrf.mxu0 }
 0xfd0   : > { %v10586_v13 = vadd.f32 %v10585_v9, %v10584_v32  ;;  %v9386_v59 = vadd.f32 %v10605_v35, %v9345_v21  ;;  %v10608_v33 = vadd.f32 %v10607_v29, %v10606_v53 }
 0xfd2   : > { %v9348_v31 = vadd.f32 %v10586_v13, %v9307_v28 }
 0xfd4   : > { %v9389_v25 = vadd.f32 %v10608_v33, %v9348_v31 }
 0xfe9   : > { %v10625_v4 = vpop.f32.mrf.mxu1  ;;  %v10647_v62 = vpop.f32.mrf.mxu0 }
 0xfeb   : > { %v10626_v54 = vpop.f32.mrf.mxu1  ;;  %v10648_v11 = vpop.f32.mrf.mxu0 }
 0xfec   : > { %v10627_v2 = vadd.f32 %v10626_v54, %v10625_v4  ;;  %v10649_v51 = vadd.f32 %v10648_v11, %v10647_v62  ;;  %v10364_v62 = vld [vmem:[%s785_s1] ss:$0 sm:$0xff] }
 0xfed   : > { %v10628_v44 = vpop.f32.mrf.mxu1  ;;  %v10650_v19 = vpop.f32.mrf.mxu0 }
 0xfee   : > { %v9427_v16 = vadd.f32 %v10627_v2, %v9386_v59 }
 0xfef   : > { %v10629_v22 = vpop.f32.mrf.mxu1  ;;  %v10651_v7 = vpop.f32.mrf.mxu0 }
 0xff0   : > { %v10630_v12 = vadd.f32 %v10629_v22, %v10628_v44  ;;  %v9468_v14 = vadd.f32 %v10649_v51, %v9427_v16  ;;  %v10652_v58 = vadd.f32 %v10651_v7, %v10650_v19 }
 0xff2   : > { %v9430_v50 = vadd.f32 %v10630_v12, %v9389_v25 }
 0xff4   : > { %v9471_v18 = vadd.f32 %v10652_v58, %v9430_v50 }
0x1009   : > { %v10669_v55 = vpop.f32.mrf.mxu1  ;;  %v10691_v17 = vpop.f32.mrf.mxu0 }
0x100b   : > { %v10670_v45 = vpop.f32.mrf.mxu1  ;;  %v10692_v24 = vpop.f32.mrf.mxu0 }
0x100c   : > { %v10671_v1 = vadd.f32 %v10670_v45, %v10669_v55  ;;  %v10693_v0 = vadd.f32 %v10692_v24, %v10691_v17 }
0x100d   : > { %v10672_v5 = vpop.f32.mrf.mxu1  ;;  %v10694_v57 = vpop.f32.mrf.mxu0 }
0x100e   : > { %v9509_v3 = vadd.f32 %v10671_v1, %v9468_v14 }
0x100f   : > { %v10673_v20 = vpop.f32.mrf.mxu1  ;;  %v10695_v8 = vpop.f32.mrf.mxu0 }
0x1010   : > { %v9550_v43 = vadd.f32 %v10693_v0, %v9509_v3  ;;  %v10674_v39 = vadd.f32 %v10673_v20, %v10672_v5  ;;  %v10696_v52 = vadd.f32 %v10695_v8, %v10694_v57 }
0x1012   : > { %v9512_v42 = vadd.f32 %v10674_v39, %v9471_v18  ;;  %v9556_v36 = vadd.f32 %v9550_v43, %v13413_v63 }
0x1014   : > { %v9553_v60 = vadd.f32 %v10696_v52, %v9512_v42  ;;  %9558 = vadd.xlane.f32.xlu0 %v9556_v36 }
0x1016   : > { %v9557_v40 = vadd.f32 %v9553_v60, %v13415_v46 }
0x1018   : > { %9560 = vadd.xlane.f32.xlu1 %v9557_v40 }
0x109d   : > { %v9559_v56 = vpop.xlane.xlu0 %9558 }
0x109e   : > { %v9562_v48 = vmul.f32 0.0078125, %v9559_v56 }
0x10a0   : > { %v9564_v47 = vsub.f32 %v9556_v36, %v9562_v48 }
0x10a1   : > { %v9561_v15 = vpop.xlane.xlu1 %9560 }
0x10a2   : > { %v9563_v27 = vmul.f32 0.0078125, %v9561_v15  ;;  %v9566_v41 = vmul.f32 %v9564_v47, %v9564_v47 }
0x10a4   : > { %v9565_v32 = vsub.f32 %v9557_v40, %v9563_v27  ;;  %9568 = vadd.xlane.f32.xlu0 %v9566_v41 }
0x10a6   : > { %v9567_v53 = vmul.f32 %v9565_v32, %v9565_v32 }
0x10a8   : > { %9570 = vadd.xlane.f32.xlu1 %v9567_v53 }
0x112d   : > { %v9569_v9 = vpop.xlane.xlu0 %9568 }
0x112e   : > { %v9572_v26 = vmul.f32 0.0078125, %v9569_v9 }
0x1130   : > { %v9574_v63 = vadd.f32 1e-05, %v9572_v26 }
0x1131   : > { %v9571_v23 = vpop.xlane.xlu1 %9570 }
0x1132   : > { %11472 = vrsqrt.f32 %v9574_v63  ;;  %v9573_v29 = vmul.f32 0.0078125, %v9571_v23 }
0x1134   : > { %v9575_v46 = vadd.f32 1e-05, %v9573_v29 }
0x1136   : > { %11474 = vrsqrt.f32 %v9575_v46 }
0x113f   : > { %v11473_v4 = vpop.eup %11472 }
0x1140   : > { %v9578_v30 = vmul.f32 %v11473_v4, %v9564_v47 }
0x1142   : > { %v9587_v54 = vmul.f32 %v10364_v62, %v9578_v30 }
0x1143   : > { %v11475_v10 = vpop.eup %11474 }
0x1144   : > { %v9596_v37 = vadd.f32 %v10365_v49, %v9587_v54  ;;  %v9579_v11 = vmul.f32 %v11475_v10, %v9565_v32 }
0x1146   : > { %9598 = vst [vmem:[#allocation2] sm:$0xff] %v9596_v37  ;;  %v9588_v38 = vmul.f32 %v10364_v62, %v9579_v11  ;;  %9603 = sbr.rel (%p10366_p2) target bundleno = 4635 (0x121b), region = 116 }
0x1148   : > { %v9597_v61 = vadd.f32 %v10365_v49, %v9588_v38 }
0x114a   : > { %9599 = vst [vmem:[#allocation2 + $0x8] sm:$0xff] %v9597_v61 }
0x114b   : > { %v11770_v44 = vmov 0.0   ;;  %vm11771_vm7 = vmmov 0   ;;  %v9605_v6 = vld [vmem:[#allocation3] sm:$0x1]  ;;  %v11772_v21 = vmov 0   ;;  %vm9688_vm9 = vcmask 122880  }
0x114c   : > { %11060 = vmatprep.subr.mxu0 %v11770_v44  ;;  %11064 = vmatprep.mubr.msk.f32.mxu0 %vm11771_vm7, %v11770_v44  ;;  %v9604_v13 = vld [vmem:[%s13838_s15] sm:$0x1] }
0x114d   : > { %11061 = vmatpush3.xpose.msra.mxu0 %v9597_v61  ;;  %11478 = vset.pattern.permute.xlu0 %v11772_v21 }
0x114e   : > { %11062 = vmatprep.subr.mxu0 %v11770_v44  ;;  %9608 = vperm.xlu0 %11478, %v9605_v6  }
0x1151   : > { %11063 = vmatpush3.xpose.msra.mxu0 %v9596_v37 }
0x1154   : > { %11065 = vmatmul.mubr.f32.vlgmr.msra.gmra.mxu0 %v9604_v13 }
0x11c9   : > { %v9609_v19 = vpop.permute.xlu0 %9608 }
0x11ca   : > { %v9614_v28 = vrot.slane %v9609_v19, %v12230_v34 }
0x1214   : > { %v9681_v35 = vpop.f32.mrf.mxu0 }
0x1215   : > { %v9682_v2 = vadd.f32 %v9681_v35, %v9614_v28 }
0x1216   : > { %v11066_v22 = vpop.f32.mrf.mxu0 }
0x1217   : > { %vm9685_vm8 = vcmp.ge.f32.partialorder %v9682_v2, 0.0  ;;  %v9686_v59 = vmul.f32 0.1, %v9682_v2 }
0x1219   : > { %v9687_v31 = vsel %vm9685_vm8, %v9682_v2, %v9686_v59 }
0x121a   : > { %9689 = vst.msk [vmem:[#allocation16] sm:$0x1] %vm9688_vm9, %v9687_v31 }
0x121b PF: > { %p11119_p8 = scmp.eq.s32.totalorder %s12000_s12, 1  ;;  %s11773_s18 = smov [#allocation16]  }
0x121c   : > { %s9697_s23 = sshll.u32 %s11773_s18, 4  ;;  %s9698_s23 = int_to_ptr.vmem [resolvable:$true] %s9697_s23 }
0x121d   : > { %s11673_s28 = scalar_lea.vmem %s9698_s23, 16  ;;  %s11679_s1 = scalar_lea.vmem %s9698_s23, 32 }
0x121e   : > { %p11674_p3 = scmp.ne.s32.totalorder %s9698_s23, %s11673_s28  ;;  %p11680_p0 = scmp.lt.s32.totalorder %s9698_s23, %s9698_s23 }
0x121f   : > { %p11681_p4 = scmp.lt.s32.totalorder %s11679_s1, %s11673_s28 }
0x1220   : > { %p11675_p10 = pnand %p11674_p3, %p11119_p8 }
0x1221   : > { %p11682_p6 = por %p11681_p4, %p11680_p0 }
0x1222   : > { %p11676_p11 = pneg %p11675_p10 }
0x1224   : > { %p11683_p7 = pnand %p11682_p6, %p11676_p11 }
0x1226   : > { %11686 = shalt.err (!%p11683_p7)
}
0x1227   : > { %s13839_s7 = sld [smem:[#allocation38_spill]] }
0x122d   : > { %11090 = dma.vmem_to_hbm [thread:$0]  (%p11119_p8), %s9698_s23, 16, %s13839_s7, [#allocation6]  }
0x122e   : > { %11730 = dma.done.wait (%p11119_p8), [#allocation6], 16  }
0x122f   : > { %11732 = vsyncadd (%p11119_p8), [#allocation6], 4294967280 }
0x1230 PF: > { %s13840_s23 = sld [smem:[#allocation23_spill]]  ;;  %s13843_s20 = smov %s11739_s21 }
0x1231   : > { %s13841_s3 = sld [smem:[#allocation22_spill]] }
0x1232   : > { %s13842_s22 = sld [smem:[#allocation24_spill]] }
0x1236   : > { %p35_p9 = scmp.ge.s32.totalorder %s13840_s23, 4  }
0x1237   : > { %s13844_s21 = smov %s13841_s3 }
0x1238   :  { %37 = sbr.rel (!%p35_p9) target bundleno = 23 (0x17), region = 207 }
0x123d   :  { %9710 = vsyncpa [#allocation5], 1 }
0x123e   :  { %9712 = vsyncpa [#allocation5 + $0x1], 1 }
0x123f   :  { %9713 = vsyncpa [#allocation8], 1 }
0x1240   :  { %9715 = vsyncpa [#allocation8 + $0x1], 1 }
0x1241   :  { %9716 = vsyncpa [#allocation11], 1 }
0x1242   :  { %9718 = vsyncpa [#allocation11 + $0x1], 1 }
0x1243   :  { %9719 = vsyncpa [#allocation14], 1 }
0x1244   :  { %9721 = vsyncpa [#allocation14 + $0x1], 1 }
0x1245   :  { %9722 = vsyncpa [#allocation6], 1 }
0x1246   :  { %9724 = vsyncpa [#allocation6 + $0x1], 1 }

</bundles_post_ra>
